<compile_context>
chip_gen: v6e
topology: v6e:2x2x1
jax: 0.10.0
libtpu: 0.0.40
codegen_flags: <defaults>
</compile_context>

<pallas_src>
import functools
import math

import numpy as np
import jax
import jax.numpy as jnp
from jax import lax
from jax.experimental import pallas as pl
from jax.experimental.pallas import tpu as pltpu


# Dispatch: use the flattened one-matmul ("kron") path only while its selection
# matrix is genuinely small, or no larger than the real input+output traffic
# (capped).  Otherwise the separable two-matmul path (KB-scale Sh/Sw) wins.
_KRON_SEL_SMALL_BYTES = 4 * 1024 * 1024
_KRON_SEL_MAX_BYTES = 32 * 1024 * 1024


def _vmem_limit_bytes():
    """Per-generation VMEM limit (v7x: 64 MiB/TC; v5e/v6e: 128 MiB)."""
    cap = 64 * 1024 * 1024                      # conservative default (v7x floor)
    try:
        info = pltpu.get_tpu_info()
        cap = int(getattr(info, "vmem_capacity_bytes", cap) or cap)
    except Exception:
        pass
    return max(32 * 1024 * 1024, min((cap * 3) // 4, 96 * 1024 * 1024))


def _nearest_src(out_size, in_size):
    """PyTorch 'nearest' rule: src = floor(out_idx * in / out), clamped."""
    return np.minimum((np.arange(out_size) * in_size) // out_size, in_size - 1)


def _one_hot_np(out_size, in_size):
    """One-hot (out_size, in_size) selection matrix for the nearest rule."""
    src = _nearest_src(out_size, in_size)
    m = np.zeros((out_size, in_size), dtype=np.float32)
    m[np.arange(out_size), src] = 1.0
    return m


# --------------------------------------------------------------------------- #
# Kron path: one lane-dense selection matmul over flattened planes.
# --------------------------------------------------------------------------- #
def _upsample_sel_kernel(x_ref, sel_ref, o_ref, *, precision):
    # x_ref:   (B, HW_in)   sel_ref: (HW_in, TN)   o_ref: (B, TN)
    x = x_ref[...]
    if not jnp.issubdtype(x_ref.dtype, jnp.floating):
        # TODO(synk): integer inputs take the f32 MXU path; exact for |v| < 2**24.
        x = x.astype(jnp.float32)
    o_ref[...] = jnp.dot(
        x, sel_ref[...],
        preferred_element_type=jnp.float32,
        precision=precision,
    ).astype(o_ref.dtype)


def _choose_kron_tiles(nc, hw_in, hw_out, itemsize, tile_budget):
    """Pick (B planes, TN lane tile) so the x+sel+out tiles fit `tile_budget`."""
    def tile_bytes(b, tn):
        return (b * hw_in + hw_in * tn + b * tn) * itemsize

    # Candidate lane tiles: full flattened plane first, then multiples of 128.
    if hw_out <= 128:
        tn_opts = [hw_out]
    else:
        tn_opts = [hw_out]
        t = (hw_out // 2) // 128 * 128
        while t >= 128:
            tn_opts.append(t)
            t = (t // 2) // 128 * 128
        if tn_opts[-1] != 128:
            tn_opts.append(128)

    # 1) Keep every plane resident (grid_i == 1): Sel streamed exactly once.
    for tn in tn_opts:
        if tile_bytes(nc, tn) <= tile_budget:
            return nc, tn
    # 2) Otherwise also shrink the plane batch (multiple of 8: sublane rule).
    for tn in tn_opts:
        avail = tile_budget // itemsize - hw_in * tn
        if avail <= 0:
            continue
        b = min(nc, avail // (hw_in + tn))
        b = (b // 8) * 8
        if b >= 8:
            return b, tn
    # Last resort: minimal legal tiles (may exceed the soft budget).
    return min(nc, 8), tn_opts[-1]


def _upsample_kron(x, h_out, w_out, mm_dtype, precision):
    n, c, h_in, w_in = x.shape
    nc = n * c
    hw_in, hw_out = h_in * w_in, h_out * w_out
    itemsize = np.dtype(mm_dtype).itemsize
    limit = _vmem_limit_bytes()
    b, tn = _choose_kron_tiles(nc, hw_in, hw_out, itemsize, limit // 3)

    # If the grid would collapse to (1, 1), split the lane axis so both v7x
    # TensorCores get work (one extra ~0.35us grid step elsewhere: harmless).
    if b == nc and tn == hw_out and hw_out >= 256:
        tn = ((hw_out // 2 + 127) // 128) * 128

    # Sel[h*Wi+w, ho*Wo+wo] = Sh[ho,h] * Sw[wo,w], built on device from the two
    # tiny one-hot factors (no O(HW_in*HW_out) host kron / host->device copy).
    sh_t = jnp.asarray(_one_hot_np(h_out, h_in).T, dtype=mm_dtype)   # (H_in, H_out)
    sw_t = jnp.asarray(_one_hot_np(w_out, w_in).T, dtype=mm_dtype)   # (W_in, W_out)
    sel = (sh_t[:, None, :, None] * sw_t[None, :, None, :]).reshape(hw_in, hw_out)

    x_flat = x.reshape(nc, hw_in)
    gi = pl.cdiv(nc, b)
    gj = pl.cdiv(hw_out, tn)

    # Grid-axis order: the operand whose block index changes in the inner loop
    # is re-DMA'd every step; put the cheaper re-fetch on the inner axis.
    sel_bytes = hw_in * hw_out * itemsize
    x_bytes = nc * hw_in * np.dtype(x.dtype).itemsize
    swap = (gi - 1) * sel_bytes > (gj - 1) * x_bytes

    if swap:
        grid = (gj, gi)
        x_map = lambda j, i: (i, 0)
        sel_map = lambda j, i: (0, j)
        out_map = lambda j, i: (i, j)
    else:
        grid = (gi, gj)
        x_map = lambda i, j: (i, 0)
        sel_map = lambda i, j: (0, j)
        out_map = lambda i, j: (i, j)

    cost = pl.CostEstimate(
        flops=2 * nc * hw_in * hw_out,
        transcendentals=0,
        bytes_accessed=int(x_bytes + nc * hw_out * np.dtype(x.dtype).itemsize
                           + sel_bytes),
    )
    kernel = functools.partial(_upsample_sel_kernel, precision=precision)
    out_flat = pl.pallas_call(
        kernel,
        out_shape=jax.ShapeDtypeStruct((nc, hw_out), x.dtype),
        grid_spec=pltpu.PrefetchScalarGridSpec(
            num_scalar_prefetch=0,
            grid=grid,
            in_specs=[
                pl.BlockSpec((b, hw_in), x_map),
                pl.BlockSpec((hw_in, tn), sel_map),
            ],
            out_specs=pl.BlockSpec((b, tn), out_map),
        ),
        compiler_params=pltpu.CompilerParams(
            dimension_semantics=("parallel", "parallel"),
            vmem_limit_bytes=limit,
        ),
        cost_estimate=cost,
    )(x_flat, sel)
    return out_flat.reshape(n, c, h_out, w_out)


# --------------------------------------------------------------------------- #
# Separable path: W-expansion matmul + per-plane H-expansion matmuls.
# --------------------------------------------------------------------------- #
def _upsample_sep_kernel(x_ref, swt_ref, sh_ref, o_ref, *, precision):
    # x_ref: (B, H_in, W_in)  swt_ref: (W_in, TW)  sh_ref: (H_out, H_in)
    # o_ref: (B, H_out, TW)
    b, h_in, w_in = x_ref.shape
    tw = swt_ref.shape[1]
    x = x_ref[...]
    if not jnp.issubdtype(x_ref.dtype, jnp.floating):
        x = x.astype(jnp.float32)
    mm_dtype = x.dtype
    # Width expansion: one lane-dense MXU matmul over every plane in the block.
    tmp = jnp.dot(x.reshape(b * h_in, w_in), swt_ref[...],
                  preferred_element_type=jnp.float32, precision=precision)
    tmp = tmp.astype(mm_dtype).reshape(b, h_in, tw)   # exact (one-hot copy)
    sh = sh_ref[...]
    # Height expansion: Sh is shared across planes -> static per-plane 2D dots
    # (no broadcast_to of Sh, no batched dot_general).  B is kept small.
    for bb in range(b):
        o_ref[bb, :, :] = jnp.dot(
            sh, tmp[bb], preferred_element_type=jnp.float32,
            precision=precision).astype(o_ref.dtype)


def _choose_sep_tiles(nc, h_in, w_in, h_out, w_out, itemsize, tile_budget):
    tw = w_out if w_out <= 512 else 512            # multiple of 128 or full dim
    per_plane = (itemsize * (h_in * w_in + h_out * tw)
                 + 4 * (h_in * tw + h_out * tw))   # f32 intermediates
    b = int(max(1, min(nc, 16, tile_budget // max(per_plane, 1))))
    return b, tw


def _upsample_separable(x, h_out, w_out, mm_dtype, precision):
    n, c, h_in, w_in = x.shape
    nc = n * c
    itemsize = np.dtype(mm_dtype).itemsize
    limit = _vmem_limit_bytes()
    b, tw = _choose_sep_tiles(nc, h_in, w_in, h_out, w_out, itemsize, limit // 3)

    sh = jnp.asarray(_one_hot_np(h_out, h_in), dtype=mm_dtype)       # (H_out, H_in)
    swt = jnp.asarray(_one_hot_np(w_out, w_in).T, dtype=mm_dtype)    # (W_in, W_out)
    x3 = x.reshape(nc, h_in, w_in)

    gi = pl.cdiv(nc, b)
    gj = pl.cdiv(w_out, tw)
    cost = pl.CostEstimate(
        flops=2 * nc * w_out * (h_in * w_in + h_out * h_in),
        transcendentals=0,
        bytes_accessed=int(nc * (h_in * w_in + h_out * w_out)
                           * np.dtype(x.dtype).itemsize),
    )
    kernel = functools.partial(_upsample_sep_kernel, precision=precision)
    out3 = pl.pallas_call(
        kernel,
        out_shape=jax.ShapeDtypeStruct((nc, h_out, w_out), x.dtype),
        grid_spec=pltpu.PrefetchScalarGridSpec(
            num_scalar_prefetch=0,
            grid=(gi, gj),
            in_specs=[
                pl.BlockSpec((b, h_in, w_in), lambda i, j: (i, 0, 0)),
                pl.BlockSpec((w_in, tw), lambda i, j: (0, j)),
                pl.BlockSpec((h_out, h_in), lambda i, j: (0, 0)),
            ],
            out_specs=pl.BlockSpec((b, h_out, tw), lambda i, j: (i, 0, j)),
        ),
        compiler_params=pltpu.CompilerParams(
            dimension_semantics=("parallel", "parallel"),
            vmem_limit_bytes=limit,
        ),
        cost_estimate=cost,
    )(x3, swt, sh)
    return out3.reshape(n, c, h_out, w_out)


# --------------------------------------------------------------------------- #
# Public wrapper: equivalent of Upsample(size, scale_factor, mode='nearest').
# --------------------------------------------------------------------------- #
def upsample_nearest(x, size=None, scale_factor=None):
    """Nearest-neighbour upsample of a (N, C, H, W) array (PyTorch index rule)."""
    n, c, h_in, w_in = x.shape
    if size is not None:
        if isinstance(size, int):
            h_out, w_out = size, size
        else:
            h_out, w_out = int(size[0]), int(size[1])
    else:
        assert scale_factor is not None, "need size or scale_factor"
        # Integer scale factors (the module's contract) reproduce PyTorch
        # exactly.  # TODO(synk): non-integer scale factors follow the
        # recompute_scale_factor rule, which can differ from PyTorch's default.
        h_out = int(math.floor(h_in * scale_factor))
        w_out = int(math.floor(w_in * scale_factor))

    floating = jnp.issubdtype(x.dtype, jnp.floating)
    mm_dtype = x.dtype if floating else jnp.float32
    itemsize = np.dtype(mm_dtype).itemsize
    # Pin f32 matmuls to HIGHEST so the one-hot copy is bit-exact (no silent
    # single-pass bf16 demotion); bf16 inputs are exact at default precision.
    precision = (lax.Precision.HIGHEST
                 if np.dtype(mm_dtype) == np.dtype(np.float32)
                 else lax.Precision.DEFAULT)

    sel_bytes = (h_in * w_in) * (h_out * w_out) * itemsize
    io_bytes = n * c * (h_in * w_in + h_out * w_out) * np.dtype(x.dtype).itemsize
    if sel_bytes <= max(_KRON_SEL_SMALL_BYTES, min(io_bytes, _KRON_SEL_MAX_BYTES)):
        return _upsample_kron(x, h_out, w_out, mm_dtype, precision)
    return _upsample_separable(x, h_out, w_out, mm_dtype, precision)


if __name__ == "__main__":
    key = jax.random.PRNGKey(0)
    N, C, H, W = 2, 4, 16, 16
    x = jax.random.normal(key, (N, C, H, W), dtype=jnp.float32)

    # Module configuration: Upsample(size=(32, 32), mode='nearest').
    size = (32, 32)
    out = jax.block_until_ready(upsample_nearest(x, size=size))

    hi = _nearest_src(size[0], H)
    wi = _nearest_src(size[1], W)
    ref = np.asarray(x)[:, :, hi, :][:, :, :, wi]
    np.testing.assert_allclose(np.asarray(out), ref, rtol=0, atol=0)
    assert out.shape == (N, C, size[0], size[1])

    # Same module configured with an integer scale_factor (2x) instead of size.
    out_sf = jax.block_until_ready(upsample_nearest(x, scale_factor=2))
    np.testing.assert_allclose(np.asarray(out_sf), ref, rtol=0, atol=0)

    # Keep the large-plane (separable) path covered at a tiny size.
    x2 = jax.random.normal(jax.random.PRNGKey(0), (1, 4, 8, 8), dtype=jnp.float32)
    out2 = jax.block_until_ready(
        _upsample_separable(x2, 20, 20, jnp.float32, lax.Precision.HIGHEST))
    hi2 = _nearest_src(20, 8)
    wi2 = _nearest_src(20, 8)
    ref2 = np.asarray(x2)[:, :, hi2, :][:, :, :, wi2]
    np.testing.assert_allclose(np.asarray(out2), ref2, rtol=0, atol=0)

    print("KERNEL_OK")
</pallas_src>

<mosaic_0001>
module attributes {stable_mosaic.version = 11 : i64} {
  func.func @_upsample_sel_kernel(%arg0: i32, %arg1: i32, %arg2: memref<8x256xf32, #tpu.memory_space<vmem>>, %arg3: memref<256x512xf32, #tpu.memory_space<vmem>>, %arg4: memref<8x512xf32, #tpu.memory_space<vmem>>) attributes {dimension_semantics = [#tpu.dimension_semantics<parallel>, #tpu.dimension_semantics<parallel>], iteration_bounds = array<i64: 1, 2>, scalar_prefetch = 0 : i64, scratch_operands = 0 : i64, tpu.core_type = #tpu.core_type<tc>, window_params = [{transform_indices = @transform_0, window_bounds = array<i64: 8, 256>}, {transform_indices = @transform_1, window_bounds = array<i64: 256, 512>}, {transform_indices = @transform_2, window_bounds = array<i64: 8, 512>}]} {
    %c0 = arith.constant 0 : index
    %c0_0 = arith.constant 0 : index
    %0 = vector.load %arg2[%c0, %c0_0] : memref<8x256xf32, #tpu.memory_space<vmem>>, vector<8x256xf32>
    %c0_1 = arith.constant 0 : index
    %c0_2 = arith.constant 0 : index
    %1 = vector.load %arg3[%c0_1, %c0_2] : memref<256x512xf32, #tpu.memory_space<vmem>>, vector<256x512xf32>
    %cst = arith.constant dense<0.000000e+00> : vector<8x512xf32>
    %2 = tpu.matmul %0, %1, %cst {dimension_numbers = #tpu.dot_dimension_numbers<[1], [0], [0], [1], [0, 0, 1, 1], [], []>, precision = #tpu.contract_precision<fp32>} : vector<8x256xf32>, vector<256x512xf32>, vector<8x512xf32> -> vector<8x512xf32>
    %c0_3 = arith.constant 0 : index
    %c0_4 = arith.constant 0 : index
    %3 = vector.load %arg4[%c0_3, %c0_4] : memref<8x512xf32, #tpu.memory_space<vmem>>, vector<8x512xf32>
    tpu.vector_store %arg4[%c0_3, %c0_4], %2 {strides = array<i32>} : memref<8x512xf32, #tpu.memory_space<vmem>>, vector<8x512xf32>,
    return
  }
  func.func @transform_0(%arg0: i32, %arg1: i32) -> (i32, i32) {
    %c0_i32 = arith.constant 0 : i32
    %c0_i32_0 = arith.constant 0 : i32
    return %arg0, %c0_i32 : i32, i32
  }
  func.func @transform_1(%arg0: i32, %arg1: i32) -> (i32, i32) {
    %c0_i32 = arith.constant 0 : i32
    %c0_i32_0 = arith.constant 0 : i32
    return %c0_i32, %arg1 : i32, i32
  }
  func.func @transform_2(%arg0: i32, %arg1: i32) -> (i32, i32) {
    %c0_i32 = arith.constant 0 : i32
    return %arg0, %arg1 : i32, i32
  }
}

</mosaic_0001>

<bundles_post_ra>
// kernel: tpu_custom_call.1
= control target key start
LH: loop header
LB: loop body
LE: loop exit
PB: predicated region body
PF: predicated region fallthrough
CT: control target
= control target key end

     0   :  { %7 = vsyncpa [#allocation3], 0  ;;  %s5962_s0 = inlined_call_operand.hbm [shape: f32[8,256], index: 0, kind: input, shape index: {}]   ;;  %s5963_s1 = inlined_call_operand.hbm [shape: f32[256,1024], index: 1, kind: input, shape index: {}]   ;;  %s5964_s2 = inlined_call_operand.hbm [shape: f32[8,1024], index: 2, kind: output, shape index: {}]  }
   0x1   :  { %8 = vsyncpa [#allocation6], 0 }
   0x2   :  { %10 = vsyncpa [#allocation6 + $0x1], 0 }
   0x3   :  { %11 = vsyncpa [#allocation4], 0 }
   0x4   :  { %13 = vsyncpa [#allocation4 + $0x1], 0  ;;  %s3269_s9 = smov 0   ;;  %s3271_s10 = smov 0  }
   0x5   :  { %s3273_s11 = smov 0   ;;  %s3275_s12 = smov 0  }
   0x6   :  { %s3277_s13 = smov 0   ;;  %s3279_s14 = smov 0  }
   0x7 LB: > { %s3013_s15 = sadd.s32 4294967295, %s3246_s14   ;;  %s3014_s16 = sadd.s32 4294967294, %s3246_s14   ;;  %s3246_s14 = sphi %s3279_s14, %s19_s14   ;;  %s3242_s13 = sphi %s3277_s13, %s7169_s13   ;;  %s3238_s12 = sphi %s3275_s12, %s7168_s12   ;;  %s3234_s11 = sphi %s3273_s11, %s7167_s11   ;;  %s3230_s10 = sphi %s3271_s10, %s7166_s10   ;;  %s3226_s9 = sphi %s3269_s9, %s7165_s9  }
   0x8   : > { %s64_s17 = sadd.s32 1, %s3234_s11  ;;  %p71_p0 = scmp.ne.s32.totalorder %s3234_s11, %s3230_s10 }
   0x9   : > { %p72_p1 = scmp.eq.s32.totalorder %s3246_s14, 0  ;;  %p77_p2 = scmp.ne.s32.totalorder %s3230_s10, %s3226_s9 }
   0xa   : > { %p3307_p3 = scmp.eq.s32.totalorder %s3013_s15, 0  ;;  %p103_p4 = scmp.eq.s32.totalorder %s3013_s15, 1 }
   0xb   : > { %p3311_p5 = por %p72_p1, %p71_p0  ;;  %p109_p6 = scmp.eq.s32.totalorder %s3014_s16, 1 }
   0xc   : > { %p3317_p7 = por %p3307_p3, %p77_p2  ;;  %p3321_p8 = por %p103_p4, %p71_p0 }
   0xd   : > { %p3325_p9 = por %p109_p6, %p77_p2  ;;  %p3015_p10 = scmp.ge.s32.totalorder %s3246_s14, 1 }
   0xe   : > { %s6385_s20 = scalar_select %p3317_p7, 1, 0 }
   0xf   : > { %s6386_s21 = scalar_select %p3321_p8, 1, 0 }
  0x10   : > { %s6387_s22 = scalar_select %p3325_p9, 1, 0 }
  0x11   : > { %p116_p11 = scmp.lt.s32.totalorder %s3246_s14, 3  ;;  %s3248_s24 = smov [#allocation2]  }
  0x12   : > { %s132_s25 = sshll.u32 %s3248_s24, 4  ;;  %p3053_p1 = scmp.lt.s32.totalorder %s3246_s14, 2  ;;  %s133_s25 = int_to_ptr.vmem [resolvable:$true] %s132_s25 }
  0x13   : > { %p3332_p13 = pnand %p3015_p10, %p116_p11  ;;  %s28_s28 = sadd.s32 1, %s3242_s13 }
  0x14   : > { %p3341_p4 = pnand %p3053_p1, %p3311_p5  ;;  %p29_p6 = scmp.ge.s32.totalorder %s28_s28, 2 }
  0x15   : > { %p3040_p0 = pneg %p3332_p13  ;;  %s143_s29 = sand.u32 1, %s3234_s11  }
  0x16   : > { %s3119_s30 = scalar_lea.vmem %s133_s25, 256  ;;  %p3127_p8 = scmp.lt.s32.totalorder %s133_s25, %s133_s25 }
  0x17   : > { %p3347_p2 = pnand %p3040_p0, %p3307_p3  ;;  %p3120_p11 = scmp.ne.s32.totalorder %s133_s25, %s3119_s30 }
  0x18   : > { %p3128_p5 = scmp.lt.s32.totalorder %s3119_s30, %s3119_s30 }
  0x19   : > { %p3110_p10 = pneg %p3347_p2 }
  0x1a   : > { %p3129_p1 = por %p3128_p5, %p3127_p8 }
  0x1b   : > { %p3122_p12 = pnand %p3120_p11, %p3110_p10 }
  0x1d   : > { %p3123_p9 = pneg %p3122_p12 }
  0x1f   : > { %p3130_p7 = pnand %p3129_p1, %p3123_p9 }
  0x21   : > { %3133 = shalt.err (!%p3130_p7)
}
  0x22   : > { %3043 = dma.hbm_to_vmem [thread:$0]  (!%p3347_p2), %s5962_s0, 256, %s133_s25, [#allocation3]  }
  0x23   : > { %s7171_s28 = smov (%p29_p6, %s28_s28), 0  ;;  %s3018_s5 = sshll.u32 %s143_s29, 10 }
  0x24   : > { %s61_s6 = ssub.s32 %s3242_s13, %s7171_s28  ;;  %s3030_s7 = sshll.u32 %s3242_s13, 9 }
  0x25   : > { %p62_p12 = scmp.eq.s32.totalorder %s61_s6, 0  ;;  %s153_s16 = scalar_lea.hbm %s5963_s1, %s3030_s7 }
  0x26   : > { %s147_s19 = scalar_lea.vmem [#allocation5], %s3018_s5  ;;  %s144_s30 = scalar_lea.sflag [#allocation6], %s143_s29 }
  0x27   : > { %s154_s24 = sshll.u32 %s147_s19, 4  ;;  %p3136_p7 = pneg %p3341_p4  ;;  %s155_s24 = int_to_ptr.vmem [resolvable:$true] %s154_s24 }
  0x28   : > { %s3371_s27 = scalar_select %p62_p12, %s3234_s11, %s64_s17  }
  0x29   : > { %s3147_s25 = scalar_lea.vmem %s155_s24, 16384  ;;  %s3249_s3 = smov [#allocation5]  }
  0x2a   : > { %p3148_p8 = scmp.ne.s32.totalorder %s155_s24, %s3147_s25  ;;  %s3152_s4 = sshll.u32 %s3249_s3, 4  ;;  %s3153_s4 = int_to_ptr.vmem [resolvable:$false] %s3152_s4 }
  0x2b   : > { %s3154_s6 = scalar_lea.vmem %s3153_s4, 32768  ;;  %p3155_p2 = scmp.lt.s32.totalorder %s155_s24, %s3153_s4 }
  0x2c   : > { %p3150_p9 = pnand %p3148_p8, %p3136_p7  ;;  %p3156_p6 = scmp.lt.s32.totalorder %s3154_s6, %s3147_s25 }
  0x2e   : > { %p3151_p0 = pneg %p3150_p9  ;;  %p3157_p10 = por %p3156_p6, %p3155_p2 }
  0x30   : > { %p3158_p11 = pnand %p3157_p10, %p3151_p0 }
  0x32   : > { %3161 = shalt.err (!%p3158_p11)
}
  0x33   : > { %s3250_s5 = smov 1024   ;;  %s3251_s17 = smov 512  }
  0x34   : > { %s3252_s7 = smov 32   ;;  %166 = sbr.rel (%p3332_p13) target bundleno = 703 (0x2bf), region = 28 }
  0x35   : > { %3047 = dma.hbm_to_vmem [thread:$0]  (!%p3341_p4), %s153_s16, 16384, %s155_s24, %s144_s30, %s3250_s5, %s3251_s17, %s3252_s7  }
  0x39   : > { %3213 = dma.done.wait (%p3307_p3), [#allocation3], 256  }
  0x3a   : > { %3215 = vsyncadd (%p3307_p3), [#allocation3], 4294967040  ;;  %s3384_s29 = sand.u32 1, %s3230_s10   ;;  %p6391_p4 = scmp.ne.s32.totalorder %s6385_s20, 0 }
  0x3b   : > { %s3023_s8 = sshll.u32 %s3384_s29, 10  ;;  %s173_s15 = scalar_lea.sflag [#allocation6], %s3384_s29 }
  0x3c   : > { %s3388_s19 = scalar_lea.vmem [#allocation5], %s3023_s8 }
  0x3d   : > { %3217 = dma.done.wait (%p6391_p4), %s173_s15, 16384  }
  0x3e   : > { %3219 = vsyncadd (%p6391_p4), %s173_s15, 4294950912  ;;  %v262_v0 = vld [vmem:[%s3388_s19 + $0x1e8] sm:$0xff]  ;;  %v261_v1 = vld [vmem:[%s3388_s19 + $0x1e0] sm:$0xff]  ;;  %s3024_s18 = sshll.u32 %s3384_s29, 5  ;;  %s3031_s23 = sshll.u32 %s3238_s12, 9 }
  0x3f   : > { %v258_v2 = vld [vmem:[%s3388_s19 + $0x1c8] sm:$0xff]  ;;  %v3397_v3 = vand.u32 4294901760, %v262_v0  ;;  %v3399_v4 = vand.u32 4294901760, %v261_v1  ;;  %v257_v6 = vld [vmem:[%s3388_s19 + $0x1c0] sm:$0xff]  ;;  %s5912_s20 = scalar_lea.vmem [#allocation7], %s3024_s18  ;;  %s2916_s30 = scalar_lea.hbm %s5964_s2, %s3031_s23 }
  0x40   : > { %v3401_v5 = vand.u32 4294901760, %v258_v2  ;;  %v254_v7 = vld [vmem:[%s3388_s19 + $0x1a8] sm:$0xff]  ;;  %v253_v8 = vld [vmem:[%s3388_s19 + $0x1a0] sm:$0xff]  ;;  %v3406_v9 = vand.u32 4294901760, %v257_v6  ;;  %s2918_s26 = sshll.u32 %s5912_s20, 4  ;;  %s2902_s25 = scalar_lea.sflag [#allocation4], %s3384_s29  ;;  %s2919_s26 = int_to_ptr.vmem [resolvable:$true] %s2918_s26 }
  0x41   : > { %v3408_v10 = vand.u32 4294901760, %v254_v7  ;;  %v3410_v11 = vand.u32 4294901760, %v253_v8  ;;  %v250_v12 = vld [vmem:[%s3388_s19 + $0x188] sm:$0xff]  ;;  %v249_v13 = vld [vmem:[%s3388_s19 + $0x180] sm:$0xff]  ;;  %330 = vmatprep.subr.mxu0 %v3397_v3  ;;  %v3423_v18 = vsub.f32 %v262_v0, %v3397_v3  ;;  %v3439_v23 = vsub.f32 %v261_v1, %v3399_v4  ;;  %s3162_s3 = scalar_lea.vmem %s2919_s26, 512  ;;  %p7162_p13 = scmp.ne.s32.totalorder %s6386_s21, 0 }
  0x42   : > { %v246_v14 = vld [vmem:[%s3388_s19 + $0x168] sm:$0xff]  ;;  %v3416_v15 = vand.u32 4294901760, %v250_v12  ;;  %v3418_v16 = vand.u32 4294901760, %v249_v13  ;;  %v3426_v19 = vld [vmem:[%s3388_s19 + $0x160] sm:$0xff]  ;;  %332 = vmatpush1.msra.mxu0 %v3399_v4  ;;  %v3445_v25 = vsub.f32 %v258_v2, %v3401_v5  ;;  %v3462_v31 = vsub.f32 %v257_v6, %v3406_v9  ;;  %p3163_p3 = scmp.ne.s32.totalorder %s2919_s26, %s3162_s3  ;;  %s3253_s4 = smov [#allocation7]  }
  0x43   : > { %v3420_v17 = vand.u32 4294901760, %v246_v14  ;;  %v3429_v20 = vld [vmem:[%s3388_s19 + $0x148] sm:$0xff]  ;;  %v3432_v21 = vld [vmem:[%s3388_s19 + $0x140] sm:$0xff]  ;;  %v3436_v22 = vand.u32 4294901760, %v3426_v19  ;;  %334 = vmatprep.subr.mxu0 %v3401_v5  ;;  %v5980_v29 = vand.u32 4294901760, %v3423_v18  ;;  %v5979_v33 = vand.u32 4294901760, %v3439_v23 }
  0x44   : > { %v3442_v24 = vand.u32 4294901760, %v3429_v20  ;;  %v3448_v26 = vld [vmem:[%s3388_s19 + $0x128] sm:$0xff]  ;;  %v3451_v27 = vld [vmem:[%s3388_s19 + $0x120] sm:$0xff]  ;;  %v3459_v30 = vand.u32 4294901760, %v3432_v21  ;;  %336 = vmatpush1.msra.mxu0 %v3406_v9  ;;  %v5977_v34 = vand.u32 4294901760, %v3445_v25  ;;  %v3471_v35 = vsub.f32 %v254_v7, %v3408_v10  ;;  %p3164_p5 = pnand %p3163_p3, %p7162_p13  ;;  %s3166_s12 = sshll.u32 %s3253_s4, 4  ;;  %s3167_s12 = int_to_ptr.vmem [resolvable:$false] %s3166_s12 }
  0x45   : > { %v3454_v28 = vld [vmem:[%s3388_s19 + $0x108] sm:$0xff]  ;;  %v3465_v32 = vand.u32 4294901760, %v3448_v26  ;;  %v3474_v36 = vand.u32 4294901760, %v3451_v27  ;;  %v3477_v37 = vld [vmem:[%s3388_s19 + $0x100] sm:$0xff]  ;;  %338 = vmatprep.subr.mxu0 %v3408_v10  ;;  %v477_v38 = vsub.f32 %v3423_v18, %v5980_v29  ;;  %v5976_v39 = vand.u32 4294901760, %v3462_v31  ;;  %s3168_s6 = scalar_lea.vmem %s3167_s12, 1024  ;;  %p3169_p12 = scmp.lt.s32.totalorder %s2919_s26, %s3167_s12 }
  0x46   : > { %6392 = vst [vmem:[#allocation11_spill] sm:$0xff] %v3442_v24  ;;  %6393 = vst [vmem:[#allocation12_spill] sm:$0xff] %v3459_v30  ;;  %v3485_v40 = vsub.f32 %v253_v8, %v3410_v11  ;;  %v3488_v41 = vand.u32 4294901760, %v3454_v28  ;;  %340 = vmatpush1.msra.mxu0 %v3410_v11  ;;  %v483_v42 = vsub.f32 %v3439_v23, %v5979_v33  ;;  %v5973_v44 = vand.u32 4294901760, %v3471_v35  ;;  %v3502_v46 = vld [vmem:[%s3388_s19 + $0xe8] sm:$0xff]  ;;  %v3513_v51 = vld [vmem:[%s3388_s19 + $0xe0] sm:$0xff]  ;;  %p3165_p1 = pneg %p3164_p5  ;;  %p3170_p7 = scmp.lt.s32.totalorder %s3168_s6, %s3162_s3 }
  0x47   : > { %6394 = vst [vmem:[#allocation13_spill] sm:$0xff] %v3465_v32  ;;  %6395 = vst [vmem:[#allocation14_spill] sm:$0xff] %v3474_v36  ;;  %v489_v43 = vsub.f32 %v3445_v25, %v5977_v34  ;;  %v3499_v45 = vsub.f32 %v250_v12, %v3416_v15  ;;  %342 = vmatprep.subr.mxu0 %v3416_v15  ;;  %v478_v47 = vand.u32 4294901760, %v477_v38  ;;  %v3510_v50 = vand.u32 4294901760, %v3477_v37  ;;  %v3521_v56 = vld [vmem:[%s3388_s19 + $0xc8] sm:$0xff]  ;;  %v3534_v61 = vld [vmem:[%s3388_s19 + $0xc0] sm:$0xff] }
  0x48   : > { %6396 = vst [vmem:[#allocation15_spill] sm:$0xff] %v3488_v41  ;;  %v495_v48 = vsub.f32 %v3462_v31, %v5976_v39  ;;  %v5972_v49 = vand.u32 4294901760, %v3485_v40  ;;  %344 = vmatpush1.msra.mxu0 %v3418_v16  ;;  %v484_v52 = vand.u32 4294901760, %v483_v42  ;;  %v501_v54 = vsub.f32 %v3471_v35, %v5973_v44  ;;  %v3547_v2 = vld [vmem:[%s3388_s19 + $0xa8] sm:$0xff]  ;;  %v3655_v34 = vld [vmem:[%s3388_s19 + $0x40] sm:$0xff]  ;;  %p3171_p8 = por %p3170_p7, %p3169_p12 }
  0x49   : > { %6397 = vst [vmem:[#allocation16_spill] sm:$0xff] %v3510_v50  ;;  %v490_v53 = vand.u32 4294901760, %v489_v43  ;;  %v5970_v55 = vand.u32 4294901760, %v3499_v45  ;;  %346 = vmatprep.subr.mxu0 %v3420_v17  ;;  %479 = vmatprep.subr.mxu1 %v478_v47  ;;  %v3528_v59 = vsub.f32 %v249_v13, %v3418_v16  ;;  %v3531_v60 = vand.u32 4294901760, %v3502_v46  ;;  %v3559_v13 = vld [vmem:[%s3388_s19 + $0xa0] sm:$0xff]  ;;  %v3667_v33 = vld [vmem:[%s3388_s19 + $0x28] sm:$0xff] }
  0x4a   : > { %v496_v57 = vand.u32 4294901760, %v495_v48  ;;  %v507_v58 = vsub.f32 %v3485_v40, %v5972_v49  ;;  %348 = vmatpush1.msra.mxu0 %v3436_v22  ;;  %485 = vmatpush1.msra.mxu1 %v484_v52  ;;  %v502_v62 = vand.u32 4294901760, %v501_v54  ;;  %v3541_v0 = vsub.f32 %v246_v14, %v3420_v17  ;;  %v3583_v52 = vld [vmem:[%s3388_s19 + $0x88] sm:$0xff]  ;;  %v3630_v49 = vld [vmem:[%s3388_s19 + $0x60] sm:$0xff]  ;;  %p3172_p9 = pnand %p3171_p8, %p3165_p1 }
  0x4b   : > { %6398 = vst [vmem:[#allocation17_spill] sm:$0xff] %v3531_v60  ;;  %v513_v63 = vsub.f32 %v3499_v45, %v5970_v55  ;;  %v3544_v1 = vand.u32 4294901760, %v3513_v51  ;;  %350 = vmatprep.subr.mxu0 %v3442_v24  ;;  %491 = vmatprep.subr.mxu1 %v490_v53  ;;  %v5969_v7 = vand.u32 4294901760, %v3528_v59  ;;  %v3553_v8 = vsub.f32 %v3426_v19, %v3436_v22 }
  0x4c   : > { %v508_v6 = vand.u32 4294901760, %v507_v58  ;;  %v3556_v12 = vand.u32 4294901760, %v3521_v56  ;;  %352 = vmatpush1.msra.mxu0 %v3459_v30  ;;  %497 = vmatpush1.msra.mxu1 %v496_v57  ;;  %v5967_v38 = vand.u32 4294901760, %v3541_v0  ;;  %v3565_v42 = vsub.f32 %v3429_v20, %v3442_v24 }
  0x4d   : > { %6399 = vst [vmem:[#allocation18_spill] sm:$0xff] %v3544_v1  ;;  %v514_v14 = vand.u32 4294901760, %v513_v63  ;;  %v3568_v43 = vand.u32 4294901760, %v3534_v61  ;;  %354 = vmatprep.subr.mxu0 %v3465_v32  ;;  %503 = vmatprep.subr.mxu1 %v502_v62  ;;  %v519_v19 = vsub.f32 %v3528_v59, %v5969_v7  ;;  %v5968_v47 = vand.u32 4294901760, %v3553_v8  ;;  %v3618_v7 = vld [vmem:[%s3388_s19 + $0x68] sm:$0xff] }
  0x4e   : > { %6400 = vst [vmem:[#allocation19_spill] sm:$0xff] %v3556_v12  ;;  %v3577_v48 = vsub.f32 %v3432_v21, %v3459_v30  ;;  %v3580_v20 = vand.u32 4294901760, %v3547_v2  ;;  %356 = vmatpush1.msra.mxu0 %v3474_v36  ;;  %509 = vmatpush1.msra.mxu1 %v508_v6  ;;  %v525_v53 = vsub.f32 %v3541_v0, %v5967_v38  ;;  %v5971_v54 = vand.u32 4294901760, %v3565_v42 }
  0x4f   : > { %6401 = vst [vmem:[#allocation20_spill] sm:$0xff] %v3568_v43  ;;  %v3592_v57 = vsub.f32 %v3448_v26, %v3465_v32  ;;  %v3595_v21 = vand.u32 4294901760, %v3559_v13  ;;  %358 = vmatprep.subr.mxu0 %v3488_v41  ;;  %515 = vmatprep.subr.mxu1 %v514_v14  ;;  %v520_v58 = vand.u32 4294901760, %v519_v19  ;;  %v531_v62 = vsub.f32 %v3553_v8, %v5968_v47  ;;  %v3607_v26 = vld [vmem:[%s3388_s19 + $0x80] sm:$0xff] }
  0x50   : > { %6402 = vst [vmem:[#allocation21_spill] sm:$0xff] %v3580_v20  ;;  %v5974_v63 = vand.u32 4294901760, %v3577_v48  ;;  %v3604_v6 = vsub.f32 %v3451_v27, %v3474_v36  ;;  %360 = vmatpush1.msra.mxu0 %v3510_v50  ;;  %v526_v38 = vand.u32 4294901760, %v525_v53  ;;  %v537_v14 = vsub.f32 %v3565_v42, %v5971_v54  ;;  %v3740_v36 = vld [vmem:[%s3388_s19 + $0x3e8] sm:$0xff] }
  0x51   : > { %6403 = vst [vmem:[#allocation22_spill] sm:$0xff] %v3595_v21  ;;  %v5975_v19 = vand.u32 4294901760, %v3592_v57  ;;  %v3615_v47 = vand.u32 4294901760, %v3583_v52  ;;  %521 = vmatpush1.msra.mxu1 %v520_v58  ;;  %362 = vmatprep.subr.mxu0 %v3531_v60  ;;  %v532_v27 = vand.u32 4294901760, %v531_v62  ;;  %v3627_v54 = vsub.f32 %v3454_v28, %v3488_v41  ;;  %v3644_v28 = vld [vmem:[%s3388_s19 + $0x48] sm:$0xff] }
  0x52   : > { %v543_v53 = vsub.f32 %v3577_v48, %v5974_v63  ;;  %v5978_v55 = vand.u32 4294901760, %v3604_v6  ;;  %527 = vmatprep.subr.mxu1 %v526_v38  ;;  %364 = vmatpush1.msra.mxu0 %v3544_v1  ;;  %v538_v58 = vand.u32 4294901760, %v537_v14  ;;  %v3637_v44 = vand.u32 4294901760, %v3607_v26 }
  0x53   : > { %6404 = vst [vmem:[#allocation23_spill] sm:$0xff] %v3615_v47  ;;  %v549_v62 = vsub.f32 %v3592_v57, %v5975_v19  ;;  %v3641_v63 = vsub.f32 %v3477_v37, %v3510_v50  ;;  %533 = vmatpush1.msra.mxu1 %v532_v27  ;;  %366 = vmatprep.subr.mxu0 %v3556_v12  ;;  %v5981_v19 = vand.u32 4294901760, %v3627_v54  ;;  %v3652_v39 = vand.u32 4294901760, %v3618_v7 }
  0x54   : > { %6405 = vst [vmem:[#allocation24_spill] sm:$0xff] %v3637_v44  ;;  %v544_v38 = vand.u32 4294901760, %v543_v53  ;;  %v555_v14 = vsub.f32 %v3604_v6, %v5978_v55  ;;  %539 = vmatprep.subr.mxu1 %v538_v58  ;;  %368 = vmatpush1.msra.mxu0 %v3568_v43  ;;  %v3661_v53 = vsub.f32 %v3502_v46, %v3531_v60  ;;  %v3664_v55 = vand.u32 4294901760, %v3630_v49 }
  0x55   : > { %6406 = vst [vmem:[#allocation25_spill] sm:$0xff] %v3652_v39  ;;  %v550_v37 = vand.u32 4294901760, %v549_v62  ;;  %v5986_v27 = vand.u32 4294901760, %v3641_v63  ;;  %370 = vmatprep.subr.mxu0 %v3580_v20  ;;  %v561_v58 = vsub.f32 %v3627_v54, %v5981_v19  ;;  %v3675_v62 = vsub.f32 %v3513_v51, %v3544_v1  ;;  %v3693_v51 = vld [vmem:[%s3388_s19 + $0x20] sm:$0xff] }
  0x56   : > { %6407 = vst [vmem:[#allocation26_spill] sm:$0xff] %v3664_v55  ;;  %545 = vmatpush1.msra.mxu1 %v544_v38  ;;  %v556_v29 = vand.u32 4294901760, %v555_v14  ;;  %v3678_v46 = vand.u32 4294901760, %v3644_v28  ;;  %372 = vmatpush1.msra.mxu0 %v3595_v21  ;;  %v3687_v19 = vsub.f32 %v3521_v56, %v3556_v12  ;;  %v3690_v60 = vand.u32 4294901760, %v3655_v34  ;;  %v3705_v56 = vld [vmem:[%s3388_s19 + $0x8] sm:$0xff] }
  0x57   : > { %551 = vmatprep.subr.mxu1 %v550_v37  ;;  %v567_v38 = vsub.f32 %v3641_v63, %v5986_v27  ;;  %374 = vmatprep.subr.mxu0 %v3615_v47  ;;  %v562_v37 = vand.u32 4294901760, %v561_v58  ;;  %v3699_v27 = vsub.f32 %v3534_v61, %v3568_v43  ;;  %v3702_v14 = vand.u32 4294901760, %v3667_v33  ;;  %v3729_v58 = vld [vmem:[%s3388_s19] sm:$0xff] }
  0x58   : > { %6408 = vst [vmem:[#allocation27_spill] sm:$0xff] %v3678_v46  ;;  %6409 = vst [vmem:[#allocation28_spill] sm:$0xff] %v3690_v60  ;;  %557 = vmatpush1.msra.mxu1 %v556_v29  ;;  %376 = vmatpush1.msra.mxu0 %v3637_v44  ;;  %v6412_v29 = vand.u32 4294901760, %v3661_v53  ;;  %v3714_v1 = vsub.f32 %v3547_v2, %v3580_v20  ;;  %v6414_v61 = vand.u32 4294901760, %v3675_v62  ;;  %v3722_v41 = vand.u32 4294901760, %v3693_v51 }
  0x59   : > { %6410 = vst [vmem:[#allocation29_spill] sm:$0xff] %v3699_v27  ;;  %6411 = vst [vmem:[#allocation30_spill] sm:$0xff] %v3702_v14  ;;  %v568_v12 = vand.u32 4294901760, %v567_v38  ;;  %563 = vmatprep.subr.mxu1 %v562_v37  ;;  %378 = vmatprep.subr.mxu0 %v3652_v39  ;;  %v6417_v37 = vand.u32 4294901760, %v3687_v19  ;;  %v3737_v20 = vand.u32 4294901760, %v3705_v56  ;;  %v3752_v38 = vld [vmem:[%s3388_s19 + $0x3e0] sm:$0xff] }
  0x5a   : > { %v573_v50 = vsub.f32 %v3661_v53, %v6412_v29  ;;  %6413 = vst [vmem:[#allocation31_spill] sm:$0xff] %v3714_v1  ;;  %v579_v43 = vsub.f32 %v3675_v62, %v6414_v61  ;;  %6415 = vst [vmem:[#allocation32_spill] sm:$0xff] %v3722_v41  ;;  %v3726_v29 = vsub.f32 %v3559_v13, %v3595_v21  ;;  %380 = vmatpush1.msra.mxu0 %v3664_v55 }
  0x5b   : > { %569 = vmatpush1.msra.mxu1 %v568_v12  ;;  %v585_v61 = vsub.f32 %v3687_v19, %v6417_v37  ;;  %6418 = vst [vmem:[#allocation34_spill] sm:$0xff] %v3737_v20  ;;  %382 = vmatprep.subr.mxu0 %v3678_v46  ;;  %v6419_v12 = vand.u32 4294901760, %v3699_v27  ;;  %v3749_v37 = vsub.f32 %v3583_v52, %v3615_v47  ;;  %v3759_v24 = vand.u32 4294901760, %v3729_v58  ;;  %v3766_v52 = vld [vmem:[%s3388_s19 + $0x3c8] sm:$0xff] }
  0x5c   : > { %6416 = vst [vmem:[#allocation33_spill] sm:$0xff] %v3726_v29  ;;  %v574_v2 = vand.u32 4294901760, %v573_v50  ;;  %v580_v13 = vand.u32 4294901760, %v579_v43  ;;  %384 = vmatpush1.msra.mxu0 %v3690_v60  ;;  %v6421_v43 = vand.u32 4294901760, %v3714_v1  ;;  %v3774_v47 = vand.u32 4294901760, %v3740_v36 }
  0x5d   : > { %v591_v50 = vsub.f32 %v3699_v27, %v6419_v12  ;;  %6420 = vst [vmem:[#allocation35_spill] sm:$0xff] %v3749_v37  ;;  %v586_v32 = vand.u32 4294901760, %v585_v61  ;;  %6422 = vst [vmem:[#allocation36_spill] sm:$0xff] %v3759_v24  ;;  %v3763_v12 = vsub.f32 %v3607_v26, %v3637_v44  ;;  %386 = vmatprep.subr.mxu0 %v3702_v14 }
  0x5e   : > { %575 = vmatprep.subr.mxu1 %v574_v2  ;;  %v597_v30 = vsub.f32 %v3714_v1, %v6421_v43  ;;  %v6424_v2 = vand.u32 4294901760, %v3726_v29  ;;  %6425 = vst [vmem:[#allocation38_spill] sm:$0xff] %v3774_v47  ;;  %v3777_v1 = vld [vmem:[%s3388_s19 + $0x3c0] sm:$0xff]  ;;  %388 = vmatpush1.msra.mxu0 %v3722_v41  ;;  %v3789_v43 = vld [vmem:[%s3388_s19 + $0x3a8] sm:$0xff] }
  0x5f   : > { %6423 = vst [vmem:[#allocation37_spill] sm:$0xff] %v3763_v12  ;;  %581 = vmatpush1.msra.mxu1 %v580_v13  ;;  %v592_v21 = vand.u32 4294901760, %v591_v50  ;;  %v3783_v50 = vsub.f32 %v3618_v7, %v3652_v39  ;;  %390 = vmatprep.subr.mxu0 %v3737_v20  ;;  %v3797_v13 = vsub.f32 %v3630_v49, %v3664_v55  ;;  %v3800_v7 = vand.u32 4294901760, %v3766_v52  ;;  %v3815_v49 = vld [vmem:[%s3388_s19 + $0x3a0] sm:$0xff] }
  0x60   : > { %v603_v61 = vsub.f32 %v3726_v29, %v6424_v2  ;;  %587 = vmatprep.subr.mxu1 %v586_v32  ;;  %v598_v26 = vand.u32 4294901760, %v597_v30  ;;  %v3786_v2 = vand.u32 4294901760, %v3752_v38  ;;  %v6428_v30 = vand.u32 4294901760, %v3749_v37  ;;  %392 = vmatpush1.msra.mxu0 %v3759_v24 }
  0x61   : > { %6426 = vst [vmem:[#allocation39_spill] sm:$0xff] %v3783_v50  ;;  %593 = vmatpush1.msra.mxu1 %v592_v21  ;;  %6429 = vst [vmem:[#allocation41_spill] sm:$0xff] %v3797_v13  ;;  %v6431_v21 = vand.u32 4294901760, %v3763_v12  ;;  %394 = vmatprep.subr.mxu0 %v3774_v47  ;;  %v3824_v39 = vand.u32 4294901760, %v3789_v43 }
  0x62   : > { %6427 = vst [vmem:[#allocation40_spill] sm:$0xff] %v3786_v2  ;;  %v604_v44 = vand.u32 4294901760, %v603_v61  ;;  %v609_v32 = vsub.f32 %v3749_v37, %v6428_v30  ;;  %6430 = vst [vmem:[#allocation42_spill] sm:$0xff] %v3800_v7  ;;  %599 = vmatprep.subr.mxu1 %v598_v26  ;;  %v3809_v30 = vsub.f32 %v3644_v28, %v3678_v46  ;;  %v3812_v37 = vand.u32 4294901760, %v3777_v1  ;;  %v3827_v28 = vld [vmem:[%s3388_s19 + $0x388] sm:$0xff] }
  0x63   : > { %v615_v61 = vsub.f32 %v3763_v12, %v6431_v21  ;;  %v3821_v21 = vsub.f32 %v3655_v34, %v3690_v60  ;;  %6435 = vst [vmem:[#allocation46_spill] sm:$0xff] %v3824_v39  ;;  %v6436_v12 = vand.u32 4294901760, %v3783_v50  ;;  %396 = vmatpush2.msra.mxu0 %v3786_v2  ;;  %v3836_v26 = vsub.f32 %v3667_v33, %v3702_v14 }
  0x64   : > { %6432 = vst [vmem:[#allocation43_spill] sm:$0xff] %v3809_v30  ;;  %6433 = vst [vmem:[#allocation44_spill] sm:$0xff] %v3812_v37  ;;  %605 = vmatpush1.msra.mxu1 %v604_v44  ;;  %v610_v55 = vand.u32 4294901760, %v609_v32  ;;  %v6438_v34 = vand.u32 4294901760, %v3797_v13  ;;  %398 = vmatprep.subr.mxu0 %v3800_v7  ;;  %v3848_v32 = vsub.f32 %v3693_v51, %v3722_v41  ;;  %v3859_v14 = vand.u32 4294901760, %v3827_v28 }
  0x65   : > { %6434 = vst [vmem:[#allocation45_spill] sm:$0xff] %v3821_v21  ;;  %v616_v46 = vand.u32 4294901760, %v615_v61  ;;  %v621_v44 = vsub.f32 %v3783_v50, %v6436_v12  ;;  %6437 = vst [vmem:[#allocation47_spill] sm:$0xff] %v3836_v26  ;;  %v3844_v12 = vand.u32 4294901760, %v3815_v49  ;;  %v3851_v50 = vld [vmem:[%s3388_s19 + $0x380] sm:$0xff]  ;;  %400 = vmatpush2.msra.mxu0 %v3812_v37  ;;  %v6443_v41 = vand.u32 4294901760, %v3821_v21 }
  0x66   : > { %611 = vmatprep.subr.mxu1 %v610_v55  ;;  %v627_v60 = vsub.f32 %v3797_v13, %v6438_v34  ;;  %6440 = vst [vmem:[#allocation49_spill] sm:$0xff] %v3848_v32  ;;  %v6441_v55 = vand.u32 4294901760, %v3809_v30  ;;  %6442 = vst [vmem:[#allocation50_spill] sm:$0xff] %v3859_v14  ;;  %v3862_v13 = vld [vmem:[%s3388_s19 + $0x368] sm:$0xff]  ;;  %402 = vmatprep.subr.mxu0 %v3824_v39  ;;  %v3874_v61 = vld [vmem:[%s3388_s19 + $0x360] sm:$0xff]  ;;  %v6445_v29 = vand.u32 4294901760, %v3836_v26 }
  0x67   : > { %6439 = vst [vmem:[#allocation48_spill] sm:$0xff] %v3844_v12  ;;  %617 = vmatpush1.msra.mxu1 %v616_v46  ;;  %v622_v33 = vand.u32 4294901760, %v621_v44  ;;  %v639_v46 = vsub.f32 %v3821_v21, %v6443_v41  ;;  %404 = vmatpush2.msra.mxu0 %v3844_v12  ;;  %v3881_v41 = vand.u32 4294901760, %v3851_v50  ;;  %v3885_v44 = vsub.f32 %v3729_v58, %v3759_v24  ;;  %v3899_v21 = vld [vmem:[%s3388_s19 + $0x340] sm:$0xff] }
  0x68   : > { %v633_v34 = vsub.f32 %v3809_v30, %v6441_v55  ;;  %v628_v51 = vand.u32 4294901760, %v627_v60  ;;  %v3871_v55 = vsub.f32 %v3705_v56, %v3737_v20  ;;  %v645_v60 = vsub.f32 %v3836_v26, %v6445_v29  ;;  %v3888_v56 = vld [vmem:[%s3388_s19 + $0x348] sm:$0xff]  ;;  %406 = vmatprep.subr.mxu0 %v3859_v14 }
  0x69   : > { %623 = vmatprep.subr.mxu1 %v622_v33  ;;  %6446 = vst [vmem:[#allocation52_spill] sm:$0xff] %v3881_v41  ;;  %6447 = vst [vmem:[#allocation53_spill] sm:$0xff] %v3885_v44  ;;  %v640_v20 = vand.u32 4294901760, %v639_v46  ;;  %v6448_v33 = vand.u32 4294901760, %v3848_v32  ;;  %v3896_v26 = vand.u32 4294901760, %v3862_v13  ;;  %408 = vmatpush2.msra.mxu0 %v3881_v41  ;;  %v3905_v46 = vsub.f32 %v3740_v36, %v3774_v47  ;;  %v3911_v29 = vld [vmem:[%s3388_s19 + $0x328] sm:$0xff] }
  0x6a   : > { %6444 = vst [vmem:[#allocation51_spill] sm:$0xff] %v3871_v55  ;;  %v634_v30 = vand.u32 4294901760, %v633_v34  ;;  %629 = vmatpush1.msra.mxu1 %v628_v51  ;;  %v646_v58 = vand.u32 4294901760, %v645_v60  ;;  %v6051_v51 = vand.u32 4294901760, %v3885_v44  ;;  %v3919_v60 = vsub.f32 %v3752_v38, %v3786_v2  ;;  %v3937_v38 = vld [vmem:[%s3388_s19 + $0x320] sm:$0xff] }
  0x6b   : > { %v651_v34 = vsub.f32 %v3848_v32, %v6448_v33  ;;  %6449 = vst [vmem:[#allocation54_spill] sm:$0xff] %v3896_v26  ;;  %6450 = vst [vmem:[#allocation55_spill] sm:$0xff] %v3905_v46  ;;  %v3908_v33 = vand.u32 4294901760, %v3874_v61  ;;  %v6452_v32 = vand.u32 4294901760, %v3871_v55  ;;  %410 = vmatprep.subr.mxu0 %v3896_v26  ;;  %v3922_v36 = vand.u32 4294901760, %v3888_v56 }
  0x6c   : > { %635 = vmatprep.subr.mxu1 %v634_v30  ;;  %6453 = vst [vmem:[#allocation57_spill] sm:$0xff] %v3919_v60  ;;  %v3934_v47 = vand.u32 4294901760, %v3899_v21 }
  0x6d   : > { %6451 = vst [vmem:[#allocation56_spill] sm:$0xff] %v3908_v33  ;;  %641 = vmatpush1.msra.mxu1 %v640_v20  ;;  %v652_v24 = vand.u32 4294901760, %v651_v34  ;;  %v657_v30 = vsub.f32 %v3871_v55, %v6452_v32  ;;  %6454 = vst [vmem:[#allocation58_spill] sm:$0xff] %v3922_v36  ;;  %v663_v20 = vsub.f32 %v3885_v44, %v6051_v51  ;;  %412 = vmatpush2.msra.mxu0 %v3908_v33 }
  0x6e   : > { %647 = vmatprep.subr.mxu1 %v646_v58  ;;  %v3931_v32 = vsub.f32 %v3766_v52, %v3800_v7  ;;  %6456 = vst [vmem:[#allocation60_spill] sm:$0xff] %v3934_v47  ;;  %414 = vmatprep.subr.mxu0 %v3922_v36  ;;  %v3943_v51 = vsub.f32 %v3777_v1, %v3812_v37  ;;  %v3946_v34 = vand.u32 4294901760, %v3911_v29  ;;  %v3949_v52 = vld [vmem:[%s3388_s19 + $0x308] sm:$0xff]  ;;  %v6459_v44 = vand.u32 4294901760, %v3905_v46 }
  0x6f   : > { %653 = vmatpush1.msra.mxu1 %v652_v24  ;;  %v658_v2 = vand.u32 4294901760, %v657_v30  ;;  %v664_v7 = vand.u32 4294901760, %v663_v20  ;;  %416 = vmatpush2.msra.mxu0 %v3934_v47  ;;  %v3958_v58 = vsub.f32 %v3789_v43, %v3824_v39  ;;  %v6461_v1 = vand.u32 4294901760, %v3919_v60 }
  0x70   : > { %6455 = vst [vmem:[#allocation59_spill] sm:$0xff] %v3931_v32  ;;  %6457 = vst [vmem:[#allocation61_spill] sm:$0xff] %v3943_v51  ;;  %v669_v24 = vsub.f32 %v3905_v46, %v6459_v44  ;;  %418 = vmatprep.subr.mxu0 %v3946_v34  ;;  %v3966_v44 = vand.u32 4294901760, %v3937_v38  ;;  %v3970_v30 = vsub.f32 %v3815_v49, %v3844_v12  ;;  %v3973_v46 = vld [vmem:[%s3388_s19 + $0x300] sm:$0xff]  ;;  %v3980_v39 = vand.u32 4294901760, %v3949_v52 }
  0x71   : > { %6458 = vst [vmem:[#allocation62_spill] sm:$0xff] %v3946_v34  ;;  %6460 = vst [vmem:[#allocation63_spill] sm:$0xff] %v3958_v58  ;;  %659 = vmatprep.subr.mxu1 %v658_v2  ;;  %v675_v37 = vsub.f32 %v3919_v60, %v6461_v1  ;;  %v6464_v2 = vand.u32 4294901760, %v3931_v32  ;;  %v3983_v60 = vld [vmem:[%s3388_s19 + $0x2e8] sm:$0xff]  ;;  %v6466_v49 = vand.u32 4294901760, %v3943_v51 }
  0x72   : > { %6462 = vst [vmem:[#allocation64_spill] sm:$0xff] %v3966_v44  ;;  %6463 = vst [vmem:[#allocation65_spill] sm:$0xff] %v3970_v30  ;;  %665 = vmatpush1.msra.mxu1 %v664_v7  ;;  %v670_v43 = vand.u32 4294901760, %v669_v24  ;;  %420 = vmatpush2.msra.mxu0 %v3966_v44  ;;  %v3992_v24 = vsub.f32 %v3827_v28, %v3859_v14  ;;  %v4006_v7 = vsub.f32 %v3851_v50, %v3881_v41  ;;  %v4009_v28 = vld [vmem:[%s3388_s19 + $0x2c8] sm:$0xff] }
  0x73   : > { %v681_v1 = vsub.f32 %v3931_v32, %v6464_v2  ;;  %6465 = vst [vmem:[#allocation66_spill] sm:$0xff] %v3980_v39  ;;  %v676_v55 = vand.u32 4294901760, %v675_v37  ;;  %v687_v12 = vsub.f32 %v3943_v51, %v6466_v49  ;;  %v3995_v2 = vld [vmem:[%s3388_s19 + $0x2e0] sm:$0xff]  ;;  %v6468_v32 = vand.u32 4294901760, %v3958_v58  ;;  %422 = vmatprep.subr.mxu0 %v3980_v39 }
  0x74   : > { %6467 = vst [vmem:[#allocation67_spill] sm:$0xff] %v3992_v24  ;;  %671 = vmatprep.subr.mxu1 %v670_v43  ;;  %v4002_v49 = vand.u32 4294901760, %v3973_v46  ;;  %6470 = vst [vmem:[#allocation69_spill] sm:$0xff] %v4006_v7  ;;  %v6471_v43 = vand.u32 4294901760, %v3970_v30  ;;  %v4019_v51 = vld [vmem:[%s3388_s19 + $0x2c0] sm:$0xff]  ;;  %v6084_v50 = vand.u32 4294901760, %v4006_v7 }
  0x75   : > { %v682_v20 = vand.u32 4294901760, %v681_v1  ;;  %v693_v37 = vsub.f32 %v3958_v58, %v6468_v32  ;;  %677 = vmatpush2.msra.mxu1 %v676_v55  ;;  %v688_v14 = vand.u32 4294901760, %v687_v12  ;;  %v4016_v58 = vand.u32 4294901760, %v3983_v60 }
  0x76   : > { %6469 = vst [vmem:[#allocation68_spill] sm:$0xff] %v4002_v49  ;;  %v699_v1 = vsub.f32 %v3970_v30, %v6471_v43  ;;  %424 = vmatpush2.msra.mxu0 %v4002_v49  ;;  %v4025_v12 = vsub.f32 %v3862_v13, %v3896_v26  ;;  %v4028_v55 = vand.u32 4294901760, %v3995_v2  ;;  %v4031_v43 = vld [vmem:[%s3388_s19 + $0x2a8] sm:$0xff]  ;;  %v6475_v41 = vand.u32 4294901760, %v3992_v24 }
  0x77   : > { %6472 = vst [vmem:[#allocation70_spill] sm:$0xff] %v4016_v58  ;;  %683 = vmatprep.subr.mxu1 %v682_v20  ;;  %v694_v27 = vand.u32 4294901760, %v693_v37  ;;  %426 = vmatprep.subr.mxu0 %v4016_v58  ;;  %v4039_v37 = vsub.f32 %v3874_v61, %v3908_v33  ;;  %v4042_v13 = vand.u32 4294901760, %v4009_v28  ;;  %v4054_v26 = vand.u32 4294901760, %v4019_v51  ;;  %v4057_v61 = vld [vmem:[%s3388_s19 + $0x2a0] sm:$0xff] }
  0x78   : > { %6473 = vst [vmem:[#allocation71_spill] sm:$0xff] %v4025_v12  ;;  %6474 = vst [vmem:[#allocation72_spill] sm:$0xff] %v4028_v55  ;;  %689 = vmatpush2.msra.mxu1 %v688_v14  ;;  %v700_v32 = vand.u32 4294901760, %v699_v1  ;;  %v705_v20 = vsub.f32 %v3992_v24, %v6475_v41  ;;  %v711_v14 = vsub.f32 %v4006_v7, %v6084_v50  ;;  %428 = vmatpush2.msra.mxu0 %v4028_v55 }
  0x79   : > { %6476 = vst [vmem:[#allocation73_spill] sm:$0xff] %v4039_v37  ;;  %6477 = vst [vmem:[#allocation74_spill] sm:$0xff] %v4042_v13  ;;  %695 = vmatprep.subr.mxu1 %v694_v27  ;;  %v4051_v41 = vsub.f32 %v3888_v56, %v3922_v36  ;;  %430 = vmatprep.subr.mxu0 %v4042_v13  ;;  %v4063_v50 = vsub.f32 %v3899_v21, %v3934_v47  ;;  %v4066_v1 = vand.u32 4294901760, %v4031_v43  ;;  %v4069_v56 = vld [vmem:[%s3388_s19 + $0x288] sm:$0xff] }
  0x7a   : > { %6479 = vst [vmem:[#allocation76_spill] sm:$0xff] %v4054_v26  ;;  %701 = vmatpush2.msra.mxu1 %v700_v32  ;;  %v706_v33 = vand.u32 4294901760, %v705_v20  ;;  %v712_v36 = vand.u32 4294901760, %v711_v14  ;;  %v6482_v7 = vand.u32 4294901760, %v4025_v12  ;;  %432 = vmatpush2.msra.mxu0 %v4054_v26  ;;  %v4078_v27 = vsub.f32 %v3911_v29, %v3946_v34 }
  0x7b   : > { %6478 = vst [vmem:[#allocation75_spill] sm:$0xff] %v4051_v41  ;;  %6480 = vst [vmem:[#allocation77_spill] sm:$0xff] %v4063_v50  ;;  %v6484_v21 = vand.u32 4294901760, %v4039_v37  ;;  %434 = vmatprep.subr.mxu0 %v4066_v1  ;;  %v4090_v20 = vsub.f32 %v3937_v38, %v3966_v44  ;;  %v4100_v34 = vand.u32 4294901760, %v4069_v56  ;;  %v6489_v38 = vand.u32 4294901760, %v4063_v50 }
  0x7c   : > { %6481 = vst [vmem:[#allocation78_spill] sm:$0xff] %v4066_v1  ;;  %v717_v32 = vsub.f32 %v4025_v12, %v6482_v7  ;;  %6483 = vst [vmem:[#allocation79_spill] sm:$0xff] %v4078_v27  ;;  %707 = vmatprep.subr.mxu1 %v706_v33  ;;  %v4086_v7 = vand.u32 4294901760, %v4057_v61  ;;  %v4093_v12 = vld [vmem:[%s3388_s19 + $0x280] sm:$0xff]  ;;  %v6487_v33 = vand.u32 4294901760, %v4051_v41 }
  0x7d   : > { %v723_v47 = vsub.f32 %v4039_v37, %v6484_v21  ;;  %6486 = vst [vmem:[#allocation81_spill] sm:$0xff] %v4090_v20  ;;  %713 = vmatpush2.msra.mxu1 %v712_v36  ;;  %6488 = vst [vmem:[#allocation82_spill] sm:$0xff] %v4100_v34  ;;  %v4103_v37 = vld [vmem:[%s3388_s19 + $0x268] sm:$0xff]  ;;  %v735_v44 = vsub.f32 %v4063_v50, %v6489_v38  ;;  %v4122_v38 = vand.u32 4294901760, %v4093_v12  ;;  %v4139_v50 = vld [vmem:[%s3388_s19 + $0x240] sm:$0xff] }
  0x7e   : > { %6485 = vst [vmem:[#allocation80_spill] sm:$0xff] %v4086_v7  ;;  %v718_v29 = vand.u32 4294901760, %v717_v32  ;;  %v729_v21 = vsub.f32 %v4051_v41, %v6487_v33  ;;  %436 = vmatpush2.msra.mxu0 %v4086_v7  ;;  %v4112_v32 = vsub.f32 %v3949_v52, %v3980_v39  ;;  %v4115_v33 = vld [vmem:[%s3388_s19 + $0x260] sm:$0xff]  ;;  %v6491_v41 = vand.u32 4294901760, %v4078_v27  ;;  %v4129_v52 = vld [vmem:[%s3388_s19 + $0x248] sm:$0xff] }
  0x7f   : > { %v724_v24 = vand.u32 4294901760, %v723_v47  ;;  %438 = vmatprep.subr.mxu0 %v4100_v34  ;;  %6492 = vst [vmem:[#allocation84_spill] sm:$0xff] %v4122_v38  ;;  %v4126_v36 = vsub.f32 %v3973_v46, %v4002_v49  ;;  %v736_v39 = vand.u32 4294901760, %v735_v44  ;;  %v4145_v44 = vsub.f32 %v3983_v60, %v4016_v58 }
  0x80   : > { %6490 = vst [vmem:[#allocation83_spill] sm:$0xff] %v4112_v32  ;;  %719 = vmatprep.subr.mxu1 %v718_v29  ;;  %v730_v14 = vand.u32 4294901760, %v729_v21  ;;  %v741_v47 = vsub.f32 %v4078_v27, %v6491_v41  ;;  %v6494_v29 = vand.u32 4294901760, %v4090_v20  ;;  %v4136_v27 = vand.u32 4294901760, %v4103_v37  ;;  %440 = vmatpush2.msra.mxu0 %v4122_v38 }
  0x81   : > { %6493 = vst [vmem:[#allocation85_spill] sm:$0xff] %v4126_v36  ;;  %725 = vmatpush2.msra.mxu1 %v724_v24  ;;  %v6117_v46 = vand.u32 4294901760, %v4126_v36  ;;  %6495 = vst [vmem:[#allocation86_spill] sm:$0xff] %v4145_v44  ;;  %v4148_v24 = vand.u32 4294901760, %v4115_v33  ;;  %v6496_v49 = vand.u32 4294901760, %v4112_v32  ;;  %v4162_v60 = vand.u32 4294901760, %v4129_v52 }
  0x82   : > { %v747_v21 = vsub.f32 %v4090_v20, %v6494_v29  ;;  %731 = vmatprep.subr.mxu1 %v730_v14  ;;  %v742_v30 = vand.u32 4294901760, %v741_v47  ;;  %v4151_v29 = vld [vmem:[%s3388_s19 + $0x228] sm:$0xff]  ;;  %442 = vmatprep.subr.mxu0 %v4136_v27  ;;  %v4159_v47 = vsub.f32 %v3995_v2, %v4028_v55  ;;  %v4174_v58 = vand.u32 4294901760, %v4139_v50  ;;  %v4177_v2 = vld [vmem:[%s3388_s19 + $0x220] sm:$0xff] }
  0x83   : > { %737 = vmatpush2.msra.mxu1 %v736_v39  ;;  %v753_v14 = vsub.f32 %v4112_v32, %v6496_v49  ;;  %6498 = vst [vmem:[#allocation88_spill] sm:$0xff] %v4162_v60  ;;  %v759_v39 = vsub.f32 %v4126_v36, %v6117_v46  ;;  %444 = vmatpush2.msra.mxu0 %v4148_v24  ;;  %v6503_v36 = vand.u32 4294901760, %v4145_v44 }
  0x84   : > { %v748_v41 = vand.u32 4294901760, %v747_v21  ;;  %6497 = vst [vmem:[#allocation87_spill] sm:$0xff] %v4159_v47  ;;  %743 = vmatprep.subr.mxu1 %v742_v30  ;;  %v4171_v49 = vsub.f32 %v4009_v28, %v4042_v13  ;;  %6500 = vst [vmem:[#allocation90_spill] sm:$0xff] %v4174_v58  ;;  %446 = vmatprep.subr.mxu0 %v4162_v60  ;;  %v4183_v46 = vsub.f32 %v4019_v51, %v4054_v26  ;;  %v4189_v28 = vld [vmem:[%s3388_s19 + $0x208] sm:$0xff] }
  0x85   : > { %v754_v55 = vand.u32 4294901760, %v753_v14  ;;  %v4186_v21 = vand.u32 4294901760, %v4151_v29  ;;  %v760_v13 = vand.u32 4294901760, %v759_v39  ;;  %448 = vmatpush2.msra.mxu0 %v4174_v58  ;;  %v4198_v30 = vsub.f32 %v4031_v43, %v4066_v1  ;;  %v4213_v14 = vld [vmem:[%s3388_s19 + $0x200] sm:$0xff] }
  0x86   : > { %6499 = vst [vmem:[#allocation89_spill] sm:$0xff] %v4171_v49  ;;  %749 = vmatpush2.msra.mxu1 %v748_v41  ;;  %6501 = vst [vmem:[#allocation91_spill] sm:$0xff] %v4183_v46  ;;  %v765_v41 = vsub.f32 %v4145_v44, %v6503_v36  ;;  %v6505_v51 = vand.u32 4294901760, %v4159_v47  ;;  %v4206_v39 = vand.u32 4294901760, %v4177_v2  ;;  %v4210_v36 = vsub.f32 %v4057_v61, %v4086_v7 }
  0x87   : > { %6502 = vst [vmem:[#allocation92_spill] sm:$0xff] %v4186_v21  ;;  %6504 = vst [vmem:[#allocation93_spill] sm:$0xff] %v4198_v30  ;;  %755 = vmatprep.subr.mxu1 %v754_v55  ;;  %450 = vmatprep.subr.mxu0 %v4186_v21  ;;  %v6507_v55 = vand.u32 4294901760, %v4171_v49  ;;  %v4220_v32 = vand.u32 4294901760, %v4189_v28  ;;  %v6508_v20 = vand.u32 4294901760, %v4183_v46  ;;  %v6510_v7 = vand.u32 4294901760, %v4198_v30 }
  0x88   : > { %v771_v26 = vsub.f32 %v4159_v47, %v6505_v51  ;;  %6506 = vst [vmem:[#allocation94_spill] sm:$0xff] %v4210_v36  ;;  %761 = vmatpush2.msra.mxu1 %v760_v13  ;;  %v766_v43 = vand.u32 4294901760, %v765_v41  ;;  %v200_v47 = vld [vmem:[#allocation2 + $0x8] sm:$0xff]  ;;  %452 = vmatpush2.msra.mxu0 %v4206_v39  ;;  %v4229_v41 = vsub.f32 %v4069_v56, %v4100_v34  ;;  %v6512_v56 = vand.u32 4294901760, %v4210_v36 }
  0x89   : > { %v777_v1 = vsub.f32 %v4171_v49, %v6507_v55  ;;  %v783_v61 = vsub.f32 %v4183_v46, %v6508_v20  ;;  %v199_v55 = vld [vmem:[#allocation2] sm:$0xff]  ;;  %v789_v49 = vsub.f32 %v4198_v30, %v6510_v7  ;;  %454 = vmatprep.subr.mxu0 %v4220_v32  ;;  %v4240_v20 = vsub.f32 %v4093_v12, %v4122_v38 }
  0x8a   : > { %v772_v44 = vand.u32 4294901760, %v771_v26  ;;  %6509 = vst [vmem:[#allocation95_spill] sm:$0xff] %v4229_v41  ;;  %767 = vmatprep.subr.mxu1 %v766_v43  ;;  %v4236_v26 = vand.u32 4294901760, %v4213_v14  ;;  %v795_v43 = vsub.f32 %v4210_v36, %v6512_v56  ;;  %v4246_v34 = vand.u32 4294901760, %v200_v47 }
  0x8b   : > { %v778_v51 = vand.u32 4294901760, %v777_v1  ;;  %6511 = vst [vmem:[#allocation96_spill] sm:$0xff] %v4240_v20  ;;  %v784_v13 = vand.u32 4294901760, %v783_v61  ;;  %v6145_v1 = vand.u32 4294901760, %v4229_v41  ;;  %v790_v7 = vand.u32 4294901760, %v789_v49 }
  0x8c   : > { %773 = vmatpush2.msra.mxu1 %v772_v44  ;;  %6513 = vst [vmem:[#allocation97_spill] sm:$0xff] %v4246_v34  ;;  %456 = vmatpush2.msra.mxu0 %v4236_v26  ;;  %v6144_v30 = vand.u32 4294901760, %v4240_v20  ;;  %v4252_v12 = vsub.f32 %v4103_v37, %v4136_v27  ;;  %v4254_v44 = vand.u32 4294901760, %v199_v55  ;;  %v796_v61 = vand.u32 4294901760, %v795_v43 }
  0x8d   : > { %779 = vmatprep.subr.mxu1 %v778_v51  ;;  %v801_v56 = vsub.f32 %v4229_v41, %v6145_v1  ;;  %v4260_v38 = vsub.f32 %v200_v47, %v4246_v34  ;;  %869 = vmatprep.subr.mxu0 %v3423_v18  ;;  %v4265_v49 = vsub.f32 %v4115_v33, %v4148_v24 }
  0x8e   : > { %6514 = vst [vmem:[#allocation98_spill] sm:$0xff] %v4252_v12  ;;  %6515 = vst [vmem:[#allocation99_spill] sm:$0xff] %v4254_v44  ;;  %785 = vmatpush2.msra.mxu1 %v784_v13  ;;  %v807_v37 = vsub.f32 %v4240_v20, %v6144_v30  ;;  %v6148_v51 = vand.u32 4294901760, %v4252_v12  ;;  %v4272_v13 = vsub.f32 %v199_v55, %v4254_v44  ;;  %859 = vmatprep.mubr.f32.mxu1 %v4246_v34 }
  0x8f   : > { %6516 = vst [vmem:[#allocation100_spill] sm:$0xff] %v4260_v38  ;;  %6517 = vst [vmem:[#allocation101_spill] sm:$0xff] %v4265_v49  ;;  %791 = vmatprep.subr.mxu1 %v790_v7  ;;  %v4276_v47 = vsub.f32 %v4129_v52, %v4162_v60  ;;  %v802_v43 = vand.u32 4294901760, %v801_v56  ;;  %v4280_v33 = vand.u32 4294901760, %v4260_v38  ;;  %v6153_v7 = vand.u32 4294901760, %v4265_v49 }
  0x90   : > { %6518 = vst [vmem:[#allocation102_spill] sm:$0xff] %v4272_v13  ;;  %797 = vmatpush2.msra.mxu1 %v796_v61  ;;  %v4285_v30 = vsub.f32 %v4139_v50, %v4174_v58  ;;  %v808_v1 = vand.u32 4294901760, %v807_v37  ;;  %v813_v55 = vsub.f32 %v4252_v12, %v6148_v51  ;;  %v4291_v52 = vand.u32 4294901760, %v4272_v13 }
  0x91   : > { %6519 = vst [vmem:[#allocation103_spill] sm:$0xff] %v4276_v47  ;;  %6520 = vst [vmem:[#allocation104_spill] sm:$0xff] %v4280_v33  ;;  %v6160_v61 = vand.u32 4294901760, %v4276_v47  ;;  %803 = vmatprep.subr.mxu1 %v802_v43  ;;  %v460_v56 = vsub.f32 %v4260_v38, %v4280_v33  ;;  %v819_v34 = vsub.f32 %v4265_v49, %v6153_v7 }
  0x92   : > { %6521 = vst [vmem:[#allocation105_spill] sm:$0xff] %v4291_v52  ;;  %v4302_v37 = vsub.f32 %v4151_v29, %v4186_v21  ;;  %809 = vmatpush2.msra.mxu1 %v808_v1  ;;  %v814_v51 = vand.u32 4294901760, %v813_v55  ;;  %v466_v58 = vsub.f32 %v4272_v13, %v4291_v52  ;;  %v4311_v33 = vsub.f32 %v4177_v2, %v4206_v39 }
  0x93   : > { %v825_v43 = vsub.f32 %v4276_v47, %v6160_v61  ;;  %v4313_v7 = vand.u32 4294901760, %v460_v56  ;;  %v820_v50 = vand.u32 4294901760, %v819_v34  ;;  %v6525_v60 = vand.u32 4294901760, %v4285_v30 }
  0x94   : > { %6522 = vst [vmem:[#allocation106_spill] sm:$0xff] %v4302_v37  ;;  %6523 = vst [vmem:[#allocation107_spill] sm:$0xff] %v4311_v33  ;;  %v6164_v1 = vand.u32 4294901760, %v4302_v37  ;;  %815 = vmatprep.subr.mxu1 %v814_v51  ;;  %v4319_v55 = vand.u32 4294901760, %v466_v58  ;;  %v6163_v21 = vand.u32 4294901760, %v4311_v33  ;;  %v4324_v61 = vsub.f32 %v4189_v28, %v4220_v32 }
  0x95   : > { %6524 = vst [vmem:[#allocation108_spill] sm:$0xff] %v4313_v7  ;;  %v831_v29 = vsub.f32 %v4285_v30, %v6525_v60  ;;  %v826_v52 = vand.u32 4294901760, %v825_v43  ;;  %462 = vmatprep.mubr.f32.mxu0 %v4313_v7  ;;  %821 = vmatpush2.msra.mxu1 %v820_v50  ;;  %v4332_v2 = vsub.f32 %v4213_v14, %v4236_v26  ;;  %v6543_v7 = vld [vmem:[#allocation43_spill] sm:$0xff] }
  0x96   : > { %6526 = vst [vmem:[#allocation109_spill] sm:$0xff] %v4319_v55  ;;  %v837_v60 = vsub.f32 %v4302_v37, %v6164_v1  ;;  %468 = vmatmul.mubr.f32.vlgmr.msra.gmra.mxu0 %v4319_v55  ;;  %v843_v58 = vsub.f32 %v4311_v33, %v6163_v21  ;;  %v6162_v28 = vand.u32 4294901760, %v4324_v61  ;;  %v6539_v21 = vld [vmem:[#allocation39_spill] sm:$0xff]  ;;  %v6540_v1 = vld [vmem:[#allocation17_spill] sm:$0xff]  ;;  %v6542_v55 = vld [vmem:[#allocation18_spill] sm:$0xff] }
  0x97   : > { %v832_v34 = vand.u32 4294901760, %v831_v29  ;;  %6527 = vst [vmem:[#allocation110_spill] sm:$0xff] %v4332_v2  ;;  %827 = vmatprep.subr.mxu1 %v826_v52  ;;  %872 = vmatpush1.msra.mxu0 %v3439_v23  ;;  %v6161_v56 = vand.u32 4294901760, %v4332_v2 }
  0x98   : > { %v838_v51 = vand.u32 4294901760, %v837_v60  ;;  %875 = vmatprep.subr.mxu0 %v3445_v25  ;;  %v844_v50 = vand.u32 4294901760, %v843_v58  ;;  %v849_v14 = vsub.f32 %v4324_v61, %v6162_v28  ;;  %1061 = vmatprep.mubr.f32.mxu0 %v4260_v38  ;;  %v6529_v60 = vld [vmem:[#allocation29_spill] sm:$0xff]  ;;  %v6530_v58 = vld [vmem:[#allocation12_spill] sm:$0xff] }
  0x99   : > { %833 = vmatpush2.msra.mxu1 %v832_v34  ;;  %878 = vmatpush1.msra.mxu0 %v3462_v31  ;;  %v855_v52 = vsub.f32 %v4332_v2, %v6161_v56  ;;  %v6528_v34 = vld [vmem:[#allocation11_spill] sm:$0xff]  ;;  %v6537_v56 = vld [vmem:[#allocation37_spill] sm:$0xff]  ;;  %v6538_v28 = vld [vmem:[#allocation16_spill] sm:$0xff] }
  0x9a   : > { %839 = vmatprep.subr.mxu1 %v838_v51  ;;  %881 = vmatprep.subr.mxu0 %v3471_v35  ;;  %v850_v43 = vand.u32 4294901760, %v849_v14  ;;  %v6531_v51 = vld [vmem:[#allocation31_spill] sm:$0xff]  ;;  %v6533_v14 = vld [vmem:[#allocation33_spill] sm:$0xff] }
  0x9b   : > { %845 = vmatpush2.msra.mxu1 %v844_v50  ;;  %884 = vmatpush1.msra.mxu0 %v3485_v40  ;;  %v856_v29 = vand.u32 4294901760, %v855_v52  ;;  %v6532_v50 = vld [vmem:[#allocation13_spill] sm:$0xff]  ;;  %v6534_v52 = vld [vmem:[#allocation14_spill] sm:$0xff] }
  0x9c   : > { %851 = vmatprep.subr.mxu1 %v850_v43  ;;  %887 = vmatprep.subr.mxu0 %v3499_v45  ;;  %v6535_v43 = vld [vmem:[#allocation35_spill] sm:$0xff]  ;;  %v6541_v38 = vld [vmem:[#allocation41_spill] sm:$0xff] }
  0x9d   : > { %857 = vmatpush2.msra.mxu1 %v856_v29  ;;  %890 = vmatpush1.msra.mxu0 %v3528_v59  ;;  %v6536_v29 = vld [vmem:[#allocation15_spill] sm:$0xff] }
  0x9e   : > { %861 = vmatmul.mubr.f32.vlgmr.msra.gmra.mxu1 %v4254_v44  ;;  %893 = vmatprep.subr.mxu0 %v3541_v0  ;;  %v6544_v44 = vld [vmem:[#allocation19_spill] sm:$0xff] }
  0x9f   : > { %1071 = vmatprep.subr.mxu1 %v3397_v3  ;;  %896 = vmatpush1.msra.mxu0 %v3553_v8 }
  0xa0   : > { %1073 = vmatpush1.msra.mxu1 %v3399_v4  ;;  %899 = vmatprep.subr.mxu0 %v3565_v42 }
  0xa1   : > { %1075 = vmatprep.subr.mxu1 %v3401_v5  ;;  %902 = vmatpush1.msra.mxu0 %v3577_v48 }
  0xa2   : > { %1077 = vmatpush1.msra.mxu1 %v3406_v9  ;;  %905 = vmatprep.subr.mxu0 %v3592_v57 }
  0xa3   : > { %1079 = vmatprep.subr.mxu1 %v3408_v10  ;;  %908 = vmatpush1.msra.mxu0 %v3604_v6 }
  0xa4   : > { %1081 = vmatpush1.msra.mxu1 %v3410_v11  ;;  %911 = vmatprep.subr.mxu0 %v3627_v54 }
  0xa5   : > { %1083 = vmatprep.subr.mxu1 %v3416_v15  ;;  %914 = vmatpush1.msra.mxu0 %v3641_v63 }
  0xa6   : > { %1085 = vmatpush1.msra.mxu1 %v3418_v16  ;;  %917 = vmatprep.subr.mxu0 %v3661_v53 }
  0xa7   : > { %1087 = vmatprep.subr.mxu1 %v3420_v17  ;;  %920 = vmatpush1.msra.mxu0 %v3675_v62 }
  0xa8   : > { %1089 = vmatpush1.msra.mxu1 %v3436_v22  ;;  %923 = vmatprep.subr.mxu0 %v3687_v19 }
  0xa9   : > { %1091 = vmatprep.subr.mxu1 %v6528_v34  ;;  %926 = vmatpush1.msra.mxu0 %v6529_v60 }
  0xaa   : > { %1093 = vmatpush1.msra.mxu1 %v6530_v58  ;;  %929 = vmatprep.subr.mxu0 %v6531_v51 }
  0xab   : > { %1095 = vmatprep.subr.mxu1 %v6532_v50  ;;  %932 = vmatpush1.msra.mxu0 %v6533_v14 }
  0xac   : > { %1097 = vmatpush1.msra.mxu1 %v6534_v52  ;;  %935 = vmatprep.subr.mxu0 %v6535_v43  ;;  %v6545_v52 = vld [vmem:[#allocation45_spill] sm:$0xff]  ;;  %v6546_v43 = vld [vmem:[#allocation20_spill] sm:$0xff] }
  0xad   : > { %1099 = vmatprep.subr.mxu1 %v6536_v29  ;;  %938 = vmatpush1.msra.mxu0 %v6537_v56  ;;  %v6547_v29 = vld [vmem:[#allocation47_spill] sm:$0xff]  ;;  %v6548_v56 = vld [vmem:[#allocation21_spill] sm:$0xff] }
  0xae   : > { %1101 = vmatpush1.msra.mxu1 %v6538_v28  ;;  %941 = vmatprep.subr.mxu0 %v6539_v21  ;;  %v6549_v28 = vld [vmem:[#allocation49_spill] sm:$0xff]  ;;  %v6550_v21 = vld [vmem:[#allocation22_spill] sm:$0xff] }
  0xaf   : > { %1103 = vmatprep.subr.mxu1 %v6540_v1  ;;  %944 = vmatpush1.msra.mxu0 %v6541_v38  ;;  %v6551_v1 = vld [vmem:[#allocation51_spill] sm:$0xff] }
  0xb0   : > { %1105 = vmatpush1.msra.mxu1 %v6542_v55  ;;  %947 = vmatprep.subr.mxu0 %v6543_v7  ;;  %v6552_v38 = vld [vmem:[#allocation23_spill] sm:$0xff]  ;;  %v6553_v55 = vld [vmem:[#allocation53_spill] sm:$0xff]  ;;  %v6554_v7 = vld [vmem:[#allocation24_spill] sm:$0xff] }
  0xb1   : > { %1107 = vmatprep.subr.mxu1 %v6544_v44  ;;  %950 = vmatpush1.msra.mxu0 %v6545_v52  ;;  %v6555_v44 = vld [vmem:[#allocation55_spill] sm:$0xff]  ;;  %v6556_v52 = vld [vmem:[#allocation25_spill] sm:$0xff] }
  0xb2   : > { %1109 = vmatpush1.msra.mxu1 %v6546_v43  ;;  %953 = vmatprep.subr.mxu0 %v6547_v29  ;;  %v6557_v43 = vld [vmem:[#allocation57_spill] sm:$0xff]  ;;  %v6558_v29 = vld [vmem:[#allocation26_spill] sm:$0xff] }
  0xb3   : > { %1111 = vmatprep.subr.mxu1 %v6548_v56  ;;  %956 = vmatpush1.msra.mxu0 %v6549_v28  ;;  %v6559_v56 = vld [vmem:[#allocation59_spill] sm:$0xff] }
  0xb4   : > { %1113 = vmatpush1.msra.mxu1 %v6550_v21  ;;  %959 = vmatprep.subr.mxu0 %v6551_v1  ;;  %v6560_v28 = vld [vmem:[#allocation27_spill] sm:$0xff]  ;;  %v6561_v21 = vld [vmem:[#allocation61_spill] sm:$0xff]  ;;  %v6562_v1 = vld [vmem:[#allocation28_spill] sm:$0xff] }
  0xb5   : > { %1115 = vmatprep.subr.mxu1 %v6552_v38  ;;  %962 = vmatpush1.msra.mxu0 %v6553_v55  ;;  %v6563_v38 = vld [vmem:[#allocation63_spill] sm:$0xff]  ;;  %v6564_v55 = vld [vmem:[#allocation30_spill] sm:$0xff] }
  0xb6   : > { %1117 = vmatpush1.msra.mxu1 %v6554_v7  ;;  %965 = vmatprep.subr.mxu0 %v6555_v44  ;;  %v6565_v7 = vld [vmem:[#allocation65_spill] sm:$0xff]  ;;  %v6566_v44 = vld [vmem:[#allocation32_spill] sm:$0xff] }
  0xb7   : > { %1119 = vmatprep.subr.mxu1 %v6556_v52  ;;  %968 = vmatpush2.msra.mxu0 %v6557_v43  ;;  %v6567_v52 = vld [vmem:[#allocation67_spill] sm:$0xff]  ;;  %v6568_v43 = vld [vmem:[#allocation34_spill] sm:$0xff] }
  0xb8   : > { %1121 = vmatpush1.msra.mxu1 %v6558_v29  ;;  %971 = vmatprep.subr.mxu0 %v6559_v56  ;;  %v6569_v29 = vld [vmem:[#allocation69_spill] sm:$0xff]  ;;  %v6570_v56 = vld [vmem:[#allocation36_spill] sm:$0xff] }
  0xb9   : > { %1123 = vmatprep.subr.mxu1 %v6560_v28  ;;  %974 = vmatpush2.msra.mxu0 %v6561_v21  ;;  %v6571_v28 = vld [vmem:[#allocation71_spill] sm:$0xff]  ;;  %v6572_v21 = vld [vmem:[#allocation38_spill] sm:$0xff] }
  0xba   : > { %1125 = vmatpush1.msra.mxu1 %v6562_v1  ;;  %977 = vmatprep.subr.mxu0 %v6563_v38  ;;  %v6573_v1 = vld [vmem:[#allocation73_spill] sm:$0xff]  ;;  %v6574_v38 = vld [vmem:[#allocation40_spill] sm:$0xff] }
  0xbb   : > { %1127 = vmatprep.subr.mxu1 %v6564_v55  ;;  %980 = vmatpush2.msra.mxu0 %v6565_v7  ;;  %v6575_v55 = vld [vmem:[#allocation75_spill] sm:$0xff]  ;;  %v6576_v7 = vld [vmem:[#allocation42_spill] sm:$0xff] }
  0xbc   : > { %1129 = vmatpush1.msra.mxu1 %v6566_v44  ;;  %983 = vmatprep.subr.mxu0 %v6567_v52  ;;  %v6577_v44 = vld [vmem:[#allocation77_spill] sm:$0xff]  ;;  %v6578_v52 = vld [vmem:[#allocation44_spill] sm:$0xff] }
  0xbd   : > { %1131 = vmatprep.subr.mxu1 %v6568_v43  ;;  %986 = vmatpush2.msra.mxu0 %v6569_v29  ;;  %v6579_v43 = vld [vmem:[#allocation79_spill] sm:$0xff]  ;;  %v6580_v29 = vld [vmem:[#allocation46_spill] sm:$0xff] }
  0xbe   : > { %1133 = vmatpush1.msra.mxu1 %v6570_v56  ;;  %989 = vmatprep.subr.mxu0 %v6571_v28  ;;  %v6581_v56 = vld [vmem:[#allocation81_spill] sm:$0xff]  ;;  %v6582_v28 = vld [vmem:[#allocation48_spill] sm:$0xff] }
  0xbf   : > { %1135 = vmatprep.subr.mxu1 %v6572_v21  ;;  %992 = vmatpush2.msra.mxu0 %v6573_v1  ;;  %v6583_v21 = vld [vmem:[#allocation83_spill] sm:$0xff]  ;;  %v6584_v1 = vld [vmem:[#allocation50_spill] sm:$0xff] }
  0xc0   : > { %1137 = vmatpush2.msra.mxu1 %v6574_v38  ;;  %995 = vmatprep.subr.mxu0 %v6575_v55  ;;  %v6585_v38 = vld [vmem:[#allocation85_spill] sm:$0xff]  ;;  %v6586_v55 = vld [vmem:[#allocation52_spill] sm:$0xff] }
  0xc1   : > { %1139 = vmatprep.subr.mxu1 %v6576_v7  ;;  %998 = vmatpush2.msra.mxu0 %v6577_v44  ;;  %v6587_v7 = vld [vmem:[#allocation86_spill] sm:$0xff] }
  0xc2   : > { %1141 = vmatpush2.msra.mxu1 %v6578_v52  ;;  %1001 = vmatprep.subr.mxu0 %v6579_v43  ;;  %v6588_v44 = vld [vmem:[#allocation54_spill] sm:$0xff]  ;;  %v6589_v52 = vld [vmem:[#allocation87_spill] sm:$0xff]  ;;  %v6590_v43 = vld [vmem:[#allocation56_spill] sm:$0xff] }
  0xc3   : > { %1143 = vmatprep.subr.mxu1 %v6580_v29  ;;  %1004 = vmatpush2.msra.mxu0 %v6581_v56  ;;  %v6591_v29 = vld [vmem:[#allocation89_spill] sm:$0xff]  ;;  %v6592_v56 = vld [vmem:[#allocation58_spill] sm:$0xff] }
  0xc4   : > { %1145 = vmatpush2.msra.mxu1 %v6582_v28  ;;  %1007 = vmatprep.subr.mxu0 %v6583_v21  ;;  %v6593_v21 = vld [vmem:[#allocation60_spill] sm:$0xff] }
  0xc5   : > { %1147 = vmatprep.subr.mxu1 %v6584_v1  ;;  %1010 = vmatpush2.msra.mxu0 %v6585_v38  ;;  %v6594_v1 = vld [vmem:[#allocation93_spill] sm:$0xff]  ;;  %v6595_v38 = vld [vmem:[#allocation62_spill] sm:$0xff] }
  0xc6   : > { %1149 = vmatpush2.msra.mxu1 %v6586_v55  ;;  %1013 = vmatprep.subr.mxu0 %v6587_v7  ;;  %v6596_v7 = vld [vmem:[#allocation64_spill] sm:$0xff] }
  0xc7   : > { %1151 = vmatprep.subr.mxu1 %v6588_v44  ;;  %1016 = vmatpush2.msra.mxu0 %v6589_v52  ;;  %v6597_v52 = vld [vmem:[#allocation66_spill] sm:$0xff] }
  0xc8   : > { %1153 = vmatpush2.msra.mxu1 %v6590_v43  ;;  %1019 = vmatprep.subr.mxu0 %v6591_v29  ;;  %v6598_v29 = vld [vmem:[#allocation68_spill] sm:$0xff] }
  0xc9   : > { %1155 = vmatprep.subr.mxu1 %v6592_v56  ;;  %1022 = vmatpush2.msra.mxu0 %v4183_v46  ;;  %v6599_v46 = vld [vmem:[#allocation70_spill] sm:$0xff] }
  0xca   : > { %1157 = vmatpush2.msra.mxu1 %v6593_v21  ;;  %1025 = vmatprep.subr.mxu0 %v6594_v1  ;;  %v6600_v1 = vld [vmem:[#allocation72_spill] sm:$0xff] }
  0xcb   : > { %1159 = vmatprep.subr.mxu1 %v6595_v38  ;;  %1028 = vmatpush2.msra.mxu0 %v4210_v36  ;;  %v6601_v36 = vld [vmem:[#allocation74_spill] sm:$0xff] }
  0xcc   : > { %1161 = vmatpush2.msra.mxu1 %v6596_v7  ;;  %1031 = vmatprep.subr.mxu0 %v4229_v41  ;;  %v6602_v41 = vld [vmem:[#allocation76_spill] sm:$0xff] }
  0xcd   : > { %1163 = vmatprep.subr.mxu1 %v6597_v52  ;;  %1034 = vmatpush2.msra.mxu0 %v4240_v20  ;;  %v6603_v20 = vld [vmem:[#allocation78_spill] sm:$0xff] }
  0xce   : > { %1165 = vmatpush2.msra.mxu1 %v6598_v29  ;;  %1037 = vmatprep.subr.mxu0 %v4252_v12  ;;  %v6604_v12 = vld [vmem:[#allocation80_spill] sm:$0xff] }
  0xcf   : > { %1167 = vmatprep.subr.mxu1 %v6599_v46  ;;  %1040 = vmatpush2.msra.mxu0 %v4265_v49  ;;  %v6605_v49 = vld [vmem:[#allocation82_spill] sm:$0xff] }
  0xd0   : > { %1169 = vmatpush2.msra.mxu1 %v6600_v1  ;;  %1043 = vmatprep.subr.mxu0 %v4276_v47  ;;  %v6606_v47 = vld [vmem:[#allocation84_spill] sm:$0xff] }
  0xd1   : > { %1171 = vmatprep.subr.mxu1 %v6601_v36  ;;  %1046 = vmatpush2.msra.mxu0 %v4285_v30 }
  0xd2   : > { %1173 = vmatpush2.msra.mxu1 %v6602_v41  ;;  %1049 = vmatprep.subr.mxu0 %v4302_v37  ;;  %v6607_v37 = vand.u32 4294901760, %v3423_v18  ;;  %v6614_v18 = vand.u32 4294901760, %v3471_v35  ;;  %v6620_v35 = vand.u32 4294901760, %v3541_v0  ;;  %v6624_v0 = vand.u32 4294901760, %v3592_v57 }
  0xd3   : > { %1175 = vmatprep.subr.mxu1 %v6603_v20  ;;  %1052 = vmatpush2.msra.mxu0 %v4311_v33  ;;  %v6608_v33 = vand.u32 4294901760, %v3439_v23  ;;  %v6615_v23 = vand.u32 4294901760, %v3485_v40  ;;  %v6621_v40 = vand.u32 4294901760, %v3553_v8  ;;  %v6634_v8 = vld [vmem:[#allocation14_spill] sm:$0xff] }
  0xd4   : > { %1177 = vmatpush2.msra.mxu1 %v6604_v12  ;;  %1055 = vmatprep.subr.mxu0 %v4324_v61  ;;  %v6609_v12 = vld [vmem:[#allocation88_spill] sm:$0xff] }
  0xd5   : > { %1179 = vmatprep.subr.mxu1 %v6605_v49  ;;  %1058 = vmatpush2.msra.mxu0 %v4332_v2  ;;  %v6610_v49 = vand.u32 4294901760, %v3445_v25  ;;  %v6611_v2 = vld [vmem:[#allocation90_spill] sm:$0xff]  ;;  %v6616_v25 = vand.u32 4294901760, %v3499_v45  ;;  %v6622_v45 = vand.u32 4294901760, %v3565_v42 }
  0xd6   : > { %1181 = vmatpush2.msra.mxu1 %v6606_v47  ;;  %1064 = vmatmul.mubr.f32.vlgmr.msra.gmra.mxu0 %v4272_v13  ;;  %v6612_v47 = vand.u32 4294901760, %v3462_v31  ;;  %v6613_v13 = vld [vmem:[#allocation92_spill] sm:$0xff]  ;;  %v6618_v31 = vand.u32 4294901760, %v3528_v59  ;;  %v6623_v59 = vand.u32 4294901760, %v3577_v48  ;;  %v6637_v48 = vld [vmem:[#allocation15_spill] sm:$0xff] }
  0xd7   : > { %1183 = vmatprep.subr.mxu1 %v4136_v27  ;;  %1214 = vmatprep.subr.mxu0 %v6607_v37  ;;  %v6646_v37 = vld [vmem:[#allocation18_spill] sm:$0xff] }
  0xd8   : > { %1185 = vmatpush2.msra.mxu1 %v4148_v24  ;;  %1218 = vmatpush1.msra.mxu0 %v6608_v33 }
  0xd9   : > { %1187 = vmatprep.subr.mxu1 %v6609_v12  ;;  %1222 = vmatprep.subr.mxu0 %v6610_v49  ;;  %v6617_v49 = vld [vmem:[#allocation104_spill] sm:$0xff] }
  0xda   : > { %1189 = vmatpush2.msra.mxu1 %v6611_v2  ;;  %1226 = vmatpush1.msra.mxu0 %v6612_v47  ;;  %v6619_v47 = vld [vmem:[#allocation105_spill] sm:$0xff] }
  0xdb   : > { %1191 = vmatprep.subr.mxu1 %v6613_v13  ;;  %1230 = vmatprep.subr.mxu0 %v6614_v18  ;;  %v6653_v18 = vld [vmem:[#allocation47_spill] sm:$0xff] }
  0xdc   : > { %1193 = vmatpush2.msra.mxu1 %v4206_v39  ;;  %1234 = vmatpush1.msra.mxu0 %v6615_v23  ;;  %v6654_v23 = vand.u32 4294901760, %v6653_v18  ;;  %v6688_v18 = vld [vmem:[#allocation36_spill] sm:$0xff] }
  0xdd   : > { %1195 = vmatprep.subr.mxu1 %v4220_v32  ;;  %1238 = vmatprep.subr.mxu0 %v6616_v25  ;;  %v6655_v25 = vld [vmem:[#allocation21_spill] sm:$0xff] }
  0xde   : > { %1197 = vmatpush2.msra.mxu1 %v4236_v26  ;;  %1201 = vmatprep.mubr.f32.mxu1 %v6617_v49 }
  0xdf   : > { %1242 = vmatpush1.msra.mxu0 %v6618_v31  ;;  %1205 = vmatmul.mubr.f32.vlgmr.msra.gmra.mxu1 %v6619_v47  ;;  %v6656_v31 = vld [vmem:[#allocation49_spill] sm:$0xff]  ;;  %v6768_v47 = vld [vmem:[#allocation110_spill] sm:$0xff] }
  0xe0   : > { %1246 = vmatprep.subr.mxu0 %v6620_v35  ;;  %1477 = vmatprep.subr.mxu1 %v3397_v3  ;;  %v6625_v3 = vand.u32 4294901760, %v3604_v6  ;;  %v6641_v6 = vld [vmem:[#allocation39_spill] sm:$0xff]  ;;  %v6657_v35 = vand.u32 4294901760, %v6656_v31  ;;  %v6691_v31 = vld [vmem:[#allocation38_spill] sm:$0xff]  ;;  %v6769_v49 = vand.u32 4294901760, %v6768_v47 }
  0xe1   : > { %1250 = vmatpush1.msra.mxu0 %v6621_v40  ;;  %1479 = vmatpush1.msra.mxu1 %v3399_v4  ;;  %v6626_v4 = vand.u32 4294901760, %v3627_v54  ;;  %v6638_v54 = vld [vmem:[#allocation37_spill] sm:$0xff]  ;;  %v6658_v40 = vld [vmem:[#allocation22_spill] sm:$0xff] }
  0xe2   : > { %1254 = vmatprep.subr.mxu0 %v6622_v45  ;;  %1481 = vmatprep.subr.mxu1 %v3401_v5  ;;  %v6627_v5 = vand.u32 4294901760, %v3641_v63  ;;  %v6639_v57 = vand.u32 4294901760, %v6638_v54  ;;  %v6640_v63 = vld [vmem:[#allocation16_spill] sm:$0xff]  ;;  %v6659_v45 = vld [vmem:[#allocation51_spill] sm:$0xff] }
  0xe3   : > { %1258 = vmatpush1.msra.mxu0 %v6623_v59  ;;  %1483 = vmatpush1.msra.mxu1 %v3406_v9  ;;  %v6628_v9 = vand.u32 4294901760, %v3661_v53  ;;  %v6643_v53 = vld [vmem:[#allocation17_spill] sm:$0xff]  ;;  %v6660_v59 = vand.u32 4294901760, %v6659_v45 }
  0xe4   : > { %1262 = vmatprep.subr.mxu0 %v6624_v0  ;;  %1485 = vmatprep.subr.mxu1 %v3408_v10  ;;  %v6629_v10 = vand.u32 4294901760, %v3675_v62  ;;  %v6644_v62 = vld [vmem:[#allocation41_spill] sm:$0xff]  ;;  %v6661_v0 = vld [vmem:[#allocation23_spill] sm:$0xff] }
  0xe5   : > { %1266 = vmatpush1.msra.mxu0 %v6625_v3  ;;  %1487 = vmatpush1.msra.mxu1 %v3410_v11  ;;  %v6630_v11 = vand.u32 4294901760, %v3687_v19  ;;  %v6642_v19 = vand.u32 4294901760, %v6641_v6  ;;  %v6645_v33 = vand.u32 4294901760, %v6644_v62  ;;  %v6662_v3 = vld [vmem:[#allocation53_spill] sm:$0xff] }
  0xe6   : > { %1270 = vmatprep.subr.mxu0 %v6626_v4  ;;  %1489 = vmatprep.subr.mxu1 %v3416_v15  ;;  %v6631_v15 = vand.u32 4294901760, %v6529_v60  ;;  %v6663_v4 = vand.u32 4294901760, %v6662_v3 }
  0xe7   : > { %1274 = vmatpush1.msra.mxu0 %v6627_v5  ;;  %1491 = vmatpush1.msra.mxu1 %v3418_v16  ;;  %v6632_v16 = vand.u32 4294901760, %v6531_v51  ;;  %v6650_v51 = vld [vmem:[#allocation45_spill] sm:$0xff]  ;;  %v6664_v5 = vld [vmem:[#allocation24_spill] sm:$0xff] }
  0xe8   : > { %1278 = vmatprep.subr.mxu0 %v6628_v9  ;;  %1493 = vmatprep.subr.mxu1 %v3420_v17  ;;  %v6633_v17 = vand.u32 4294901760, %v6533_v14  ;;  %v6652_v14 = vld [vmem:[#allocation20_spill] sm:$0xff]  ;;  %v6665_v9 = vld [vmem:[#allocation55_spill] sm:$0xff] }
  0xe9   : > { %1282 = vmatpush1.msra.mxu0 %v6629_v10  ;;  %1495 = vmatpush1.msra.mxu1 %v3436_v22  ;;  %v6635_v22 = vld [vmem:[#allocation35_spill] sm:$0xff]  ;;  %v6666_v10 = vand.u32 4294901760, %v6665_v9 }
  0xea   : > { %1286 = vmatprep.subr.mxu0 %v6630_v11  ;;  %1497 = vmatprep.subr.mxu1 %v6528_v34  ;;  %v6636_v42 = vand.u32 4294901760, %v6635_v22  ;;  %v6647_v34 = vld [vmem:[#allocation43_spill] sm:$0xff]  ;;  %v6667_v11 = vld [vmem:[#allocation25_spill] sm:$0xff] }
  0xeb   : > { %1290 = vmatpush1.msra.mxu0 %v6631_v15  ;;  %1499 = vmatpush1.msra.mxu1 %v6530_v58  ;;  %v6648_v60 = vand.u32 4294901760, %v6647_v34  ;;  %v6649_v58 = vld [vmem:[#allocation19_spill] sm:$0xff]  ;;  %v6668_v15 = vld [vmem:[#allocation57_spill] sm:$0xff] }
  0xec   : > { %1294 = vmatprep.subr.mxu0 %v6632_v16  ;;  %1501 = vmatprep.subr.mxu1 %v6532_v50  ;;  %v6651_v50 = vand.u32 4294901760, %v6650_v51  ;;  %v6669_v16 = vand.u32 4294901760, %v6668_v15  ;;  %v263_v51 = vld [vmem:[%s3388_s19 + $0x1f0] sm:$0xff] }
  0xed   : > { %1298 = vmatpush1.msra.mxu0 %v6633_v17  ;;  %1503 = vmatpush1.msra.mxu1 %v6634_v8  ;;  %v6670_v17 = vld [vmem:[#allocation26_spill] sm:$0xff]  ;;  %v6671_v8 = vld [vmem:[#allocation59_spill] sm:$0xff]  ;;  %v4601_v3 = vand.u32 4294901760, %v263_v51 }
  0xee   : > { %1302 = vmatprep.subr.mxu0 %v6636_v42  ;;  %1505 = vmatprep.subr.mxu1 %v6637_v48  ;;  %v6672_v22 = vand.u32 4294901760, %v6671_v8  ;;  %v6673_v42 = vld [vmem:[#allocation27_spill] sm:$0xff]  ;;  %v6674_v48 = vld [vmem:[#allocation61_spill] sm:$0xff]  ;;  %v256_v8 = vld [vmem:[%s3388_s19 + $0x1b8] sm:$0xff] }
  0xef   : > { %1306 = vmatpush1.msra.mxu0 %v6639_v57  ;;  %1507 = vmatpush1.msra.mxu1 %v6640_v63  ;;  %v6675_v54 = vand.u32 4294901760, %v6674_v48  ;;  %v6676_v57 = vld [vmem:[#allocation28_spill] sm:$0xff]  ;;  %v6677_v63 = vld [vmem:[#allocation63_spill] sm:$0xff] }
  0xf0   : > { %1310 = vmatprep.subr.mxu0 %v6642_v19  ;;  %1509 = vmatprep.subr.mxu1 %v6643_v53  ;;  %v6678_v6 = vand.u32 4294901760, %v6677_v63  ;;  %v6679_v19 = vld [vmem:[#allocation30_spill] sm:$0xff]  ;;  %v6680_v53 = vld [vmem:[#allocation65_spill] sm:$0xff] }
  0xf1   : > { %1314 = vmatpush1.msra.mxu0 %v6645_v33  ;;  %1511 = vmatpush1.msra.mxu1 %v6646_v37  ;;  %v6681_v62 = vand.u32 4294901760, %v6680_v53  ;;  %v6682_v33 = vld [vmem:[#allocation32_spill] sm:$0xff]  ;;  %v6683_v37 = vld [vmem:[#allocation67_spill] sm:$0xff]  ;;  %v6706_v63 = vld [vmem:[#allocation81_spill] sm:$0xff] }
  0xf2   : > { %1318 = vmatprep.subr.mxu0 %v6648_v60  ;;  %1513 = vmatprep.subr.mxu1 %v6649_v58  ;;  %v6684_v34 = vand.u32 4294901760, %v6683_v37  ;;  %v6685_v60 = vld [vmem:[#allocation34_spill] sm:$0xff] }
  0xf3   : > { %1322 = vmatpush1.msra.mxu0 %v6651_v50  ;;  %1515 = vmatpush1.msra.mxu1 %v6652_v14  ;;  %v264_v58 = vld [vmem:[%s3388_s19 + $0x1f8] sm:$0xff]  ;;  %v6686_v50 = vld [vmem:[#allocation69_spill] sm:$0xff] }
  0xf4   : > { %1326 = vmatprep.subr.mxu0 %v6654_v23  ;;  %1517 = vmatprep.subr.mxu1 %v6655_v25  ;;  %v6687_v14 = vand.u32 4294901760, %v6686_v50  ;;  %v6689_v23 = vld [vmem:[#allocation71_spill] sm:$0xff]  ;;  %v252_v53 = vld [vmem:[%s3388_s19 + $0x198] sm:$0xff] }
  0xf5   : > { %1330 = vmatpush1.msra.mxu0 %v6657_v35  ;;  %1519 = vmatpush1.msra.mxu1 %v6658_v40  ;;  %v6690_v25 = vand.u32 4294901760, %v6689_v23  ;;  %v260_v35 = vld [vmem:[%s3388_s19 + $0x1d8] sm:$0xff]  ;;  %v6692_v40 = vld [vmem:[#allocation73_spill] sm:$0xff] }
  0xf6   : > { %1334 = vmatprep.subr.mxu0 %v6660_v59  ;;  %1521 = vmatprep.subr.mxu1 %v6661_v0  ;;  %v6693_v45 = vand.u32 4294901760, %v6692_v40  ;;  %v6694_v59 = vld [vmem:[#allocation40_spill] sm:$0xff]  ;;  %v4599_v0 = vand.u32 4294901760, %v264_v58  ;;  %v248_v40 = vld [vmem:[%s3388_s19 + $0x178] sm:$0xff] }
  0xf7   : > { %1338 = vmatpush1.msra.mxu0 %v6663_v4  ;;  %1523 = vmatpush1.msra.mxu1 %v6664_v5  ;;  %v259_v4 = vld [vmem:[%s3388_s19 + $0x1d0] sm:$0xff]  ;;  %v6695_v5 = vld [vmem:[#allocation75_spill] sm:$0xff] }
  0xf8   : > { %1342 = vmatprep.subr.mxu0 %v6666_v10  ;;  %1525 = vmatprep.subr.mxu1 %v6667_v11  ;;  %v6696_v9 = vand.u32 4294901760, %v6695_v5  ;;  %v6697_v10 = vld [vmem:[#allocation42_spill] sm:$0xff]  ;;  %v6698_v11 = vld [vmem:[#allocation77_spill] sm:$0xff] }
  0xf9   : > { %1346 = vmatpush2.msra.mxu0 %v6669_v16  ;;  %1527 = vmatpush1.msra.mxu1 %v6670_v17  ;;  %v6699_v15 = vand.u32 4294901760, %v6698_v11  ;;  %v6700_v16 = vld [vmem:[#allocation44_spill] sm:$0xff]  ;;  %v4610_v17 = vand.u32 4294901760, %v260_v35  ;;  %v243_v11 = vld [vmem:[%s3388_s19 + $0x150] sm:$0xff] }
  0xfa   : > { %1350 = vmatprep.subr.mxu0 %v6672_v22  ;;  %1529 = vmatprep.subr.mxu1 %v6673_v42  ;;  %v255_v22 = vld [vmem:[%s3388_s19 + $0x1b0] sm:$0xff]  ;;  %v6702_v42 = vld [vmem:[#allocation79_spill] sm:$0xff] }
  0xfb   : > { %1354 = vmatpush2.msra.mxu0 %v6675_v54  ;;  %1531 = vmatpush1.msra.mxu1 %v6676_v57  ;;  %6701 = vst [vmem:[#allocation11_spill] sm:$0xff] %v4610_v17  ;;  %v6703_v48 = vand.u32 4294901760, %v6702_v42  ;;  %v6704_v54 = vld [vmem:[#allocation46_spill] sm:$0xff]  ;;  %v4617_v57 = vand.u32 4294901760, %v259_v4  ;;  %v4634_v50 = vand.u32 4294901760, %v255_v22  ;;  %v4673_v42 = vand.u32 4294901760, %v248_v40 }
  0xfc   : > { %1358 = vmatprep.subr.mxu0 %v6678_v6  ;;  %1533 = vmatprep.subr.mxu1 %v6679_v19  ;;  %v6707_v6 = vand.u32 4294901760, %v6706_v63  ;;  %v4623_v19 = vsub.f32 %v263_v51, %v4601_v3  ;;  %v4641_v51 = vsub.f32 %v260_v35, %v4610_v17 }
  0xfd   : > { %1362 = vmatpush2.msra.mxu0 %v6681_v62  ;;  %1535 = vmatpush1.msra.mxu1 %v6682_v33  ;;  %6705 = vst [vmem:[#allocation29_spill] sm:$0xff] %v4617_v57  ;;  %v4627_v62 = vsub.f32 %v264_v58, %v4599_v0  ;;  %v6708_v33 = vld [vmem:[#allocation83_spill] sm:$0xff]  ;;  %6712 = vst [vmem:[#allocation31_spill] sm:$0xff] %v4634_v50  ;;  %v6715_v58 = vld [vmem:[#allocation86_spill] sm:$0xff] }
  0xfe   : > { %1366 = vmatprep.subr.mxu0 %v6684_v34  ;;  %1537 = vmatprep.subr.mxu1 %v6685_v60  ;;  %v6709_v37 = vand.u32 4294901760, %v6708_v33  ;;  %v6710_v34 = vld [vmem:[#allocation50_spill] sm:$0xff]  ;;  %v4632_v60 = vand.u32 4294901760, %v256_v8  ;;  %v6716_v23 = vand.u32 4294901760, %v6715_v58  ;;  %6727 = vst [vmem:[#allocation54_spill] sm:$0xff] %v4673_v42  ;;  %v6736_v58 = vld [vmem:[#allocation95_spill] sm:$0xff] }
  0xff   : > { %1370 = vmatpush2.msra.mxu0 %v6687_v14  ;;  %1539 = vmatpush1.msra.mxu1 %v6688_v18  ;;  %v251_v14 = vld [vmem:[%s3388_s19 + $0x190] sm:$0xff]  ;;  %v6186_v35 = vand.u32 4294901760, %v4627_v62  ;;  %v6732_v33 = vld [vmem:[#allocation94_spill] sm:$0xff] }
 0x100   : > { %1374 = vmatprep.subr.mxu0 %v6690_v25  ;;  %1541 = vmatprep.subr.mxu1 %v6691_v31  ;;  %6711 = vst [vmem:[#allocation12_spill] sm:$0xff] %v4632_v60  ;;  %v4647_v25 = vsub.f32 %v259_v4, %v4617_v57  ;;  %v4649_v31 = vand.u32 4294901760, %v252_v53  ;;  %v4664_v4 = vsub.f32 %v255_v22, %v4634_v50  ;;  %v6729_v22 = vld [vmem:[#allocation93_spill] sm:$0xff] }
 0x101   : > { %1378 = vmatpush2.msra.mxu0 %v6693_v45  ;;  %1543 = vmatpush2.msra.mxu1 %v6694_v59  ;;  %v247_v45 = vld [vmem:[%s3388_s19 + $0x170] sm:$0xff]  ;;  %v6718_v59 = vld [vmem:[#allocation87_spill] sm:$0xff]  ;;  %v6730_v63 = vand.u32 4294901760, %v6729_v22  ;;  %v6743_v22 = vld [vmem:[#allocation98_spill] sm:$0xff] }
 0x102   : > { %1382 = vmatprep.subr.mxu0 %v6696_v9  ;;  %1545 = vmatprep.subr.mxu1 %v6697_v10  ;;  %6717 = vst [vmem:[#allocation13_spill] sm:$0xff] %v4649_v31  ;;  %v6719_v5 = vand.u32 4294901760, %v6718_v59  ;;  %v6185_v9 = vand.u32 4294901760, %v4623_v19  ;;  %6723 = vst [vmem:[#allocation48_spill] sm:$0xff] %v4664_v4  ;;  %v6184_v59 = vand.u32 4294901760, %v4664_v4 }
 0x103   : > { %1386 = vmatpush2.msra.mxu0 %v6699_v15  ;;  %1547 = vmatpush2.msra.mxu1 %v6700_v16  ;;  %v4668_v15 = vsub.f32 %v256_v8, %v4632_v60  ;;  %v6725_v16 = vld [vmem:[#allocation91_spill] sm:$0xff]  ;;  %v6181_v8 = vand.u32 4294901760, %v4647_v25 }
 0x104   : > { %1390 = vmatprep.subr.mxu0 %v6703_v48  ;;  %1549 = vmatprep.subr.mxu1 %v6704_v54  ;;  %v4675_v48 = vand.u32 4294901760, %v247_v45  ;;  %v244_v54 = vld [vmem:[%s3388_s19 + $0x158] sm:$0xff] }
 0x105   : > { %1394 = vmatpush2.msra.mxu0 %v6707_v6  ;;  %1551 = vmatpush2.msra.mxu1 %v6582_v28  ;;  %v6713_v28 = vld [vmem:[#allocation85_spill] sm:$0xff]  ;;  %6724 = vst [vmem:[#allocation52_spill] sm:$0xff] %v4668_v15  ;;  %v4684_v6 = vsub.f32 %v252_v53, %v4649_v31  ;;  %v4702_v53 = vand.u32 4294901760, %v243_v11 }
 0x106   : > { %1398 = vmatprep.subr.mxu0 %v6709_v37  ;;  %1553 = vmatprep.subr.mxu1 %v6710_v34  ;;  %v6714_v18 = vand.u32 4294901760, %v6713_v28  ;;  %6728 = vst [vmem:[#allocation56_spill] sm:$0xff] %v4675_v48  ;;  %v4695_v34 = vsub.f32 %v4627_v62, %v6186_v35  ;;  %v240_v28 = vld [vmem:[%s3388_s19 + $0x138] sm:$0xff] }
 0x107   : > { %1555 = vmatpush2.msra.mxu1 %v6586_v55  ;;  %v4656_v55 = vand.u32 4294901760, %v251_v14  ;;  %6731 = vst [vmem:[#allocation58_spill] sm:$0xff] %v4684_v6  ;;  %6735 = vst [vmem:[#allocation62_spill] sm:$0xff] %v4702_v53  ;;  %v6756_v35 = vld [vmem:[#allocation106_spill] sm:$0xff] }
 0x108   : > { %1402 = vmatpush2.msra.mxu0 %v6714_v18  ;;  %1557 = vmatprep.subr.mxu1 %v6588_v44  ;;  %v6721_v44 = vld [vmem:[#allocation89_spill] sm:$0xff] }
 0x109   : > { %1406 = vmatprep.subr.mxu0 %v6716_v23  ;;  %1559 = vmatpush2.msra.mxu1 %v6590_v43  ;;  %6720 = vst [vmem:[#allocation33_spill] sm:$0xff] %v4656_v55  ;;  %v6722_v10 = vand.u32 4294901760, %v6721_v44  ;;  %v6726_v43 = vand.u32 4294901760, %v6725_v16  ;;  %v4690_v37 = vsub.f32 %v251_v14, %v4656_v55  ;;  %v239_v18 = vld [vmem:[%s3388_s19 + $0x130] sm:$0xff]  ;;  %v4709_v14 = vand.u32 4294901760, %v244_v54 }
 0x10a   : > { %1410 = vmatpush2.msra.mxu0 %v6719_v5  ;;  %1561 = vmatprep.subr.mxu1 %v6592_v56  ;;  %v6182_v56 = vand.u32 4294901760, %v4641_v51  ;;  %v6183_v23 = vand.u32 4294901760, %v4668_v15  ;;  %v6739_v5 = vld [vmem:[#allocation96_spill] sm:$0xff] }
 0x10b   : > { %1414 = vmatprep.subr.mxu0 %v6722_v10  ;;  %1563 = vmatpush2.msra.mxu1 %v6593_v21  ;;  %v6733_v21 = vand.u32 4294901760, %v6732_v33  ;;  %6734 = vst [vmem:[#allocation60_spill] sm:$0xff] %v4690_v37  ;;  %6738 = vst [vmem:[#allocation64_spill] sm:$0xff] %v4709_v14  ;;  %v6740_v44 = vand.u32 4294901760, %v6739_v5  ;;  %v4717_v10 = vsub.f32 %v247_v45, %v4675_v48  ;;  %v4736_v45 = vand.u32 4294901760, %v240_v28 }
 0x10c   : > { %1418 = vmatpush2.msra.mxu0 %v6726_v43  ;;  %1565 = vmatprep.subr.mxu1 %v6595_v38  ;;  %v4700_v38 = vsub.f32 %v4623_v19, %v6185_v9  ;;  %v4722_v16 = vsub.f32 %v4641_v51, %v6182_v56  ;;  %v4726_v43 = vsub.f32 %v248_v40, %v4673_v42  ;;  %v4738_v33 = vand.u32 4294901760, %v239_v18  ;;  %v231_v56 = vld [vmem:[%s3388_s19 + $0xf0] sm:$0xff] }
 0x10d   : > { %1422 = vmatprep.subr.mxu0 %v6730_v63  ;;  %1567 = vmatpush2.msra.mxu1 %v6596_v7  ;;  %v6737_v7 = vand.u32 4294901760, %v6736_v58  ;;  %6741 = vst [vmem:[#allocation66_spill] sm:$0xff] %v4717_v10  ;;  %v6744_v63 = vand.u32 4294901760, %v6743_v22  ;;  %6745 = vst [vmem:[#allocation70_spill] sm:$0xff] %v4736_v45  ;;  %v6187_v40 = vand.u32 4294901760, %v4684_v6  ;;  %v6747_v58 = vld [vmem:[#allocation101_spill] sm:$0xff] }
 0x10e   : > { %1426 = vmatpush2.msra.mxu0 %v6733_v21  ;;  %1569 = vmatprep.subr.mxu1 %v6597_v52  ;;  %v235_v52 = vld [vmem:[%s3388_s19 + $0x110] sm:$0xff]  ;;  %6742 = vst [vmem:[#allocation68_spill] sm:$0xff] %v4726_v43  ;;  %6746 = vst [vmem:[#allocation72_spill] sm:$0xff] %v4738_v33  ;;  %v236_v21 = vld [vmem:[%s3388_s19 + $0x118] sm:$0xff]  ;;  %v6188_v22 = vand.u32 4294901760, %v4690_v37  ;;  %v6757_v5 = vand.u32 4294901760, %v6756_v35 }
 0x10f   : > { %1430 = vmatprep.subr.mxu0 %v6737_v7  ;;  %1571 = vmatpush2.msra.mxu1 %v6598_v29  ;;  %v4734_v29 = vsub.f32 %v4647_v25, %v6181_v8  ;;  %v6748_v7 = vand.u32 4294901760, %v6747_v58  ;;  %v4757_v58 = vsub.f32 %v4668_v15, %v6183_v23  ;;  %v4775_v23 = vand.u32 4294901760, %v236_v21  ;;  %v6762_v35 = vld [vmem:[#allocation80_spill] sm:$0xff] }
 0x110   : > { %1434 = vmatpush2.msra.mxu0 %v6740_v44  ;;  %1573 = vmatprep.subr.mxu1 %v6599_v46  ;;  %v4748_v44 = vsub.f32 %v243_v11, %v4702_v53  ;;  %v4764_v11 = vand.u32 4294901760, %v235_v52  ;;  %v6760_v46 = vld [vmem:[#allocation107_spill] sm:$0xff] }
 0x111   : > { %1438 = vmatprep.subr.mxu0 %v6744_v63  ;;  %1575 = vmatpush2.msra.mxu1 %v6600_v1  ;;  %v6750_v63 = vld [vmem:[#allocation103_spill] sm:$0xff]  ;;  %v4762_v1 = vsub.f32 %v4664_v4, %v6184_v59  ;;  %6755 = vst [vmem:[#allocation88_spill] sm:$0xff] %v4775_v23  ;;  %v6761_v9 = vand.u32 4294901760, %v6760_v46  ;;  %v223_v46 = vld [vmem:[%s3388_s19 + $0xb0] sm:$0xff]  ;;  %v4836_v47 = vsub.f32 %v236_v21, %v4775_v23 }
 0x112   : > { %1442 = vmatpush2.msra.mxu0 %v6748_v7  ;;  %6749 = vst [vmem:[#allocation74_spill] sm:$0xff] %v4748_v44  ;;  %v6751_v8 = vand.u32 4294901760, %v6750_v63  ;;  %1577 = vmatprep.subr.mxu1 %v6601_v36  ;;  %6752 = vst [vmem:[#allocation76_spill] sm:$0xff] %v4764_v11  ;;  %v232_v7 = vld [vmem:[%s3388_s19 + $0xf8] sm:$0xff]  ;;  %v4769_v63 = vsub.f32 %v244_v54, %v4709_v14  ;;  %v6754_v36 = vand.u32 4294901760, %v4285_v30  ;;  %v6765_v54 = vand.u32 4294901760, %v4324_v61 }
 0x113   : > { %1579 = vmatpush2.msra.mxu1 %v6602_v41  ;;  %v4784_v30 = vsub.f32 %v239_v18, %v4738_v33  ;;  %v4789_v41 = vsub.f32 %v4684_v6, %v6187_v40  ;;  %v4803_v18 = vand.u32 4294901760, %v232_v7  ;;  %v228_v40 = vld [vmem:[%s3388_s19 + $0xd8] sm:$0xff]  ;;  %6774 = vst [vmem:[#allocation16_spill] sm:$0xff] %v4836_v47  ;;  %v6776_v59 = vld [vmem:[#allocation99_spill] sm:$0xff]  ;;  %v219_v4 = vld [vmem:[%s3388_s19 + $0x90] sm:$0xff] }
 0x114   : > { %1446 = vmatprep.subr.mxu0 %v6751_v8  ;;  %6753 = vst [vmem:[#allocation78_spill] sm:$0xff] %v4769_v63  ;;  %1581 = vmatprep.subr.mxu1 %v6603_v20  ;;  %v4793_v8 = vsub.f32 %v240_v28, %v4736_v45  ;;  %v4801_v20 = vsub.f32 %v4690_v37, %v6188_v22  ;;  %v6770_v37 = vld [vmem:[#allocation97_spill] sm:$0xff]  ;;  %v6771_v28 = vand.u32 4294901760, %v4726_v43 }
 0x115   : > { %1450 = vmatpush2.msra.mxu0 %v6754_v36  ;;  %6758 = vst [vmem:[#allocation90_spill] sm:$0xff] %v4784_v30  ;;  %v227_v36 = vld [vmem:[%s3388_s19 + $0xd0] sm:$0xff]  ;;  %1583 = vmatpush2.msra.mxu1 %v6762_v35  ;;  %6763 = vst [vmem:[#allocation14_spill] sm:$0xff] %v4803_v18  ;;  %v4815_v22 = vsub.f32 %v235_v52, %v4764_v11  ;;  %v224_v35 = vld [vmem:[%s3388_s19 + $0xb8] sm:$0xff]  ;;  %v4858_v15 = vsub.f32 %v232_v7, %v4803_v18  ;;  %v4893_v7 = vand.u32 4294901760, %v219_v4 }
 0x116   : > { %1454 = vmatprep.subr.mxu0 %v6757_v5  ;;  %6759 = vst [vmem:[#allocation92_spill] sm:$0xff] %v4793_v8  ;;  %v4805_v5 = vand.u32 4294901760, %v231_v56  ;;  %1468 = vmatprep.mubr.f32.mxu0 %v6770_v37  ;;  %v4824_v61 = vsub.f32 %v4726_v43, %v6771_v28  ;;  %v4831_v52 = vand.u32 4294901760, %v227_v36  ;;  %v4841_v43 = vand.u32 4294901760, %v228_v40 }
 0x117   : > { %1458 = vmatpush2.msra.mxu0 %v6761_v9  ;;  %v6766_v9 = vld [vmem:[#allocation82_spill] sm:$0xff]  ;;  %6767 = vst [vmem:[#allocation15_spill] sm:$0xff] %v4815_v22  ;;  %6780 = vst [vmem:[#allocation41_spill] sm:$0xff] %v4858_v15  ;;  %1605 = vmatprep.mubr.f32.mxu1 %v6770_v37 }
 0x118   : > { %6764 = vst [vmem:[#allocation35_spill] sm:$0xff] %v4805_v5  ;;  %1462 = vmatprep.subr.mxu0 %v6765_v54  ;;  %1585 = vmatprep.subr.mxu1 %v6766_v9  ;;  %v6772_v54 = vand.u32 4294901760, %v4717_v10  ;;  %6773 = vst [vmem:[#allocation37_spill] sm:$0xff] %v4831_v52  ;;  %v4849_v6 = vsub.f32 %v231_v56, %v4805_v5  ;;  %v4867_v56 = vand.u32 4294901760, %v224_v35 }
 0x119   : > { %1466 = vmatpush2.msra.mxu0 %v6769_v49  ;;  %v6775_v49 = vld [vmem:[#allocation84_spill] sm:$0xff]  ;;  %6777 = vst [vmem:[#allocation39_spill] sm:$0xff] %v4841_v43  ;;  %6787 = vst [vmem:[#allocation45_spill] sm:$0xff] %v4893_v7 }
 0x11a   : > { %v4829_v9 = vsub.f32 %v4717_v10, %v6772_v54  ;;  %1587 = vmatpush2.msra.mxu1 %v6775_v49  ;;  %1470 = vmatmul.mubr.f32.vlgmr.msra.gmra.mxu0 %v6776_v59  ;;  %6778 = vst [vmem:[#allocation17_spill] sm:$0xff] %v4849_v6  ;;  %v6779_v49 = vand.u32 4294901760, %v4748_v44  ;;  %6782 = vst [vmem:[#allocation18_spill] sm:$0xff] %v4867_v56  ;;  %v4869_v10 = vand.u32 4294901760, %v223_v46 }
 0x11b   : > { %1589 = vmatprep.subr.mxu1 %v4136_v27  ;;  %1614 = vmatprep.subr.mxu0 %v4599_v0  ;;  %v6781_v27 = vand.u32 4294901760, %v4769_v63 }
 0x11c   : > { %v4854_v28 = vsub.f32 %v4748_v44, %v6779_v49  ;;  %1591 = vmatpush2.msra.mxu1 %v4148_v24  ;;  %1616 = vmatpush1.msra.mxu0 %v4601_v3  ;;  %6783 = vst [vmem:[#allocation43_spill] sm:$0xff] %v4869_v10  ;;  %v220_v49 = vld [vmem:[%s3388_s19 + $0x98] sm:$0xff]  ;;  %v4898_v44 = vsub.f32 %v228_v40, %v4841_v43 }
 0x11d   : > { %v4865_v21 = vsub.f32 %v4769_v63, %v6781_v27  ;;  %1593 = vmatprep.subr.mxu1 %v6609_v12  ;;  %1618 = vmatprep.subr.mxu0 %v4610_v17  ;;  %v4878_v27 = vsub.f32 %v227_v36, %v4831_v52  ;;  %v6785_v63 = vand.u32 4294901760, %v4793_v8  ;;  %v6786_v12 = vand.u32 4294901760, %v4784_v30  ;;  %v216_v36 = vld [vmem:[%s3388_s19 + $0x78] sm:$0xff]  ;;  %v215_v17 = vld [vmem:[%s3388_s19 + $0x70] sm:$0xff] }
 0x11e   : > { %1595 = vmatpush2.msra.mxu1 %v6611_v2  ;;  %1620 = vmatpush1.msra.mxu0 %v4617_v57  ;;  %6788 = vst [vmem:[#allocation20_spill] sm:$0xff] %v4898_v44  ;;  %v4920_v57 = vsub.f32 %v224_v35, %v4867_v56 }
 0x11f   : > { %6784 = vst [vmem:[#allocation19_spill] sm:$0xff] %v4878_v27  ;;  %v4886_v54 = vsub.f32 %v4793_v8, %v6785_v63  ;;  %v4891_v24 = vsub.f32 %v4784_v30, %v6786_v12  ;;  %1597 = vmatprep.subr.mxu1 %v6613_v13  ;;  %1622 = vmatprep.subr.mxu0 %v4632_v60  ;;  %v4903_v63 = vand.u32 4294901760, %v220_v49  ;;  %v6791_v13 = vand.u32 4294901760, %v4815_v22  ;;  %v211_v60 = vld [vmem:[%s3388_s19 + $0x50] sm:$0xff] }
 0x120   : > { %1599 = vmatpush2.msra.mxu1 %v4206_v39  ;;  %1624 = vmatpush1.msra.mxu0 %v4634_v50  ;;  %v4911_v8 = vsub.f32 %v223_v46, %v4869_v10  ;;  %6792 = vst [vmem:[#allocation49_spill] sm:$0xff] %v4920_v57  ;;  %v6793_v39 = vand.u32 4294901760, %v4836_v47  ;;  %v4929_v46 = vand.u32 4294901760, %v216_v36  ;;  %v4931_v30 = vand.u32 4294901760, %v215_v17 }
 0x121   : > { %6789 = vst [vmem:[#allocation47_spill] sm:$0xff] %v4903_v63  ;;  %v4916_v2 = vsub.f32 %v4815_v22, %v6791_v13  ;;  %1601 = vmatprep.subr.mxu1 %v4220_v32  ;;  %1626 = vmatprep.subr.mxu0 %v4649_v31  ;;  %v212_v13 = vld [vmem:[%s3388_s19 + $0x58] sm:$0xff]  ;;  %v6797_v31 = vand.u32 4294901760, %v4858_v15  ;;  %v4955_v35 = vand.u32 4294901760, %v211_v60  ;;  %v4960_v22 = vsub.f32 %v220_v49, %v4903_v63 }
 0x122   : > { %6790 = vst [vmem:[#allocation21_spill] sm:$0xff] %v4911_v8  ;;  %v4927_v40 = vsub.f32 %v4836_v47, %v6793_v39  ;;  %6794 = vst [vmem:[#allocation22_spill] sm:$0xff] %v4929_v46  ;;  %1603 = vmatpush2.msra.mxu1 %v4236_v26  ;;  %v4940_v39 = vsub.f32 %v219_v4, %v4893_v7  ;;  %1628 = vmatpush1.msra.mxu0 %v4656_v55  ;;  %v6798_v26 = vand.u32 4294901760, %v4849_v6  ;;  %v208_v4 = vld [vmem:[%s3388_s19 + $0x38] sm:$0xff]  ;;  %v207_v47 = vld [vmem:[%s3388_s19 + $0x30] sm:$0xff] }
 0x123   : > { %6795 = vst [vmem:[#allocation51_spill] sm:$0xff] %v4931_v30  ;;  %1607 = vmatmul.mubr.f32.vlgmr.msra.gmra.mxu1 %v6776_v59  ;;  %v4948_v12 = vsub.f32 %v4858_v15, %v6797_v31  ;;  %6799 = vst [vmem:[#allocation53_spill] sm:$0xff] %v4955_v35  ;;  %1630 = vmatprep.subr.mxu0 %v4673_v42  ;;  %v6801_v55 = vand.u32 4294901760, %v4695_v34  ;;  %v4966_v15 = vand.u32 4294901760, %v212_v13  ;;  %v6803_v50 = vand.u32 4294901760, %v4700_v38  ;;  %v203_v31 = vld [vmem:[%s3388_s19 + $0x10] sm:$0xff] }
 0x124   : > { %6796 = vst [vmem:[#allocation23_spill] sm:$0xff] %v4940_v39  ;;  %v4953_v32 = vsub.f32 %v4849_v6, %v6798_v26  ;;  %6800 = vst [vmem:[#allocation24_spill] sm:$0xff] %v4960_v22  ;;  %1632 = vmatpush1.msra.mxu0 %v4675_v48  ;;  %v4975_v42 = vsub.f32 %v215_v17, %v4931_v30  ;;  %v4984_v26 = vsub.f32 %v216_v36, %v4929_v46  ;;  %v204_v49 = vld [vmem:[%s3388_s19 + $0x18] sm:$0xff] }
 0x125   : > { %1763 = vmatprep.subr.mxu1 %v6801_v55  ;;  %6802 = vst [vmem:[#allocation55_spill] sm:$0xff] %v4966_v15  ;;  %v6805_v55 = vand.u32 4294901760, %v4878_v27  ;;  %1634 = vmatprep.subr.mxu0 %v4709_v14  ;;  %v6807_v6 = vand.u32 4294901760, %v4722_v16  ;;  %v4994_v17 = vand.u32 4294901760, %v208_v4  ;;  %v6814_v36 = vand.u32 4294901760, %v4920_v57  ;;  %v328_v16 = vld [vmem:[%s3388_s19 + $0x3f8] sm:$0xff] }
 0x126   : > { %1769 = vmatpush1.msra.mxu1 %v6803_v50  ;;  %6804 = vst [vmem:[#allocation25_spill] sm:$0xff] %v4975_v42  ;;  %6806 = vst [vmem:[#allocation57_spill] sm:$0xff] %v4984_v26  ;;  %v6808_v50 = vand.u32 4294901760, %v4898_v44  ;;  %1636 = vmatpush1.msra.mxu0 %v4702_v53  ;;  %v5027_v14 = vsub.f32 %v212_v13, %v4966_v15  ;;  %v5062_v13 = vand.u32 4294901760, %v328_v16 }
 0x127   : > { %v4980_v34 = vsub.f32 %v4878_v27, %v6805_v55  ;;  %1775 = vmatprep.subr.mxu1 %v6807_v6  ;;  %6809 = vst [vmem:[#allocation26_spill] sm:$0xff] %v4994_v17  ;;  %v4996_v55 = vand.u32 4294901760, %v207_v47  ;;  %v6811_v27 = vand.u32 4294901760, %v4734_v29  ;;  %1638 = vmatprep.subr.mxu0 %v4736_v45  ;;  %v5015_v53 = vsub.f32 %v4920_v57, %v6814_v36  ;;  %v327_v6 = vld [vmem:[%s3388_s19 + $0x3f0] sm:$0xff] }
 0x128   : > { %v4992_v38 = vsub.f32 %v4898_v44, %v6808_v50  ;;  %v5006_v50 = vsub.f32 %v211_v60, %v4955_v35  ;;  %v6813_v44 = vand.u32 4294901760, %v4757_v58  ;;  %v6815_v29 = vand.u32 4294901760, %v4911_v8  ;;  %6817 = vst [vmem:[#allocation28_spill] sm:$0xff] %v5027_v14  ;;  %1640 = vmatpush1.msra.mxu0 %v4738_v33  ;;  %v324_v58 = vld [vmem:[%s3388_s19 + $0x3d8] sm:$0xff]  ;;  %v323_v57 = vld [vmem:[%s3388_s19 + $0x3d0] sm:$0xff]  ;;  %6826 = vst [vmem:[#allocation32_spill] sm:$0xff] %v5062_v13 }
 0x129   : > { %6810 = vst [vmem:[#allocation59_spill] sm:$0xff] %v4996_v55  ;;  %1781 = vmatpush1.msra.mxu1 %v6811_v27  ;;  %v5022_v60 = vand.u32 4294901760, %v203_v31  ;;  %v5033_v36 = vand.u32 4294901760, %v204_v49  ;;  %1642 = vmatprep.subr.mxu0 %v4775_v23  ;;  %v6820_v45 = vand.u32 4294901760, %v4789_v41  ;;  %v5042_v33 = vsub.f32 %v207_v47, %v4996_v55 }
 0x12a   : > { %6812 = vst [vmem:[#allocation27_spill] sm:$0xff] %v5006_v50  ;;  %1787 = vmatprep.subr.mxu1 %v6813_v44  ;;  %v5020_v27 = vsub.f32 %v4911_v8, %v6815_v29  ;;  %v6818_v44 = vand.u32 4294901760, %v4762_v1  ;;  %v6822_v1 = vand.u32 4294901760, %v4940_v39  ;;  %v5052_v29 = vsub.f32 %v208_v4, %v4994_v17  ;;  %1644 = vmatpush1.msra.mxu0 %v4764_v11  ;;  %v320_v11 = vld [vmem:[%s3388_s19 + $0x3b8] sm:$0xff] }
 0x12b   : > { %6816 = vst [vmem:[#allocation61_spill] sm:$0xff] %v5022_v60  ;;  %6819 = vst [vmem:[#allocation63_spill] sm:$0xff] %v5033_v36  ;;  %v6824_v41 = vand.u32 4294901760, %v4801_v20  ;;  %1646 = vmatprep.subr.mxu0 %v4803_v18  ;;  %v6828_v4 = vand.u32 4294901760, %v4824_v61  ;;  %v6831_v8 = vand.u32 4294901760, %v4984_v26  ;;  %v5091_v20 = vand.u32 4294901760, %v323_v57  ;;  %2143 = vmatprep.mubr.f32.mxu1 %v6770_v37 }
 0x12c   : > { %1793 = vmatpush1.msra.mxu1 %v6818_v44  ;;  %6821 = vst [vmem:[#allocation30_spill] sm:$0xff] %v5042_v33  ;;  %v5047_v44 = vsub.f32 %v4940_v39, %v6822_v1  ;;  %6823 = vst [vmem:[#allocation65_spill] sm:$0xff] %v5052_v29  ;;  %v5064_v1 = vand.u32 4294901760, %v327_v6  ;;  %1648 = vmatpush1.msra.mxu0 %v4805_v5  ;;  %v6830_v39 = vand.u32 4294901760, %v4829_v9  ;;  %v319_v5 = vld [vmem:[%s3388_s19 + $0x3b0] sm:$0xff]  ;;  %v6835_v9 = vand.u32 4294901760, %v4865_v21 }
 0x12d   : > { %1799 = vmatprep.subr.mxu1 %v6820_v45  ;;  %v6825_v45 = vand.u32 4294901760, %v4960_v22  ;;  %v5082_v61 = vsub.f32 %v4984_v26, %v6831_v8  ;;  %6834 = vst [vmem:[#allocation36_spill] sm:$0xff] %v5091_v20  ;;  %1650 = vmatprep.subr.mxu0 %v4841_v43  ;;  %v6837_v26 = vand.u32 4294901760, %v4854_v28  ;;  %v316_v18 = vld [vmem:[%s3388_s19 + $0x398] sm:$0xff]  ;;  %v6842_v28 = vand.u32 4294901760, %v5027_v14  ;;  %v6958_v37 = vld [vmem:[#allocation33_spill] sm:$0xff] }
 0x12e   : > { %1805 = vmatpush1.msra.mxu1 %v6824_v41  ;;  %6827 = vst [vmem:[#allocation67_spill] sm:$0xff] %v5064_v1  ;;  %1652 = vmatpush1.msra.mxu0 %v4831_v52  ;;  %v5110_v21 = vsub.f32 %v327_v6, %v5064_v1  ;;  %v5129_v6 = vand.u32 4294901760, %v320_v11  ;;  %v6848_v52 = vand.u32 4294901760, %v4927_v40  ;;  %v6849_v43 = vand.u32 4294901760, %v5052_v29 }
 0x12f   : > { %v5060_v47 = vsub.f32 %v4960_v22, %v6825_v45  ;;  %1811 = vmatprep.subr.mxu1 %v6828_v4  ;;  %v5073_v45 = vsub.f32 %v203_v31, %v5022_v60  ;;  %v6832_v4 = vand.u32 4294901760, %v4975_v42  ;;  %v5089_v31 = vand.u32 4294901760, %v324_v58  ;;  %1654 = vmatprep.subr.mxu0 %v4867_v56 }
 0x130   : > { %1817 = vmatpush1.msra.mxu1 %v6830_v39  ;;  %6838 = vst [vmem:[#allocation38_spill] sm:$0xff] %v5110_v21  ;;  %v6841_v39 = vand.u32 4294901760, %v4886_v54  ;;  %6843 = vst [vmem:[#allocation40_spill] sm:$0xff] %v5129_v6  ;;  %1656 = vmatpush1.msra.mxu0 %v4869_v10  ;;  %v312_v10 = vld [vmem:[%s3388_s19 + $0x378] sm:$0xff]  ;;  %v6854_v54 = vand.u32 4294901760, %v4948_v12  ;;  %v6858_v12 = vand.u32 4294901760, %v4953_v32 }
 0x131   : > { %6829 = vst [vmem:[#allocation34_spill] sm:$0xff] %v5073_v45  ;;  %v5087_v41 = vsub.f32 %v4975_v42, %v6832_v4  ;;  %6833 = vst [vmem:[#allocation69_spill] sm:$0xff] %v5089_v31  ;;  %1823 = vmatprep.subr.mxu1 %v6835_v9  ;;  %v5102_v4 = vsub.f32 %v204_v49, %v5033_v36  ;;  %v315_v42 = vld [vmem:[%s3388_s19 + $0x390] sm:$0xff]  ;;  %v6839_v9 = vand.u32 4294901760, %v5006_v50  ;;  %1658 = vmatprep.subr.mxu0 %v4903_v63 }
 0x132   : > { %1829 = vmatpush1.msra.mxu1 %v6837_v26  ;;  %v5119_v49 = vsub.f32 %v328_v16, %v5062_v13  ;;  %v5127_v26 = vsub.f32 %v5027_v14, %v6842_v28  ;;  %v6845_v16 = vand.u32 4294901760, %v4891_v24  ;;  %v5140_v28 = vsub.f32 %v323_v57, %v5091_v20  ;;  %v311_v63 = vld [vmem:[%s3388_s19 + $0x370] sm:$0xff]  ;;  %1660 = vmatpush1.msra.mxu0 %v4893_v7 }
 0x133   : > { %6836 = vst [vmem:[#allocation71_spill] sm:$0xff] %v5102_v4  ;;  %v5115_v8 = vsub.f32 %v5006_v50, %v6839_v9  ;;  %1835 = vmatprep.subr.mxu1 %v6841_v39  ;;  %v5131_v9 = vand.u32 4294901760, %v319_v5  ;;  %v5142_v56 = vand.u32 4294901760, %v315_v42  ;;  %v5150_v24 = vsub.f32 %v5052_v29, %v6849_v43  ;;  %1662 = vmatprep.subr.mxu0 %v4929_v46  ;;  %v308_v29 = vld [vmem:[%s3388_s19 + $0x358] sm:$0xff]  ;;  %v303_v46 = vld [vmem:[%s3388_s19 + $0x330] sm:$0xff] }
 0x134   : > { %6840 = vst [vmem:[#allocation73_spill] sm:$0xff] %v5119_v49  ;;  %1841 = vmatpush1.msra.mxu1 %v6845_v16  ;;  %6846 = vst [vmem:[#allocation42_spill] sm:$0xff] %v5140_v28  ;;  %v6850_v16 = vand.u32 4294901760, %v5042_v33  ;;  %v5157_v57 = vand.u32 4294901760, %v316_v18  ;;  %1664 = vmatpush1.msra.mxu0 %v4931_v30  ;;  %v5196_v7 = vand.u32 4294901760, %v311_v63  ;;  %v6867_v32 = vand.u32 4294901760, %v5110_v21 }
 0x135   : > { %6844 = vst [vmem:[#allocation75_spill] sm:$0xff] %v5131_v9  ;;  %6847 = vst [vmem:[#allocation77_spill] sm:$0xff] %v5142_v56  ;;  %1847 = vmatprep.subr.mxu1 %v6848_v52  ;;  %v6852_v52 = vand.u32 4294901760, %v4916_v2  ;;  %v5177_v2 = vsub.f32 %v319_v5, %v5131_v9  ;;  %v5194_v5 = vand.u32 4294901760, %v312_v10  ;;  %1666 = vmatprep.subr.mxu0 %v4966_v15  ;;  %v6871_v15 = vand.u32 4294901760, %v5020_v27 }
 0x136   : > { %v5155_v39 = vsub.f32 %v5042_v33, %v6850_v16  ;;  %6851 = vst [vmem:[#allocation44_spill] sm:$0xff] %v5157_v57  ;;  %v5169_v16 = vsub.f32 %v324_v58, %v5089_v31  ;;  %v307_v33 = vld [vmem:[%s3388_s19 + $0x350] sm:$0xff]  ;;  %v5186_v58 = vsub.f32 %v320_v11, %v5129_v6  ;;  %6861 = vst [vmem:[#allocation85_spill] sm:$0xff] %v5196_v7  ;;  %v6862_v11 = vand.u32 4294901760, %v4992_v38 }
 0x137   : > { %1853 = vmatpush1.msra.mxu1 %v6852_v52  ;;  %6855 = vst [vmem:[#allocation46_spill] sm:$0xff] %v5177_v2  ;;  %v6856_v52 = vand.u32 4294901760, %v5073_v45  ;;  %6860 = vst [vmem:[#allocation50_spill] sm:$0xff] %v5194_v5  ;;  %v5209_v30 = vand.u32 4294901760, %v307_v33  ;;  %1668 = vmatpush1.msra.mxu0 %v4955_v35  ;;  %v6866_v38 = vand.u32 4294901760, %v5119_v49  ;;  %v5223_v40 = vsub.f32 %v5110_v21, %v6867_v32  ;;  %v299_v21 = vld [vmem:[%s3388_s19 + $0x310] sm:$0xff] }
 0x138   : > { %6853 = vst [vmem:[#allocation79_spill] sm:$0xff] %v5169_v16  ;;  %1859 = vmatprep.subr.mxu1 %v6854_v54  ;;  %6857 = vst [vmem:[#allocation81_spill] sm:$0xff] %v5186_v58  ;;  %v5192_v54 = vsub.f32 %v315_v42, %v5142_v56  ;;  %1670 = vmatprep.subr.mxu0 %v4994_v17  ;;  %v5236_v32 = vsub.f32 %v316_v18, %v5157_v57  ;;  %v300_v35 = vld [vmem:[%s3388_s19 + $0x318] sm:$0xff]  ;;  %v6876_v27 = vand.u32 4294901760, %v5060_v47 }
 0x139   : > { %v5182_v43 = vsub.f32 %v5073_v45, %v6856_v52  ;;  %1865 = vmatpush1.msra.mxu1 %v6858_v12  ;;  %v6863_v12 = vand.u32 4294901760, %v5102_v4  ;;  %6864 = vst [vmem:[#allocation86_spill] sm:$0xff] %v5209_v30  ;;  %v6865_v52 = vand.u32 4294901760, %v4980_v34  ;;  %v304_v45 = vld [vmem:[%s3388_s19 + $0x338] sm:$0xff]  ;;  %v6869_v34 = vand.u32 4294901760, %v5015_v53  ;;  %1672 = vmatpush1.msra.mxu0 %v4996_v55  ;;  %v295_v55 = vld [vmem:[%s3388_s19 + $0x2f0] sm:$0xff] }
 0x13a   : > { %6859 = vst [vmem:[#allocation83_spill] sm:$0xff] %v5192_v54  ;;  %1871 = vmatprep.subr.mxu1 %v6862_v11  ;;  %v5218_v11 = vsub.f32 %v5119_v49, %v6866_v38  ;;  %6870 = vst [vmem:[#allocation89_spill] sm:$0xff] %v5236_v32  ;;  %v5243_v17 = vsub.f32 %v311_v63, %v5196_v7  ;;  %v6873_v53 = vand.u32 4294901760, %v5140_v28  ;;  %1674 = vmatprep.subr.mxu0 %v5033_v36 }
 0x13b   : > { %v5207_v42 = vsub.f32 %v5102_v4, %v6863_v12  ;;  %1877 = vmatpush1.msra.mxu1 %v6865_v52  ;;  %v5225_v12 = vand.u32 4294901760, %v308_v29  ;;  %v5250_v52 = vand.u32 4294901760, %v303_v46  ;;  %v5254_v18 = vsub.f32 %v312_v10, %v5194_v5  ;;  %1676 = vmatpush1.msra.mxu0 %v5022_v60 }
 0x13c   : > { %1883 = vmatprep.subr.mxu1 %v6869_v34  ;;  %6872 = vst [vmem:[#allocation91_spill] sm:$0xff] %v5243_v17  ;;  %v5248_v34 = vsub.f32 %v5140_v28, %v6873_v53  ;;  %v5261_v63 = vsub.f32 %v307_v33, %v5209_v30  ;;  %v5263_v53 = vand.u32 4294901760, %v304_v45  ;;  %v6879_v10 = vand.u32 4294901760, %v5047_v44  ;;  %1678 = vmatprep.subr.mxu0 %v5062_v13  ;;  %v296_v28 = vld [vmem:[%s3388_s19 + $0x2f8] sm:$0xff] }
 0x13d   : > { %6868 = vst [vmem:[#allocation87_spill] sm:$0xff] %v5225_v12  ;;  %1889 = vmatpush1.msra.mxu1 %v6871_v15  ;;  %6874 = vst [vmem:[#allocation93_spill] sm:$0xff] %v5250_v52  ;;  %v1942_v15 = vand.u32 4294901760, %v5207_v42  ;;  %v1954_v36 = vand.u32 4294901760, %v5218_v11  ;;  %v5276_v33 = vand.u32 4294901760, %v299_v21  ;;  %v6882_v38 = vand.u32 4294901760, %v5082_v61  ;;  %1680 = vmatpush2.msra.mxu0 %v5064_v1 }
 0x13e   : > { %6875 = vst [vmem:[#allocation94_spill] sm:$0xff] %v5254_v18  ;;  %1895 = vmatprep.subr.mxu1 %v6876_v27  ;;  %6877 = vst [vmem:[#allocation95_spill] sm:$0xff] %v5261_v63  ;;  %v6880_v27 = vand.u32 4294901760, %v5169_v16  ;;  %v6883_v44 = vand.u32 4294901760, %v5186_v58  ;;  %v6886_v61 = vand.u32 4294901760, %v5087_v41  ;;  %1682 = vmatprep.subr.mxu0 %v5089_v31  ;;  %v6889_v60 = vand.u32 4294901760, %v5127_v26 }
 0x13f   : > { %6878 = vst [vmem:[#allocation96_spill] sm:$0xff] %v5263_v53  ;;  %1901 = vmatpush1.msra.mxu1 %v6879_v10  ;;  %6881 = vst [vmem:[#allocation98_spill] sm:$0xff] %v5276_v33  ;;  %v6884_v10 = vand.u32 4294901760, %v5177_v2  ;;  %v6890_v1 = vand.u32 4294901760, %v5192_v54  ;;  %1684 = vmatpush2.msra.mxu0 %v5091_v20  ;;  %v6893_v13 = vand.u32 4294901760, %v5115_v8  ;;  %v5330_v26 = vand.u32 4294901760, %v296_v28 }
 0x140   : > { %v5274_v42 = vsub.f32 %v5169_v16, %v6880_v27  ;;  %1907 = vmatprep.subr.mxu1 %v6882_v38  ;;  %v5285_v11 = vsub.f32 %v5186_v58, %v6883_v44  ;;  %v5292_v27 = vand.u32 4294901760, %v300_v35  ;;  %v5301_v44 = vsub.f32 %v303_v46, %v5250_v52  ;;  %v292_v38 = vld [vmem:[%s3388_s19 + $0x2d8] sm:$0xff]  ;;  %1686 = vmatprep.subr.mxu0 %v5129_v6  ;;  %v287_v20 = vld [vmem:[%s3388_s19 + $0x2b0] sm:$0xff] }
 0x141   : > { %v5290_v47 = vsub.f32 %v5177_v2, %v6884_v10  ;;  %1913 = vmatpush1.msra.mxu1 %v6886_v61  ;;  %v5305_v10 = vsub.f32 %v308_v29, %v5225_v12  ;;  %v291_v2 = vld [vmem:[%s3388_s19 + $0x2d0] sm:$0xff]  ;;  %v5314_v41 = vsub.f32 %v5192_v54, %v6890_v1  ;;  %v5316_v61 = vand.u32 4294901760, %v295_v55  ;;  %6895 = vst [vmem:[#allocation110_spill] sm:$0xff] %v5330_v26 }
 0x142   : > { %6885 = vst [vmem:[#allocation101_spill] sm:$0xff] %v5292_v27  ;;  %6887 = vst [vmem:[#allocation103_spill] sm:$0xff] %v5301_v44  ;;  %1919 = vmatprep.subr.mxu1 %v6889_v60  ;;  %v5321_v29 = vsub.f32 %v304_v45, %v5263_v53  ;;  %v1966_v60 = vand.u32 4294901760, %v5274_v42  ;;  %v5328_v1 = vsub.f32 %v299_v21, %v5276_v33  ;;  %v6896_v45 = vand.u32 4294901760, %v5150_v24 }
 0x143   : > { %6888 = vst [vmem:[#allocation106_spill] sm:$0xff] %v5305_v10  ;;  %6891 = vst [vmem:[#allocation107_spill] sm:$0xff] %v5316_v61  ;;  %1925 = vmatpush1.msra.mxu1 %v6893_v13  ;;  %v1978_v46 = vand.u32 4294901760, %v5285_v11  ;;  %v1984_v8 = vand.u32 4294901760, %v5290_v47  ;;  %v6897_v13 = vand.u32 4294901760, %v5236_v32  ;;  %v5343_v21 = vand.u32 4294901760, %v291_v2  ;;  %1688 = vmatpush2.msra.mxu0 %v5131_v9 }
 0x144   : > { %6892 = vst [vmem:[#allocation80_spill] sm:$0xff] %v5321_v29  ;;  %6894 = vst [vmem:[#allocation82_spill] sm:$0xff] %v5328_v1  ;;  %1931 = vmatprep.subr.mxu1 %v6896_v45  ;;  %v6899_v31 = vand.u32 4294901760, %v5155_v39  ;;  %v6900_v24 = vand.u32 4294901760, %v5254_v18  ;;  %v5354_v47 = vand.u32 4294901760, %v292_v38  ;;  %v5359_v6 = vsub.f32 %v300_v35, %v5292_v27  ;;  %1690 = vmatprep.subr.mxu0 %v5157_v57  ;;  %v283_v45 = vld [vmem:[%s3388_s19 + $0x290] sm:$0xff] }
 0x145   : > { %v5341_v42 = vsub.f32 %v5236_v32, %v6897_v13  ;;  %6898 = vst [vmem:[#allocation84_spill] sm:$0xff] %v5343_v21  ;;  %v288_v13 = vld [vmem:[%s3388_s19 + $0x2b8] sm:$0xff]  ;;  %v1996_v39 = vand.u32 4294901760, %v5314_v41  ;;  %1692 = vmatpush2.msra.mxu0 %v5142_v56  ;;  %v6905_v35 = vand.u32 4294901760, %v5182_v43  ;;  %v6911_v57 = vand.u32 4294901760, %v5223_v40 }
 0x146   : > { %1937 = vmatpush1.msra.mxu1 %v6899_v31  ;;  %v5352_v11 = vsub.f32 %v5254_v18, %v6900_v24  ;;  %6901 = vst [vmem:[#allocation111_spill] sm:$0xff] %v5354_v47  ;;  %6902 = vst [vmem:[#allocation112_spill] sm:$0xff] %v5359_v6  ;;  %v5364_v31 = vsub.f32 %v295_v55, %v5316_v61  ;;  %v6904_v24 = vand.u32 4294901760, %v5243_v17  ;;  %v5381_v55 = vand.u32 4294901760, %v287_v20 }
 0x147   : > { %1943 = vmatprep.subr.mxu1 %v1942_v15  ;;  %v6906_v15 = vand.u32 4294901760, %v5261_v63  ;;  %1694 = vmatprep.subr.mxu0 %v5194_v5  ;;  %v1990_v43 = vand.u32 4294901760, %v5341_v42  ;;  %v5391_v56 = vand.u32 4294901760, %v288_v13  ;;  %v6912_v5 = vand.u32 4294901760, %v5305_v10 }
 0x148   : > { %6903 = vst [vmem:[#allocation113_spill] sm:$0xff] %v5364_v31  ;;  %v5369_v9 = vsub.f32 %v5243_v17, %v6904_v24  ;;  %1949 = vmatpush1.msra.mxu1 %v6905_v35  ;;  %6907 = vst [vmem:[#allocation114_spill] sm:$0xff] %v5381_v55  ;;  %v284_v24 = vld [vmem:[%s3388_s19 + $0x298] sm:$0xff]  ;;  %v5389_v35 = vsub.f32 %v291_v2, %v5343_v21  ;;  %1696 = vmatpush2.msra.mxu0 %v5196_v7  ;;  %v2002_v18 = vand.u32 4294901760, %v5352_v11  ;;  %v279_v17 = vld [vmem:[%s3388_s19 + $0x270] sm:$0xff] }
 0x149   : > { %v5379_v41 = vsub.f32 %v5261_v63, %v6906_v15  ;;  %1955 = vmatprep.subr.mxu1 %v1954_v36  ;;  %6909 = vst [vmem:[#allocation116_spill] sm:$0xff] %v5391_v56  ;;  %v5394_v15 = vsub.f32 %v296_v28, %v5330_v26  ;;  %v2013_v36 = vsub.f32 %v5305_v10, %v6912_v5  ;;  %v5404_v2 = vand.u32 4294901760, %v283_v45  ;;  %v280_v63 = vld [vmem:[%s3388_s19 + $0x278] sm:$0xff] }
 0x14a   : > { %6908 = vst [vmem:[#allocation115_spill] sm:$0xff] %v5389_v35  ;;  %1961 = vmatpush2.msra.mxu1 %v6911_v57  ;;  %1698 = vmatprep.subr.mxu0 %v5225_v12  ;;  %v2008_v28 = vand.u32 4294901760, %v5369_v9  ;;  %v6913_v57 = vand.u32 4294901760, %v5321_v29  ;;  %v5415_v11 = vand.u32 4294901760, %v284_v24  ;;  %v5418_v5 = vsub.f32 %v292_v38, %v5354_v47 }
 0x14b   : > { %6910 = vst [vmem:[#allocation117_spill] sm:$0xff] %v5394_v15  ;;  %1967 = vmatprep.subr.mxu1 %v1966_v60  ;;  %1700 = vmatpush2.msra.mxu0 %v5209_v30  ;;  %v6915_v42 = vand.u32 4294901760, %v5248_v34  ;;  %v2020_v60 = vand.u32 4294901760, %v5379_v41  ;;  %v5425_v9 = vsub.f32 %v287_v20, %v5381_v55  ;;  %v6917_v12 = vand.u32 4294901760, %v5301_v44 }
 0x14c   : > { %v5413_v40 = vsub.f32 %v5321_v29, %v6913_v57  ;;  %6914 = vst [vmem:[#allocation118_spill] sm:$0xff] %v5418_v5  ;;  %v6918_v7 = vand.u32 4294901760, %v5328_v1  ;;  %v275_v29 = vld [vmem:[%s3388_s19 + $0x250] sm:$0xff]  ;;  %1702 = vmatprep.subr.mxu0 %v5263_v53  ;;  %v5439_v34 = vand.u32 4294901760, %v280_v63  ;;  %v5442_v41 = vand.u32 4294901760, %v279_v17 }
 0x14d   : > { %1973 = vmatpush2.msra.mxu1 %v6915_v42  ;;  %6916 = vst [vmem:[#allocation119_spill] sm:$0xff] %v5425_v9  ;;  %v5430_v57 = vsub.f32 %v5301_v44, %v6917_v12  ;;  %v276_v42 = vld [vmem:[%s3388_s19 + $0x258] sm:$0xff]  ;;  %v5446_v12 = vsub.f32 %v288_v13, %v5391_v56  ;;  %1704 = vmatpush2.msra.mxu0 %v5250_v52  ;;  %v6920_v30 = vand.u32 4294901760, %v5359_v6 }
 0x14e   : > { %v5435_v38 = vsub.f32 %v5328_v1, %v6918_v7  ;;  %1979 = vmatprep.subr.mxu1 %v1978_v46  ;;  %v2014_v7 = vand.u32 4294901760, %v2013_v36  ;;  %v5453_v46 = vsub.f32 %v283_v45, %v5404_v2  ;;  %1706 = vmatprep.subr.mxu0 %v5292_v27  ;;  %v2026_v13 = vand.u32 4294901760, %v5413_v40  ;;  %v272_v36 = vld [vmem:[%s3388_s19 + $0x238] sm:$0xff]  ;;  %v271_v40 = vld [vmem:[%s3388_s19 + $0x230] sm:$0xff] }
 0x14f   : > { %6919 = vst [vmem:[#allocation120_spill] sm:$0xff] %v5446_v12  ;;  %1985 = vmatpush2.msra.mxu1 %v1984_v8  ;;  %v2037_v53 = vsub.f32 %v5359_v6, %v6920_v30  ;;  %v5459_v8 = vand.u32 4294901760, %v275_v29  ;;  %v5463_v52 = vsub.f32 %v284_v24, %v5415_v11  ;;  %1708 = vmatpush2.msra.mxu0 %v5276_v33  ;;  %v2032_v30 = vand.u32 4294901760, %v5430_v57  ;;  %v268_v57 = vld [vmem:[%s3388_s19 + $0x218] sm:$0xff] }
 0x150   : > { %6921 = vst [vmem:[#allocation121_spill] sm:$0xff] %v5453_v46  ;;  %1991 = vmatprep.subr.mxu1 %v1990_v43  ;;  %v2044_v45 = vand.u32 4294901760, %v5435_v38  ;;  %v5468_v20 = vand.u32 4294901760, %v276_v42  ;;  %1710 = vmatprep.subr.mxu0 %v5330_v26  ;;  %v6923_v1 = vand.u32 4294901760, %v5394_v15  ;;  %v5477_v33 = vsub.f32 %v279_v17, %v5442_v41  ;;  %v267_v17 = vld [vmem:[%s3388_s19 + $0x210] sm:$0xff] }
 0x151   : > { %6922 = vst [vmem:[#allocation122_spill] sm:$0xff] %v5463_v52  ;;  %1997 = vmatpush2.msra.mxu1 %v1996_v39  ;;  %v5482_v38 = vsub.f32 %v280_v63, %v5439_v34  ;;  %1712 = vmatpush2.msra.mxu0 %v5316_v61  ;;  %v2038_v43 = vand.u32 4294901760, %v2037_v53  ;;  %v6924_v26 = vand.u32 4294901760, %v5364_v31  ;;  %v5488_v27 = vand.u32 4294901760, %v272_v36 }
 0x152   : > { %2003 = vmatprep.subr.mxu1 %v2002_v18  ;;  %v2049_v24 = vsub.f32 %v5394_v15, %v6923_v1  ;;  %1714 = vmatprep.subr.mxu0 %v5354_v47  ;;  %v6925_v39 = vand.u32 4294901760, %v5418_v5  ;;  %v5497_v61 = vsub.f32 %v275_v29, %v5459_v8  ;;  %v5499_v53 = vand.u32 4294901760, %v271_v40 }
 0x153   : > { %2009 = vmatpush2.msra.mxu1 %v2008_v28  ;;  %v2055_v18 = vsub.f32 %v5364_v31, %v6924_v26  ;;  %1716 = vmatpush2.msra.mxu0 %v5343_v21  ;;  %v6927_v26 = vand.u32 4294901760, %v5389_v35  ;;  %v5506_v47 = vand.u32 4294901760, %v268_v57  ;;  %v6929_v28 = vand.u32 4294901760, %v5446_v12 }
 0x154   : > { %2015 = vmatprep.subr.mxu1 %v2014_v7  ;;  %v2061_v63 = vsub.f32 %v5418_v5, %v6925_v39  ;;  %6926 = vst [vmem:[#allocation123_spill] sm:$0xff] %v5497_v61  ;;  %v5510_v39 = vsub.f32 %v276_v42, %v5468_v20  ;;  %1718 = vmatprep.subr.mxu0 %v5391_v56  ;;  %v2050_v29 = vand.u32 4294901760, %v2049_v24  ;;  %v6930_v7 = vand.u32 4294901760, %v5425_v9 }
 0x155   : > { %2021 = vmatpush2.msra.mxu1 %v2020_v60  ;;  %v2067_v1 = vsub.f32 %v5389_v35, %v6927_v26  ;;  %v2073_v21 = vsub.f32 %v5446_v12, %v6929_v28  ;;  %v5516_v60 = vand.u32 4294901760, %v267_v17  ;;  %1720 = vmatpush2.msra.mxu0 %v5381_v55  ;;  %v2056_v26 = vand.u32 4294901760, %v2055_v18 }
 0x156   : > { %6928 = vst [vmem:[#allocation124_spill] sm:$0xff] %v5510_v39  ;;  %2027 = vmatprep.subr.mxu1 %v2026_v13  ;;  %v2079_v42 = vsub.f32 %v5425_v9, %v6930_v7  ;;  %v5524_v56 = vsub.f32 %v272_v36, %v5488_v27  ;;  %1722 = vmatprep.subr.mxu0 %v5415_v11  ;;  %v2062_v13 = vand.u32 4294901760, %v2061_v63  ;;  %v6931_v28 = vand.u32 4294901760, %v5463_v52 }
 0x157   : > { %2033 = vmatpush2.msra.mxu1 %v2032_v30  ;;  %v5528_v24 = vsub.f32 %v271_v40, %v5499_v53  ;;  %1724 = vmatpush2.msra.mxu0 %v5404_v2  ;;  %v2068_v18 = vand.u32 4294901760, %v2067_v1  ;;  %v6932_v36 = vand.u32 4294901760, %v5453_v46  ;;  %v5540_v63 = vsub.f32 %v268_v57, %v5506_v47 }
 0x158   : > { %2039 = vmatprep.subr.mxu1 %v2038_v43  ;;  %v2085_v5 = vsub.f32 %v5463_v52, %v6931_v28  ;;  %1726 = vmatprep.subr.mxu0 %v5439_v34  ;;  %v2074_v40 = vand.u32 4294901760, %v2073_v21  ;;  %v5544_v28 = vsub.f32 %v267_v17, %v5516_v60  ;;  %v6934_v30 = vand.u32 4294901760, %v5482_v38 }
 0x159   : > { %2045 = vmatpush2.msra.mxu1 %v2044_v45  ;;  %v2091_v7 = vsub.f32 %v5453_v46, %v6932_v36  ;;  %1728 = vmatpush2.msra.mxu0 %v5442_v41  ;;  %v2080_v36 = vand.u32 4294901760, %v2079_v42  ;;  %v6353_v57 = vand.u32 4294901760, %v5524_v56  ;;  %v6935_v21 = vand.u32 4294901760, %v5477_v33 }
 0x15a   : > { %2051 = vmatprep.subr.mxu1 %v2050_v29  ;;  %6933 = vst [vmem:[#allocation125_spill] sm:$0xff] %v5544_v28  ;;  %v2097_v45 = vsub.f32 %v5482_v38, %v6934_v30  ;;  %1730 = vmatprep.subr.mxu0 %v5468_v20  ;;  %v2086_v29 = vand.u32 4294901760, %v2085_v5  ;;  %v6936_v1 = vand.u32 4294901760, %v5510_v39  ;;  %v6355_v42 = vand.u32 4294901760, %v5540_v63 }
 0x15b   : > { %2057 = vmatpush2.msra.mxu1 %v2056_v26  ;;  %v2103_v17 = vsub.f32 %v5477_v33, %v6935_v21  ;;  %1732 = vmatpush2.msra.mxu0 %v5459_v8  ;;  %v2092_v30 = vand.u32 4294901760, %v2091_v7  ;;  %v6354_v43 = vand.u32 4294901760, %v5544_v28 }
 0x15c   : > { %2063 = vmatprep.subr.mxu1 %v2062_v13  ;;  %v2109_v26 = vsub.f32 %v5510_v39, %v6936_v1  ;;  %1734 = vmatprep.subr.mxu0 %v5488_v27  ;;  %v2098_v5 = vand.u32 4294901760, %v2097_v45  ;;  %v6937_v13 = vand.u32 4294901760, %v5497_v61 }
 0x15d   : > { %2069 = vmatpush2.msra.mxu1 %v2068_v18  ;;  %1736 = vmatpush2.msra.mxu0 %v5499_v53  ;;  %v2121_v18 = vsub.f32 %v5524_v56, %v6353_v57  ;;  %v2104_v7 = vand.u32 4294901760, %v2103_v17  ;;  %v6940_v17 = vld [vmem:[#allocation109_spill] sm:$0xff] }
 0x15e   : > { %2075 = vmatprep.subr.mxu1 %v2074_v40  ;;  %v2115_v21 = vsub.f32 %v5497_v61, %v6937_v13  ;;  %1738 = vmatprep.subr.mxu0 %v5506_v47  ;;  %v6938_v40 = vand.u32 4294901760, %v5528_v24  ;;  %v2110_v1 = vand.u32 4294901760, %v2109_v26  ;;  %v6939_v13 = vld [vmem:[#allocation108_spill] sm:$0xff] }
 0x15f   : > { %2081 = vmatpush2.msra.mxu1 %v2080_v36  ;;  %1740 = vmatpush2.msra.mxu0 %v5516_v60  ;;  %v2133_v36 = vsub.f32 %v5540_v63, %v6355_v42  ;;  %v6956_v42 = vld [vmem:[#allocation13_spill] sm:$0xff] }
 0x160   : > { %2087 = vmatprep.subr.mxu1 %v2086_v29  ;;  %v2127_v45 = vsub.f32 %v5528_v24, %v6938_v40  ;;  %1746 = vmatprep.mubr.f32.mxu0 %v6939_v13  ;;  %v2116_v57 = vand.u32 4294901760, %v2115_v21  ;;  %v2139_v29 = vsub.f32 %v5544_v28, %v6354_v43  ;;  %v2122_v40 = vand.u32 4294901760, %v2121_v18  ;;  %v6941_v21 = vld [vmem:[#allocation52_spill] sm:$0xff]  ;;  %v6943_v18 = vld [vmem:[#allocation58_spill] sm:$0xff] }
 0x161   : > { %2093 = vmatpush2.msra.mxu1 %v2092_v30  ;;  %2153 = vmatprep.subr.mxu0 %v4627_v62  ;;  %v2134_v26 = vand.u32 4294901760, %v2133_v36  ;;  %v6942_v13 = vld [vmem:[#allocation48_spill] sm:$0xff]  ;;  %v6948_v36 = vld [vmem:[#allocation11_spill] sm:$0xff] }
 0x162   : > { %2099 = vmatprep.subr.mxu1 %v2098_v5  ;;  %1752 = vmatmul.mubr.f32.vlgmr.msra.gmra.mxu0 %v6940_v17  ;;  %v2128_v30 = vand.u32 4294901760, %v2127_v45  ;;  %v2140_v5 = vand.u32 4294901760, %v2139_v29  ;;  %v6946_v45 = vld [vmem:[#allocation66_spill] sm:$0xff]  ;;  %v6950_v17 = vld [vmem:[#allocation29_spill] sm:$0xff]  ;;  %v6955_v43 = vld [vmem:[#allocation16_spill] sm:$0xff] }
 0x163   : > { %2105 = vmatpush2.msra.mxu1 %v2104_v7  ;;  %2156 = vmatpush1.msra.mxu0 %v4623_v19  ;;  %v6944_v7 = vld [vmem:[#allocation60_spill] sm:$0xff]  ;;  %v6949_v29 = vld [vmem:[#allocation74_spill] sm:$0xff] }
 0x164   : > { %2111 = vmatprep.subr.mxu1 %v2110_v1  ;;  %2159 = vmatprep.subr.mxu0 %v4641_v51  ;;  %v6947_v1 = vld [vmem:[#allocation78_spill] sm:$0xff] }
 0x165   : > { %2117 = vmatpush2.msra.mxu1 %v2116_v57  ;;  %2162 = vmatpush1.msra.mxu0 %v4647_v25  ;;  %v6945_v57 = vld [vmem:[#allocation68_spill] sm:$0xff] }
 0x166   : > { %2123 = vmatprep.subr.mxu1 %v2122_v40  ;;  %2165 = vmatprep.subr.mxu0 %v6941_v21  ;;  %v6951_v40 = vld [vmem:[#allocation92_spill] sm:$0xff] }
 0x167   : > { %2129 = vmatpush2.msra.mxu1 %v2128_v30  ;;  %2168 = vmatpush1.msra.mxu0 %v6942_v13  ;;  %v6952_v30 = vld [vmem:[#allocation12_spill] sm:$0xff] }
 0x168   : > { %2135 = vmatprep.subr.mxu1 %v2134_v26  ;;  %2171 = vmatprep.subr.mxu0 %v6943_v18  ;;  %v6953_v26 = vld [vmem:[#allocation90_spill] sm:$0xff] }
 0x169   : > { %2141 = vmatpush2.msra.mxu1 %v2140_v5  ;;  %2174 = vmatpush1.msra.mxu0 %v6944_v7  ;;  %v6954_v5 = vld [vmem:[#allocation31_spill] sm:$0xff] }
 0x16a   : > { %2145 = vmatmul.mubr.f32.vlgmr.msra.gmra.mxu1 %v6776_v59  ;;  %2177 = vmatprep.subr.mxu0 %v6945_v57  ;;  %v6957_v59 = vld [vmem:[#allocation15_spill] sm:$0xff] }
 0x16b   : > { %2355 = vmatprep.subr.mxu1 %v4599_v0  ;;  %2180 = vmatpush1.msra.mxu0 %v6946_v45 }
 0x16c   : > { %2357 = vmatpush1.msra.mxu1 %v4601_v3  ;;  %2183 = vmatprep.subr.mxu0 %v6947_v1 }
 0x16d   : > { %2359 = vmatprep.subr.mxu1 %v6948_v36  ;;  %2186 = vmatpush1.msra.mxu0 %v6949_v29  ;;  %v6959_v36 = vld [vmem:[#allocation41_spill] sm:$0xff]  ;;  %v6960_v29 = vld [vmem:[#allocation54_spill] sm:$0xff] }
 0x16e   : > { %2361 = vmatpush1.msra.mxu1 %v6950_v17  ;;  %2189 = vmatprep.subr.mxu0 %v6951_v40  ;;  %v6961_v17 = vld [vmem:[#allocation17_spill] sm:$0xff] }
 0x16f   : > { %2363 = vmatprep.subr.mxu1 %v6952_v30  ;;  %2192 = vmatpush1.msra.mxu0 %v6953_v26  ;;  %v6962_v30 = vld [vmem:[#allocation20_spill] sm:$0xff] }
 0x170   : > { %2365 = vmatpush1.msra.mxu1 %v6954_v5  ;;  %2195 = vmatprep.subr.mxu0 %v6955_v43  ;;  %v6963_v26 = vld [vmem:[#allocation64_spill] sm:$0xff]  ;;  %v6964_v5 = vld [vmem:[#allocation19_spill] sm:$0xff]  ;;  %v6965_v43 = vld [vmem:[#allocation62_spill] sm:$0xff] }
 0x171   : > { %2367 = vmatprep.subr.mxu1 %v6956_v42  ;;  %2198 = vmatpush1.msra.mxu0 %v6957_v59  ;;  %v6966_v42 = vld [vmem:[#allocation49_spill] sm:$0xff]  ;;  %v6967_v59 = vld [vmem:[#allocation70_spill] sm:$0xff] }
 0x172   : > { %2369 = vmatpush1.msra.mxu1 %v6958_v37  ;;  %2201 = vmatprep.subr.mxu0 %v6959_v36  ;;  %v6968_v37 = vld [vmem:[#allocation21_spill] sm:$0xff]  ;;  %v6969_v36 = vld [vmem:[#allocation72_spill] sm:$0xff] }
 0x173   : > { %2371 = vmatprep.subr.mxu1 %v6960_v29  ;;  %2204 = vmatpush1.msra.mxu0 %v6961_v17 }
 0x174   : > { %2373 = vmatpush1.msra.mxu1 %v4675_v48  ;;  %2207 = vmatprep.subr.mxu0 %v6962_v30  ;;  %v6970_v48 = vld [vmem:[#allocation23_spill] sm:$0xff]  ;;  %v6971_v30 = vld [vmem:[#allocation76_spill] sm:$0xff] }
 0x175   : > { %2375 = vmatprep.subr.mxu1 %v6963_v26  ;;  %2210 = vmatpush1.msra.mxu0 %v6964_v5  ;;  %v6972_v26 = vld [vmem:[#allocation57_spill] sm:$0xff]  ;;  %v6973_v5 = vld [vmem:[#allocation14_spill] sm:$0xff] }
 0x176   : > { %2377 = vmatpush1.msra.mxu1 %v6965_v43  ;;  %2213 = vmatprep.subr.mxu0 %v6966_v42  ;;  %v6974_v43 = vld [vmem:[#allocation25_spill] sm:$0xff]  ;;  %v6975_v42 = vld [vmem:[#allocation35_spill] sm:$0xff] }
 0x177   : > { %2379 = vmatprep.subr.mxu1 %v6967_v59  ;;  %2216 = vmatpush1.msra.mxu0 %v6968_v37  ;;  %v6976_v37 = vld [vmem:[#allocation39_spill] sm:$0xff] }
 0x178   : > { %2381 = vmatpush1.msra.mxu1 %v6969_v36  ;;  %2219 = vmatprep.subr.mxu0 %v4960_v22  ;;  %v6977_v22 = vld [vmem:[#allocation37_spill] sm:$0xff] }
 0x179   : > { %2383 = vmatprep.subr.mxu1 %v4775_v23  ;;  %2222 = vmatpush1.msra.mxu0 %v6970_v48  ;;  %v6978_v23 = vld [vmem:[#allocation65_spill] sm:$0xff]  ;;  %v6979_v48 = vld [vmem:[#allocation18_spill] sm:$0xff] }
 0x17a   : > { %2385 = vmatpush1.msra.mxu1 %v6971_v30  ;;  %2225 = vmatprep.subr.mxu0 %v6972_v26  ;;  %v6980_v30 = vld [vmem:[#allocation30_spill] sm:$0xff]  ;;  %v6981_v26 = vld [vmem:[#allocation43_spill] sm:$0xff] }
 0x17b   : > { %2387 = vmatprep.subr.mxu1 %v6973_v5  ;;  %2228 = vmatpush1.msra.mxu0 %v6974_v43  ;;  %v6982_v43 = vld [vmem:[#allocation47_spill] sm:$0xff] }
 0x17c   : > { %2389 = vmatpush1.msra.mxu1 %v6975_v42  ;;  %2231 = vmatprep.subr.mxu0 %v5027_v14  ;;  %v6983_v42 = vld [vmem:[#allocation34_spill] sm:$0xff]  ;;  %v6984_v14 = vld [vmem:[#allocation45_spill] sm:$0xff] }
 0x17d   : > { %2391 = vmatprep.subr.mxu1 %v6976_v37  ;;  %2234 = vmatpush1.msra.mxu0 %v5006_v50  ;;  %v6985_v50 = vld [vmem:[#allocation22_spill] sm:$0xff] }
 0x17e   : > { %2393 = vmatpush1.msra.mxu1 %v6977_v22  ;;  %2237 = vmatprep.subr.mxu0 %v6978_v23  ;;  %v6986_v22 = vld [vmem:[#allocation38_spill] sm:$0xff]  ;;  %v6987_v23 = vld [vmem:[#allocation51_spill] sm:$0xff] }
 0x17f   : > { %2395 = vmatprep.subr.mxu1 %v6979_v48  ;;  %2240 = vmatpush1.msra.mxu0 %v6980_v30  ;;  %v6988_v30 = vld [vmem:[#allocation55_spill] sm:$0xff] }
 0x180   : > { %2397 = vmatpush1.msra.mxu1 %v6981_v26  ;;  %2243 = vmatprep.subr.mxu0 %v5102_v4  ;;  %v6989_v26 = vld [vmem:[#allocation42_spill] sm:$0xff]  ;;  %v6990_v4 = vld [vmem:[#allocation53_spill] sm:$0xff] }
 0x181   : > { %2399 = vmatprep.subr.mxu1 %v6982_v43  ;;  %2246 = vmatpush1.msra.mxu0 %v6983_v42  ;;  %v6991_v42 = vld [vmem:[#allocation26_spill] sm:$0xff] }
 0x182   : > { %2401 = vmatpush1.msra.mxu1 %v6984_v14  ;;  %2249 = vmatprep.subr.mxu0 %v5119_v49  ;;  %v6992_v14 = vld [vmem:[#allocation46_spill] sm:$0xff]  ;;  %v6993_v49 = vld [vmem:[#allocation59_spill] sm:$0xff] }
 0x183   : > { %2403 = vmatprep.subr.mxu1 %v6985_v50  ;;  %2252 = vmatpush2.msra.mxu0 %v6986_v22  ;;  %v6994_v22 = vld [vmem:[#allocation63_spill] sm:$0xff] }
 0x184   : > { %2405 = vmatpush1.msra.mxu1 %v6987_v23  ;;  %2255 = vmatprep.subr.mxu0 %v5169_v16  ;;  %v6995_v16 = vld [vmem:[#allocation61_spill] sm:$0xff] }
 0x185   : > { %2407 = vmatprep.subr.mxu1 %v6988_v30  ;;  %2258 = vmatpush2.msra.mxu0 %v6989_v26  ;;  %v6996_v30 = vld [vmem:[#allocation94_spill] sm:$0xff]  ;;  %v6997_v26 = vld [vmem:[#allocation32_spill] sm:$0xff] }
 0x186   : > { %2409 = vmatpush1.msra.mxu1 %v6990_v4  ;;  %2261 = vmatprep.subr.mxu0 %v5186_v58  ;;  %v6998_v4 = vld [vmem:[#allocation91_spill] sm:$0xff] }
 0x187   : > { %2411 = vmatprep.subr.mxu1 %v6991_v42  ;;  %2264 = vmatpush2.msra.mxu0 %v6992_v14  ;;  %v6999_v58 = vld [vmem:[#allocation67_spill] sm:$0xff]  ;;  %v7000_v14 = vld [vmem:[#allocation69_spill] sm:$0xff] }
 0x188   : > { %2413 = vmatpush1.msra.mxu1 %v6993_v49  ;;  %2267 = vmatprep.subr.mxu0 %v5236_v32  ;;  %v7001_v49 = vld [vmem:[#allocation95_spill] sm:$0xff]  ;;  %v7002_v32 = vld [vmem:[#allocation36_spill] sm:$0xff] }
 0x189   : > { %2415 = vmatprep.subr.mxu1 %v6994_v22  ;;  %2270 = vmatpush2.msra.mxu0 %v5192_v54  ;;  %v7003_v22 = vld [vmem:[#allocation80_spill] sm:$0xff] }
 0x18a   : > { %2417 = vmatpush1.msra.mxu1 %v6995_v16  ;;  %2273 = vmatprep.subr.mxu0 %v6996_v30  ;;  %v7004_v54 = vld [vmem:[#allocation40_spill] sm:$0xff]  ;;  %v7005_v30 = vld [vmem:[#allocation75_spill] sm:$0xff] }
 0x18b   : > { %2419 = vmatprep.subr.mxu1 %v6997_v26  ;;  %2276 = vmatpush2.msra.mxu0 %v6998_v4  ;;  %v7006_v4 = vld [vmem:[#allocation44_spill] sm:$0xff] }
 0x18c   : > { %2421 = vmatpush2.msra.mxu1 %v6999_v58  ;;  %2279 = vmatprep.subr.mxu0 %v5305_v10  ;;  %v7007_v58 = vld [vmem:[#allocation82_spill] sm:$0xff]  ;;  %v7008_v10 = vld [vmem:[#allocation77_spill] sm:$0xff] }
 0x18d   : > { %2423 = vmatprep.subr.mxu1 %v7000_v14  ;;  %2282 = vmatpush2.msra.mxu0 %v7001_v49  ;;  %v7009_v49 = vld [vmem:[#allocation50_spill] sm:$0xff] }
 0x18e   : > { %2425 = vmatpush2.msra.mxu1 %v7002_v32  ;;  %2285 = vmatprep.subr.mxu0 %v7003_v22  ;;  %v7010_v22 = vld [vmem:[#allocation85_spill] sm:$0xff] }
 0x18f   : > { %2427 = vmatprep.subr.mxu1 %v7004_v54  ;;  %2288 = vmatpush2.msra.mxu0 %v5301_v44  ;;  %v7011_v54 = vld [vmem:[#allocation118_spill] sm:$0xff]  ;;  %v7012_v44 = vld [vmem:[#allocation87_spill] sm:$0xff] }
 0x190   : > { %2429 = vmatpush2.msra.mxu1 %v7005_v30  ;;  %2291 = vmatprep.subr.mxu0 %v5359_v6  ;;  %v7013_v6 = vld [vmem:[#allocation86_spill] sm:$0xff] }
 0x191   : > { %2431 = vmatprep.subr.mxu1 %v7006_v4  ;;  %2294 = vmatpush2.msra.mxu0 %v7007_v58  ;;  %v7014_v58 = vld [vmem:[#allocation96_spill] sm:$0xff] }
 0x192   : > { %2433 = vmatpush2.msra.mxu1 %v7008_v10  ;;  %2297 = vmatprep.subr.mxu0 %v5394_v15  ;;  %v7015_v15 = vld [vmem:[#allocation93_spill] sm:$0xff] }
 0x193   : > { %2435 = vmatprep.subr.mxu1 %v7009_v49  ;;  %2300 = vmatpush2.msra.mxu0 %v5364_v31  ;;  %v7016_v31 = vld [vmem:[#allocation101_spill] sm:$0xff] }
 0x194   : > { %2437 = vmatpush2.msra.mxu1 %v7010_v22  ;;  %2303 = vmatprep.subr.mxu0 %v7011_v54  ;;  %v7017_v54 = vld [vmem:[#allocation98_spill] sm:$0xff] }
 0x195   : > { %2439 = vmatprep.subr.mxu1 %v7012_v44  ;;  %2306 = vmatpush2.msra.mxu0 %v5389_v35  ;;  %v7018_v35 = vld [vmem:[#allocation110_spill] sm:$0xff] }
 0x196   : > { %2441 = vmatpush2.msra.mxu1 %v7013_v6  ;;  %2309 = vmatprep.subr.mxu0 %v5446_v12  ;;  %v7019_v12 = vld [vmem:[#allocation107_spill] sm:$0xff] }
 0x197   : > { %2443 = vmatprep.subr.mxu1 %v7014_v58  ;;  %2312 = vmatpush2.msra.mxu0 %v5425_v9  ;;  %v7020_v9 = vld [vmem:[#allocation111_spill] sm:$0xff] }
 0x198   : > { %2445 = vmatpush2.msra.mxu1 %v7015_v15  ;;  %2315 = vmatprep.subr.mxu0 %v5463_v52  ;;  %v7021_v52 = vld [vmem:[#allocation84_spill] sm:$0xff] }
 0x199   : > { %2447 = vmatprep.subr.mxu1 %v7016_v31  ;;  %2318 = vmatpush2.msra.mxu0 %v5453_v46  ;;  %v7022_v46 = vld [vmem:[#allocation116_spill] sm:$0xff] }
 0x19a   : > { %2449 = vmatpush2.msra.mxu1 %v7017_v54  ;;  %2321 = vmatprep.subr.mxu0 %v5482_v38 }
 0x19b   : > { %2451 = vmatprep.subr.mxu1 %v7018_v35  ;;  %2324 = vmatpush2.msra.mxu0 %v5477_v33 }
 0x19c   : > { %2453 = vmatpush2.msra.mxu1 %v7019_v12  ;;  %2327 = vmatprep.subr.mxu0 %v5510_v39  ;;  %v7023_v39 = vld [vmem:[#allocation100_spill] sm:$0xff] }
 0x19d   : > { %2455 = vmatprep.subr.mxu1 %v7020_v9  ;;  %2330 = vmatpush2.msra.mxu0 %v5497_v61  ;;  %v7024_v61 = vld [vmem:[#allocation102_spill] sm:$0xff] }
 0x19e   : > { %2457 = vmatpush2.msra.mxu1 %v7021_v52  ;;  %2333 = vmatprep.subr.mxu0 %v5524_v56 }
 0x19f   : > { %2459 = vmatprep.subr.mxu1 %v7022_v46  ;;  %2336 = vmatpush2.msra.mxu0 %v5528_v24  ;;  %v7025_v46 = vand.u32 4294901760, %v4627_v62  ;;  %v7029_v62 = vand.u32 4294901760, %v6941_v21  ;;  %v7037_v21 = vand.u32 4294901760, %v6947_v1 }
 0x1a0   : > { %2461 = vmatpush2.msra.mxu1 %v5381_v55  ;;  %2339 = vmatprep.subr.mxu0 %v5540_v63  ;;  %v7026_v55 = vand.u32 4294901760, %v4623_v19  ;;  %v7030_v19 = vand.u32 4294901760, %v6942_v13  ;;  %v7038_v13 = vld [vmem:[#allocation11_spill] sm:$0xff] }
 0x1a1   : > { %2463 = vmatprep.subr.mxu1 %v5415_v11  ;;  %2342 = vmatpush2.msra.mxu0 %v5544_v28  ;;  %v7027_v28 = vand.u32 4294901760, %v4641_v51  ;;  %v7031_v51 = vand.u32 4294901760, %v6943_v18  ;;  %v7039_v18 = vld [vmem:[#allocation74_spill] sm:$0xff] }
 0x1a2   : > { %2345 = vmatprep.mubr.f32.mxu0 %v7023_v39  ;;  %2465 = vmatpush2.msra.mxu1 %v5404_v2  ;;  %v7028_v39 = vand.u32 4294901760, %v4647_v25  ;;  %v7033_v25 = vand.u32 4294901760, %v6944_v7  ;;  %v7040_v7 = vand.u32 4294901760, %v7039_v18 }
 0x1a3   : > { %2348 = vmatmul.mubr.f32.vlgmr.msra.gmra.mxu0 %v7024_v61  ;;  %2467 = vmatprep.subr.mxu1 %v5439_v34  ;;  %v7032_v61 = vld [vmem:[#allocation104_spill] sm:$0xff] }
 0x1a4   : > { %2498 = vmatprep.subr.mxu0 %v7025_v46  ;;  %2469 = vmatpush2.msra.mxu1 %v5442_v41  ;;  %v7035_v46 = vand.u32 4294901760, %v6945_v57  ;;  %v7042_v57 = vand.u32 4294901760, %v6951_v40 }
 0x1a5   : > { %2502 = vmatpush1.msra.mxu0 %v7026_v55  ;;  %2471 = vmatprep.subr.mxu1 %v5468_v20  ;;  %v7034_v55 = vld [vmem:[#allocation105_spill] sm:$0xff] }
 0x1a6   : > { %2506 = vmatprep.subr.mxu0 %v7027_v28  ;;  %2473 = vmatpush2.msra.mxu1 %v5459_v8  ;;  %v7036_v28 = vand.u32 4294901760, %v6946_v45 }
 0x1a7   : > { %2510 = vmatpush1.msra.mxu0 %v7028_v39  ;;  %2475 = vmatprep.subr.mxu1 %v5488_v27  ;;  %v7041_v39 = vld [vmem:[#allocation29_spill] sm:$0xff] }
 0x1a8   : > { %2514 = vmatprep.subr.mxu0 %v7029_v62  ;;  %2477 = vmatpush2.msra.mxu1 %v5499_v53  ;;  %v7043_v62 = vld [vmem:[#allocation12_spill] sm:$0xff] }
 0x1a9   : > { %2518 = vmatpush1.msra.mxu0 %v7030_v19  ;;  %2479 = vmatprep.subr.mxu1 %v5506_v47  ;;  %v7046_v19 = vld [vmem:[#allocation31_spill] sm:$0xff] }
 0x1aa   : > { %2522 = vmatprep.subr.mxu0 %v7031_v51  ;;  %2481 = vmatpush2.msra.mxu1 %v5516_v60  ;;  %v7049_v51 = vld [vmem:[#allocation13_spill] sm:$0xff] }
 0x1ab   : > { %2485 = vmatprep.mubr.f32.mxu1 %v7032_v61  ;;  %2526 = vmatpush1.msra.mxu0 %v7033_v25  ;;  %v7050_v61 = vld [vmem:[#allocation15_spill] sm:$0xff] }
 0x1ac   : > { %2489 = vmatmul.mubr.f32.vlgmr.msra.gmra.mxu1 %v7034_v55  ;;  %2530 = vmatprep.subr.mxu0 %v7035_v46  ;;  %v7051_v25 = vand.u32 4294901760, %v7050_v61  ;;  %v7052_v55 = vld [vmem:[#allocation33_spill] sm:$0xff] }
 0x1ad   : > { %2761 = vmatprep.subr.mxu1 %v4599_v0  ;;  %2534 = vmatpush1.msra.mxu0 %v7036_v28  ;;  %v7044_v0 = vld [vmem:[#allocation90_spill] sm:$0xff]  ;;  %v7053_v46 = vld [vmem:[#allocation41_spill] sm:$0xff]  ;;  %v7055_v28 = vand.u32 4294901760, %v6961_v17 }
 0x1ae   : > { %2763 = vmatpush1.msra.mxu1 %v4601_v3  ;;  %2538 = vmatprep.subr.mxu0 %v7037_v21  ;;  %v7045_v45 = vand.u32 4294901760, %v7044_v0  ;;  %v7047_v3 = vld [vmem:[#allocation16_spill] sm:$0xff]  ;;  %v7054_v40 = vand.u32 4294901760, %v7053_v46  ;;  %v7063_v0 = vld [vmem:[#allocation49_spill] sm:$0xff] }
 0x1af   : > { %2765 = vmatprep.subr.mxu1 %v7038_v13  ;;  %2542 = vmatpush1.msra.mxu0 %v7040_v7  ;;  %v7048_v1 = vand.u32 4294901760, %v7047_v3  ;;  %v7056_v21 = vld [vmem:[#allocation56_spill] sm:$0xff] }
 0x1b0   : > { %2767 = vmatpush1.msra.mxu1 %v7041_v39  ;;  %2546 = vmatprep.subr.mxu0 %v7042_v57  ;;  %v7057_v13 = vld [vmem:[#allocation20_spill] sm:$0xff]  ;;  %v7060_v39 = vld [vmem:[#allocation19_spill] sm:$0xff] }
 0x1b1   : > { %2769 = vmatprep.subr.mxu1 %v7043_v62  ;;  %2550 = vmatpush1.msra.mxu0 %v7045_v45  ;;  %v7058_v18 = vand.u32 4294901760, %v7057_v13  ;;  %v7059_v7 = vld [vmem:[#allocation64_spill] sm:$0xff]  ;;  %v7061_v57 = vand.u32 4294901760, %v7060_v39  ;;  %v7062_v62 = vld [vmem:[#allocation62_spill] sm:$0xff]  ;;  %v7064_v45 = vand.u32 4294901760, %v7063_v0  ;;  %v7080_v13 = vld [vmem:[#allocation27_spill] sm:$0xff] }
 0x1b2   : > { %2771 = vmatpush1.msra.mxu1 %v7046_v19  ;;  %2554 = vmatprep.subr.mxu0 %v7048_v1  ;;  %v7067_v19 = vld [vmem:[#allocation24_spill] sm:$0xff]  ;;  %v7083_v39 = vld [vmem:[#allocation65_spill] sm:$0xff]  ;;  %v7087_v0 = vld [vmem:[#allocation43_spill] sm:$0xff] }
 0x1b3   : > { %2773 = vmatprep.subr.mxu1 %v7049_v51  ;;  %2558 = vmatpush1.msra.mxu0 %v7051_v25  ;;  %v7068_v3 = vand.u32 4294901760, %v7067_v19  ;;  %v7069_v1 = vld [vmem:[#allocation88_spill] sm:$0xff]  ;;  %v7070_v51 = vld [vmem:[#allocation23_spill] sm:$0xff]  ;;  %v7092_v19 = vld [vmem:[#allocation45_spill] sm:$0xff] }
 0x1b4   : > { %2775 = vmatpush1.msra.mxu1 %v7052_v55  ;;  %2562 = vmatprep.subr.mxu0 %v7054_v40  ;;  %v7071_v61 = vand.u32 4294901760, %v7070_v51  ;;  %v7072_v25 = vld [vmem:[#allocation76_spill] sm:$0xff]  ;;  %v7073_v55 = vld [vmem:[#allocation57_spill] sm:$0xff] }
 0x1b5   : > { %2777 = vmatprep.subr.mxu1 %v6960_v29  ;;  %2566 = vmatpush1.msra.mxu0 %v7055_v28  ;;  %v7065_v29 = vld [vmem:[#allocation21_spill] sm:$0xff]  ;;  %v7074_v46 = vand.u32 4294901760, %v7073_v55  ;;  %v7077_v28 = vld [vmem:[#allocation35_spill] sm:$0xff] }
 0x1b6   : > { %2779 = vmatpush1.msra.mxu1 %v7056_v21  ;;  %2570 = vmatprep.subr.mxu0 %v7058_v18  ;;  %v7066_v17 = vand.u32 4294901760, %v7065_v29  ;;  %v7081_v18 = vand.u32 4294901760, %v7080_v13  ;;  %v7099_v55 = vld [vmem:[#allocation55_spill] sm:$0xff] }
 0x1b7   : > { %2781 = vmatprep.subr.mxu1 %v7059_v7  ;;  %2574 = vmatpush1.msra.mxu0 %v7061_v57  ;;  %v7082_v7 = vld [vmem:[#allocation37_spill] sm:$0xff]  ;;  %v7084_v57 = vand.u32 4294901760, %v7083_v39 }
 0x1b8   : > { %2783 = vmatpush1.msra.mxu1 %v7062_v62  ;;  %2578 = vmatprep.subr.mxu0 %v7064_v45  ;;  %v7088_v45 = vld [vmem:[#allocation71_spill] sm:$0xff] }
 0x1b9   : > { %2785 = vmatprep.subr.mxu1 %v6967_v59  ;;  %2582 = vmatpush1.msra.mxu0 %v7066_v17  ;;  %v7075_v59 = vld [vmem:[#allocation25_spill] sm:$0xff]  ;;  %v7089_v29 = vand.u32 4294901760, %v7088_v45  ;;  %v7118_v45 = vld [vmem:[#allocation106_spill] sm:$0xff] }
 0x1ba   : > { %2787 = vmatpush1.msra.mxu1 %v6969_v36  ;;  %2586 = vmatprep.subr.mxu0 %v7068_v3  ;;  %v7076_v40 = vand.u32 4294901760, %v7075_v59  ;;  %v7078_v36 = vld [vmem:[#allocation28_spill] sm:$0xff]  ;;  %v7093_v3 = vld [vmem:[#allocation73_spill] sm:$0xff] }
 0x1bb   : > { %2789 = vmatprep.subr.mxu1 %v7069_v1  ;;  %2590 = vmatpush1.msra.mxu0 %v7071_v61  ;;  %v7079_v21 = vand.u32 4294901760, %v7078_v36  ;;  %v7094_v1 = vand.u32 4294901760, %v7093_v3  ;;  %v7097_v61 = vld [vmem:[#allocation79_spill] sm:$0xff]  ;;  %v7102_v59 = vld [vmem:[#allocation53_spill] sm:$0xff]  ;;  %v7124_v3 = vld [vmem:[#allocation40_spill] sm:$0xff] }
 0x1bc   : > { %2791 = vmatpush1.msra.mxu1 %v7072_v25  ;;  %2594 = vmatprep.subr.mxu0 %v7074_v46  ;;  %v7098_v25 = vand.u32 4294901760, %v7097_v61 }
 0x1bd   : > { %2793 = vmatprep.subr.mxu1 %v6973_v5  ;;  %2598 = vmatpush1.msra.mxu0 %v7076_v40  ;;  %v7085_v5 = vld [vmem:[#allocation30_spill] sm:$0xff]  ;;  %v7103_v40 = vld [vmem:[#allocation81_spill] sm:$0xff] }
 0x1be   : > { %2795 = vmatpush1.msra.mxu1 %v7077_v28  ;;  %2602 = vmatprep.subr.mxu0 %v7079_v21  ;;  %v7086_v62 = vand.u32 4294901760, %v7085_v5  ;;  %v7104_v28 = vand.u32 4294901760, %v7103_v40  ;;  %v7107_v21 = vld [vmem:[#allocation59_spill] sm:$0xff] }
 0x1bf   : > { %2797 = vmatprep.subr.mxu1 %v6976_v37  ;;  %2606 = vmatpush1.msra.mxu0 %v7081_v18  ;;  %v7090_v37 = vld [vmem:[#allocation34_spill] sm:$0xff]  ;;  %v7110_v18 = vld [vmem:[#allocation63_spill] sm:$0xff] }
 0x1c0   : > { %2799 = vmatpush1.msra.mxu1 %v7082_v7  ;;  %2610 = vmatprep.subr.mxu0 %v7084_v57  ;;  %v7091_v17 = vand.u32 4294901760, %v7090_v37  ;;  %v7111_v7 = vld [vmem:[#allocation83_spill] sm:$0xff]  ;;  %v7113_v57 = vld [vmem:[#allocation94_spill] sm:$0xff] }
 0x1c1   : > { %2801 = vmatprep.subr.mxu1 %v6979_v48  ;;  %2614 = vmatpush1.msra.mxu0 %v7086_v62  ;;  %v7095_v48 = vld [vmem:[#allocation38_spill] sm:$0xff]  ;;  %v7112_v39 = vand.u32 4294901760, %v7111_v7  ;;  %v7114_v5 = vand.u32 4294901760, %v7113_v57  ;;  %v7120_v37 = vld [vmem:[#allocation95_spill] sm:$0xff]  ;;  %v7148_v7 = vand.u32 4294901760, %v5477_v33  ;;  %v7154_v33 = vld [vmem:[#allocation116_spill] sm:$0xff] }
 0x1c2   : > { %2803 = vmatpush1.msra.mxu1 %v7087_v0  ;;  %2618 = vmatprep.subr.mxu0 %v7089_v29  ;;  %v7096_v51 = vand.u32 4294901760, %v7095_v48  ;;  %v7117_v0 = vld [vmem:[#allocation67_spill] sm:$0xff]  ;;  %v7119_v29 = vand.u32 4294901760, %v7118_v45  ;;  %v7127_v48 = vld [vmem:[#allocation112_spill] sm:$0xff]  ;;  %v7157_v45 = vand.u32 4294901760, %v5540_v63 }
 0x1c3   : > { %2805 = vmatprep.subr.mxu1 %v6982_v43  ;;  %2622 = vmatpush1.msra.mxu0 %v7091_v17  ;;  %v7100_v43 = vld [vmem:[#allocation42_spill] sm:$0xff]  ;;  %v7121_v17 = vand.u32 4294901760, %v7120_v37  ;;  %v7160_v37 = vld [vmem:[#allocation97_spill] sm:$0xff] }
 0x1c4   : > { %2807 = vmatpush1.msra.mxu1 %v7092_v19  ;;  %2626 = vmatprep.subr.mxu0 %v7094_v1  ;;  %v7101_v46 = vand.u32 4294901760, %v7100_v43  ;;  %v7133_v43 = vld [vmem:[#allocation113_spill] sm:$0xff] }
 0x1c5   : > { %2809 = vmatprep.subr.mxu1 %v6985_v50  ;;  %2630 = vmatpush2.msra.mxu0 %v7096_v51  ;;  %v7105_v50 = vld [vmem:[#allocation46_spill] sm:$0xff]  ;;  %v7128_v51 = vand.u32 4294901760, %v7127_v48 }
 0x1c6   : > { %2811 = vmatpush1.msra.mxu1 %v6987_v23  ;;  %2634 = vmatprep.subr.mxu0 %v7098_v25  ;;  %v7106_v36 = vand.u32 4294901760, %v7105_v50  ;;  %v7108_v23 = vld [vmem:[#allocation89_spill] sm:$0xff]  ;;  %v862_v50 = vpop.f32.mrf.mxu1 }
 0x1c7   : > { %2813 = vmatprep.subr.mxu1 %v7099_v55  ;;  %2638 = vmatpush2.msra.mxu0 %v7101_v46  ;;  %v7109_v13 = vand.u32 4294901760, %v7108_v23  ;;  %v469_v55 = vpop.f32.mrf.mxu0  ;;  %v7134_v46 = vand.u32 4294901760, %v7133_v43 }
 0x1c8   : > { %2815 = vmatpush1.msra.mxu1 %v7102_v59  ;;  %2642 = vmatprep.subr.mxu0 %v7104_v28 }
 0x1c9   : > { %2817 = vmatprep.subr.mxu1 %v6991_v42  ;;  %2646 = vmatpush2.msra.mxu0 %v7106_v36  ;;  %v7115_v42 = vld [vmem:[#allocation91_spill] sm:$0xff] }
 0x1ca   : > { %2819 = vmatpush1.msra.mxu1 %v7107_v21  ;;  %2650 = vmatprep.subr.mxu0 %v7109_v13  ;;  %v7116_v62 = vand.u32 4294901760, %v7115_v42  ;;  %v7141_v36 = vld [vmem:[#allocation119_spill] sm:$0xff]  ;;  %v7145_v13 = vld [vmem:[#allocation121_spill] sm:$0xff]  ;;  %v7156_v42 = vld [vmem:[#allocation114_spill] sm:$0xff] }
 0x1cb   : > { %2821 = vmatprep.subr.mxu1 %v7110_v18  ;;  %2654 = vmatpush2.msra.mxu0 %v7112_v39  ;;  %v7142_v21 = vand.u32 4294901760, %v7141_v36  ;;  %v864_v18 = vpop.f32.mrf.mxu1 }
 0x1cc   : > { %2823 = vmatpush1.msra.mxu1 %v6995_v16  ;;  %2658 = vmatprep.subr.mxu0 %v7114_v5  ;;  %v7122_v16 = vld [vmem:[#allocation80_spill] sm:$0xff]  ;;  %v7151_v5 = vld [vmem:[#allocation123_spill] sm:$0xff] }
 0x1cd   : > { %2825 = vmatprep.subr.mxu1 %v6997_v26  ;;  %2662 = vmatpush2.msra.mxu0 %v7116_v62  ;;  %v7123_v19 = vand.u32 4294901760, %v7122_v16  ;;  %v7125_v26 = vld [vmem:[#allocation103_spill] sm:$0xff]  ;;  %v1206_v57 = vpop.f32.mrf.mxu1 }
 0x1ce   : > { %2827 = vmatpush2.msra.mxu1 %v7117_v0  ;;  %2666 = vmatprep.subr.mxu0 %v7119_v29  ;;  %v7126_v1 = vand.u32 4294901760, %v7125_v26  ;;  %v7158_v29 = vld [vmem:[#allocation125_spill] sm:$0xff] }
 0x1cf   : > { %2829 = vmatprep.subr.mxu1 %v7000_v14  ;;  %2670 = vmatpush2.msra.mxu0 %v7121_v17  ;;  %v7129_v14 = vld [vmem:[#allocation82_spill] sm:$0xff] }
 0x1d0   : > { %2831 = vmatpush2.msra.mxu1 %v7002_v32  ;;  %2674 = vmatprep.subr.mxu0 %v7123_v19  ;;  %v7130_v61 = vand.u32 4294901760, %v7129_v14  ;;  %v7131_v32 = vld [vmem:[#allocation117_spill] sm:$0xff] }
 0x1d1   : > { %2833 = vmatprep.subr.mxu1 %v7124_v3  ;;  %2678 = vmatpush2.msra.mxu0 %v7126_v1  ;;  %v7132_v25 = vand.u32 4294901760, %v7131_v32 }
 0x1d2   : > { %2835 = vmatpush2.msra.mxu1 %v7005_v30  ;;  %2682 = vmatprep.subr.mxu0 %v7128_v51  ;;  %v7135_v30 = vld [vmem:[#allocation118_spill] sm:$0xff] }
 0x1d3   : > { %2837 = vmatprep.subr.mxu1 %v7006_v4  ;;  %2686 = vmatpush2.msra.mxu0 %v7130_v61  ;;  %v7136_v59 = vand.u32 4294901760, %v7135_v30  ;;  %v7137_v4 = vld [vmem:[#allocation115_spill] sm:$0xff] }
 0x1d4   : > { %2839 = vmatpush2.msra.mxu1 %v7008_v10  ;;  %2690 = vmatprep.subr.mxu0 %v7132_v25  ;;  %v7138_v40 = vand.u32 4294901760, %v7137_v4  ;;  %v7139_v10 = vld [vmem:[#allocation120_spill] sm:$0xff] }
 0x1d5   : > { %2841 = vmatprep.subr.mxu1 %v7009_v49  ;;  %2694 = vmatpush2.msra.mxu0 %v7134_v46  ;;  %v7140_v28 = vand.u32 4294901760, %v7139_v10  ;;  %v471_v49 = vpop.f32.mrf.mxu0 }
 0x1d6   : > { %2843 = vmatpush2.msra.mxu1 %v7010_v22  ;;  %2698 = vmatprep.subr.mxu0 %v7136_v59  ;;  %v7143_v22 = vld [vmem:[#allocation122_spill] sm:$0xff]  ;;  %v865_v62 = vadd.f32 %v864_v18, %v471_v49 }
 0x1d7   : > { %2845 = vmatprep.subr.mxu1 %v7012_v44  ;;  %2702 = vmatpush2.msra.mxu0 %v7138_v40  ;;  %v7144_v23 = vand.u32 4294901760, %v7143_v22  ;;  %v1065_v44 = vpop.f32.mrf.mxu0 }
 0x1d8   : > { %2847 = vmatpush2.msra.mxu1 %v7013_v6  ;;  %2706 = vmatprep.subr.mxu0 %v7140_v28  ;;  %v7146_v6 = vand.u32 4294901760, %v7145_v13 }
 0x1d9   : > { %2849 = vmatprep.subr.mxu1 %v7014_v58  ;;  %2710 = vmatpush2.msra.mxu0 %v7142_v21  ;;  %v7147_v58 = vand.u32 4294901760, %v5482_v38  ;;  %v863_v38 = vadd.f32 %v862_v50, %v469_v55 }
 0x1da   : > { %2851 = vmatpush2.msra.mxu1 %v7015_v15  ;;  %2714 = vmatprep.subr.mxu0 %v7144_v23  ;;  %v7149_v15 = vld [vmem:[#allocation124_spill] sm:$0xff] }
 0x1db   : > { %2853 = vmatprep.subr.mxu1 %v7016_v31  ;;  %2718 = vmatpush2.msra.mxu0 %v7146_v6  ;;  %v7150_v39 = vand.u32 4294901760, %v7149_v15  ;;  %v1067_v31 = vpop.f32.mrf.mxu0  ;;  %v1066_v0 = vadd.f32 %v1065_v44, %v863_v38 }
 0x1dc   : > { %2855 = vmatpush2.msra.mxu1 %v7017_v54  ;;  %2722 = vmatprep.subr.mxu0 %v7147_v58  ;;  %v7152_v54 = vand.u32 4294901760, %v7151_v5  ;;  %v1068_v17 = vadd.f32 %v1067_v31, %v865_v62 }
 0x1dd   : > { %2857 = vmatprep.subr.mxu1 %v7018_v35  ;;  %2726 = vmatpush2.msra.mxu0 %v7148_v7  ;;  %v7153_v35 = vand.u32 4294901760, %v5524_v56  ;;  %v7159_v56 = vand.u32 4294901760, %v7158_v29  ;;  %v1207_v16 = vadd.f32 %v1206_v57, %v1066_v0 }
 0x1de   : > { %2859 = vmatpush2.msra.mxu1 %v7019_v12  ;;  %2730 = vmatprep.subr.mxu0 %v7150_v39  ;;  %v7155_v12 = vand.u32 4294901760, %v5528_v24  ;;  %v7161_v24 = vld [vmem:[#allocation99_spill] sm:$0xff] }
 0x1df   : > { %2861 = vmatprep.subr.mxu1 %v7020_v9  ;;  %2734 = vmatpush2.msra.mxu0 %v7152_v54  ;;  %v1471_v9 = vpop.f32.mrf.mxu0 }
 0x1e0   : > { %2863 = vmatpush2.msra.mxu1 %v7021_v52  ;;  %2738 = vmatprep.subr.mxu0 %v7153_v35  ;;  %v1208_v52 = vpop.f32.mrf.mxu1 }
 0x1e1   : > { %2865 = vmatprep.subr.mxu1 %v7154_v33  ;;  %2742 = vmatpush2.msra.mxu0 %v7155_v12  ;;  %v1473_v19 = vpop.f32.mrf.mxu0  ;;  %v1209_v63 = vadd.f32 %v1208_v52, %v1068_v17 }
 0x1e2   : > { %2867 = vmatpush2.msra.mxu1 %v7156_v42  ;;  %2746 = vmatprep.subr.mxu0 %v7157_v45 }
 0x1e3   : > { %2869 = vmatprep.subr.mxu1 %v5415_v11  ;;  %2750 = vmatpush2.msra.mxu0 %v7159_v56  ;;  %v1472_v11 = vadd.f32 %v1471_v9, %v1207_v16  ;;  %v1608_v3 = vpop.f32.mrf.mxu1  ;;  %v1474_v26 = vadd.f32 %v1473_v19, %v1209_v63 }
 0x1e4   : > { %2752 = vmatprep.mubr.f32.mxu0 %v7160_v37  ;;  %2871 = vmatpush2.msra.mxu1 %v5404_v2 }
 0x1e5   : > { %2754 = vmatmul.mubr.f32.vlgmr.msra.gmra.mxu0 %v7161_v24  ;;  %2873 = vmatprep.subr.mxu1 %v5439_v34  ;;  %v1609_v1 = vadd.f32 %v1608_v3, %v1472_v11  ;;  %v1610_v2 = vpop.f32.mrf.mxu1 }
 0x1e6   : > { %2889 = vmatprep.mubr.f32.mxu1 %v7160_v37  ;;  %2875 = vmatpush2.msra.mxu1 %v5442_v41  ;;  %v1611_v34 = vadd.f32 %v1610_v2, %v1474_v26 }
 0x1e7   : > { %2877 = vmatprep.subr.mxu1 %v5468_v20  ;;  %2897 = vst [vmem:[%s5912_s20] sm:$0xff] %v1609_v1 }
 0x1e8   : > { %2879 = vmatpush2.msra.mxu1 %v5459_v8  ;;  %2898 = vst [vmem:[%s5912_s20 + $0x8] sm:$0xff] %v1611_v34 }
 0x1e9   : > { %2881 = vmatprep.subr.mxu1 %v5488_v27 }
 0x1ea   : > { %2883 = vmatpush2.msra.mxu1 %v5499_v53 }
 0x1eb   : > { %2885 = vmatprep.subr.mxu1 %v5506_v47 }
 0x1ec   : > { %2887 = vmatpush2.msra.mxu1 %v5516_v60 }
 0x1ed   : > { %2891 = vmatmul.mubr.f32.vlgmr.msra.gmra.mxu1 %v7161_v24 }
 0x222   : > { %v1753_v20 = vpop.f32.mrf.mxu0 }
 0x224   : > { %v1755_v41 = vpop.f32.mrf.mxu0 }
 0x22a   : > { %v2146_v8 = vpop.f32.mrf.mxu1 }
 0x22b   : > { %v2147_v14 = vadd.f32 %v2146_v8, %v1753_v20 }
 0x22c   : > { %v2148_v53 = vpop.f32.mrf.mxu1 }
 0x22d   : > { %v2149_v32 = vadd.f32 %v2148_v53, %v1755_v41 }
 0x263   : > { %v2349_v27 = vpop.f32.mrf.mxu0 }
 0x264   : > { %v2350_v25 = vadd.f32 %v2349_v27, %v2147_v14 }
 0x265   : > { %v2351_v48 = vpop.f32.mrf.mxu0 }
 0x266   : > { %v2352_v60 = vadd.f32 %v2351_v48, %v2149_v32 }
 0x26c   : > { %v2490_v51 = vpop.f32.mrf.mxu1 }
 0x26d   : > { %v2491_v55 = vadd.f32 %v2490_v51, %v2350_v25 }
 0x26e   : > { %v2492_v47 = vpop.f32.mrf.mxu1 }
 0x26f   : > { %v2493_v46 = vadd.f32 %v2492_v47, %v2352_v60 }
 0x2a5   : > { %v2755_v61 = vpop.f32.mrf.mxu0 }
 0x2a6   : > { %v2756_v30 = vadd.f32 %v2755_v61, %v2491_v55 }
 0x2a7   : > { %v2757_v43 = vpop.f32.mrf.mxu0 }
 0x2a8   : > { %v2758_v4 = vadd.f32 %v2757_v43, %v2493_v46 }
 0x2ad   : > { %v2892_v59 = vpop.f32.mrf.mxu1 }
 0x2ae   : > { %v2893_v40 = vadd.f32 %v2892_v59, %v2756_v30 }
 0x2af   : > { %v2894_v10 = vpop.f32.mrf.mxu1 }
 0x2b0   : > { %2899 = vst [vmem:[%s5912_s20 + $0x10] sm:$0xff] %v2893_v40  ;;  %v2895_v28 = vadd.f32 %v2894_v10, %v2758_v4 }
 0x2b2   : > { %2900 = vst [vmem:[%s5912_s20 + $0x18] sm:$0xff] %v2895_v28 }
 0x2b3   : > { %3175 = shalt.err (!%p3172_p9)
}
 0x2b4   : > { %s3176_s5 = scalar_lea.hbm %s2916_s30, 512  ;;  %s3180_s29 = scalar_lea.hbm %s5964_s2, 1024 }
 0x2b5   : > { %p3177_p0 = scmp.ne.s32.totalorder %s2916_s30, %s3176_s5  ;;  %p3181_p10 = scmp.lt.s32.totalorder %s2916_s30, %s5964_s2 }
 0x2b6   : > { %p3182_p11 = scmp.lt.s32.totalorder %s3180_s29, %s3176_s5 }
 0x2b7   : > { %p3178_p2 = pnand %p3177_p0, %p7162_p13 }
 0x2b8   : > { %p3183_p4 = por %p3182_p11, %p3181_p10 }
 0x2b9   : > { %p3179_p6 = pneg %p3178_p2 }
 0x2bb   : > { %p3184_p3 = pnand %p3183_p4, %p3179_p6 }
 0x2bd   : > { %3187 = shalt.err (!%p3184_p3)
}
 0x2be   : > { %3038 = dma.vmem_to_hbm [thread:$0]  (%p7162_p13), %s2919_s26, 512, %s2916_s30, %s2902_s25  }
 0x2bf PF: > { %s2930_s19 = sand.u32 1, %s3226_s9   ;;  %p7163_p5 = scmp.ne.s32.totalorder %s6387_s22, 0 }
 0x2c0   : > { %p7164_p1 = scmp.ge.s32.totalorder %s3246_s14, 2  ;;  %s2931_s18 = scalar_lea.sflag [#allocation4], %s2930_s19 }
 0x2c2   : > { %p3049_p12 = pnand %p7164_p1, %p7163_p5 }
 0x2c4   : > { %p3050_p7 = pneg %p3049_p12 }
 0x2c6   : > { %3221 = dma.done.wait (%p3050_p7), %s2931_s18, 512  }
 0x2c7   : > { %3223 = vsyncadd (%p3050_p7), %s2931_s18, 4294966784  ;;  %s19_s14 = sadd.s32 1, %s3246_s14   ;;  %s7165_s9 = smov %s3230_s10 }
 0x2c8   : > { %p16_p8 = scmp.ge.s32.totalorder %s19_s14, 4   ;;  %s7166_s10 = smov %s3234_s11 }
 0x2c9   : > { %s7167_s11 = smov %s3371_s27  ;;  %s7168_s12 = smov %s3242_s13 }
 0x2ca   : > { %s7169_s13 = smov %s7171_s28  ;;  %18 = sbr.rel (!%p16_p8) target bundleno = 7 (0x7), region = 79 }
 0x2cf   :  { %2936 = vsyncpa [#allocation3], 1 }
 0x2d0   :  { %2938 = vsyncpa [#allocation3 + $0x1], 1 }
 0x2d1   :  { %2939 = vsyncpa [#allocation6], 1 }
 0x2d2   :  { %2941 = vsyncpa [#allocation6 + $0x1], 1 }
 0x2d3   :  { %2942 = vsyncpa [#allocation4], 1 }
 0x2d4   :  { %2944 = vsyncpa [#allocation4 + $0x1], 1 }

</bundles_post_ra>
